<compile_context>
chip_gen: v7x
topology: tpu7x:2x2x1
jax: 0.10.0
libtpu: 0.0.40
codegen_flags: <defaults>
</compile_context>

<pallas_src>
import functools

import numpy as np
import jax
import jax.numpy as jnp
from jax.experimental import pallas as pl
from jax.experimental.pallas import tpu as pltpu


_K = 3  # every conv in the model is 3x3


# ---------------------------------------------------------------------------
# 0/1 geometry matrices (weight independent, numpy, cached per shape).
# ---------------------------------------------------------------------------
@functools.lru_cache(maxsize=None)
def _conv_select(h, w, k, stride, pad):
    """S[t, ih*w+iw, oh*OW+ow] = 1 iff input (ih,iw) feeds output (oh,ow) at tap t."""
    oh = (h + 2 * pad - k) // stride + 1
    ow = (w + 2 * pad - k) // stride + 1
    s = np.zeros((k * k, h * w, oh * ow), np.float32)
    for kh in range(k):
        for kw in range(k):
            t = kh * k + kw
            for io in range(oh):
                for jo in range(ow):
                    ii = io * stride + kh - pad
                    ji = jo * stride + kw - pad
                    if 0 <= ii < h and 0 <= ji < w:
                        s[t, ii * w + ji, io * ow + jo] = 1.0
    return s, oh, ow


@functools.lru_cache(maxsize=None)
def _deconv_select(h, w, k, stride, pad, out_pad):
    """ConvTranspose2d scatter geometry: output (io,jo) = (ii*s+kh-p, ji*s+kw-p)."""
    oh = (h - 1) * stride - 2 * pad + k + out_pad
    ow = (w - 1) * stride - 2 * pad + k + out_pad
    s = np.zeros((k * k, h * w, oh * ow), np.float32)
    for kh in range(k):
        for kw in range(k):
            t = kh * k + kw
            for ii in range(h):
                for ji in range(w):
                    io = ii * stride + kh - pad
                    jo = ji * stride + kw - pad
                    if 0 <= io < oh and 0 <= jo < ow:
                        s[t, ii * w + ji, io * ow + jo] = 1.0
    return s, oh, ow


# ---------------------------------------------------------------------------
# Offline folding of geometry + channel mix into one dense matrix per layer.
# ---------------------------------------------------------------------------
def build_folded_layers(params, h, w, mxu_dtype=jnp.bfloat16):
    k = _K
    s1, h1, w1 = _conv_select(h, w, k, 2, 1)          # Conv2d(1, 16, 3, s2, p1)
    s2, h2, w2 = _conv_select(h1, w1, k, 2, 1)        # Conv2d(16, 32, 3, s2, p1)
    s3, h3, w3 = _deconv_select(h2, w2, k, 2, 1, 1)   # ConvT(32, 16, 3, s2, p1, op1)
    s4, h4, w4 = _deconv_select(h3, w3, k, 2, 1, 1)   # ConvT(16, 1, 3, s2, p1, op1)

    # Per-tap channel-mix matrices, tap order t = kh*3 + kw (matches S).
    w1t = params["w1"].transpose(2, 3, 0, 1).reshape(k * k, 16, 1)    # (t, cout, cin)
    w2t = params["w2"].transpose(2, 3, 0, 1).reshape(k * k, 32, 16)
    w3t = params["w3"].transpose(2, 3, 1, 0).reshape(k * k, 16, 32)   # ConvT: swap io
    w4t = params["w4"].transpose(2, 3, 1, 0).reshape(k * k, 1, 16)

    def fold(s_np, w_tap, cin, cout, bias):
        hw_in, hw_out = s_np.shape[1], s_np.shape[2]
        m = jnp.einsum("tpq,toc->cpoq", jnp.asarray(s_np), w_tap,
                       precision=jax.lax.Precision.HIGHEST)
        m = m.reshape(cin * hw_in, cout * hw_out).astype(mxu_dtype)
        b = jnp.broadcast_to(bias.astype(jnp.float32)[:, None],
                             (cout, hw_out)).reshape(1, cout * hw_out)
        return m, b

    layers = [
        (*fold(s1, w1t, 1, 16, params["b1"]), "relu"),
        (*fold(s2, w2t, 16, 32, params["b2"]), "relu"),
        (*fold(s3, w3t, 32, 16, params["b3"]), "relu"),
        (*fold(s4, w4t, 16, 1, params["b4"]), "tanh"),
    ]
    return layers, (h4, w4)


# ---------------------------------------------------------------------------
# Fused kernel: one batch tile per grid step, all 4 layers in VMEM.
# ---------------------------------------------------------------------------
def _autoenkoder_kernel(x_ref,
                        m1_ref, b1_ref, m2_ref, b2_ref,
                        m3_ref, b3_ref, m4_ref, b4_ref,
                        o_ref):
    def layer(h, m_ref, b_ref, act):
        # bf16 (or f32) operands on the MXU, f32 accumulation.
        y = jnp.dot(h.astype(m_ref.dtype), m_ref[...],
                    preferred_element_type=jnp.float32)
        y = y + b_ref[...]                          # f32 bias on VPU
        return jnp.maximum(y, 0.0) if act == "relu" else jnp.tanh(y)

    h = x_ref[...]                                  # (B_TILE, hw_in) f32 slab
    h = layer(h, m1_ref, b1_ref, "relu")            # (B, 16*hw/4)
    h = layer(h, m2_ref, b2_ref, "relu")            # (B, 32*hw/16)
    h = layer(h, m3_ref, b3_ref, "relu")            # (B, 16*hw/4)
    o_ref[...] = layer(h, m4_ref, b4_ref, "tanh")   # (B, hw)


def _resident_spec(arr):
    # Constant index_map -> the block is VMEM-resident across all grid steps.
    zeros = (0,) * arr.ndim
    return pl.BlockSpec(tuple(arr.shape), lambda i, _z=zeros: _z)


def _round_up(a, b):
    return -(-a // b) * b


# ---------------------------------------------------------------------------
# SiecAutoenkoder forward (NCHW in / NCHW out, PyTorch semantics).
# ---------------------------------------------------------------------------
def siec_autoenkoder_forward(params, x, *, b_tile=128, mxu_dtype=jnp.bfloat16):
    n, c, h, w = x.shape
    assert c == 1, "SiecAutoenkoder expects single-channel input"

    layers, (h_out, w_out) = build_folded_layers(params, h, w, mxu_dtype)
    side = []
    for m, b, _ in layers:
        side.extend([m, b])

    # TODO(synk): folded matrices grow as O((H*W)^2); for inputs much larger
    # than ~32x32 add an output-pixel grid axis (tile M_l columns) instead of
    # keeping them fully VMEM-resident.
    folded_bytes = sum(a.size * a.dtype.itemsize for a in side)
    assert folded_bytes <= 16 * 1024 * 1024, (
        "folded weights too large for VMEM residency; tile over output pixels")

    hw_in = c * h * w
    hw_out = h_out * w_out

    x_flat = x.reshape(n, hw_in).astype(jnp.float32)

    # Batch tiling: sublane-full (multiple of 8) blocks, as large as possible.
    n_pad = _round_up(n, 8)
    b_block = min(b_tile, n_pad)
    n_pad = _round_up(n_pad, b_block)
    if n_pad != n:
        x_flat = jnp.pad(x_flat, ((0, n_pad - n), (0, 0)))

    in_specs = [pl.BlockSpec((b_block, hw_in), lambda i: (i, 0))]
    in_specs += [_resident_spec(a) for a in side]

    out = pl.pallas_call(
        _autoenkoder_kernel,
        out_shape=jax.ShapeDtypeStruct((n_pad, hw_out), jnp.float32),
        grid=(n_pad // b_block,),
        in_specs=in_specs,
        out_specs=pl.BlockSpec((b_block, hw_out), lambda i: (i, 0)),
        compiler_params=pltpu.CompilerParams(
            dimension_semantics=("parallel",),
            vmem_limit_bytes=32 * 1024 * 1024),
    )(x_flat, *side)

    return out[:n].reshape(n, 1, h_out, w_out)


# ---------------------------------------------------------------------------
# Parameter init (PyTorch-style uniform) and references.
# ---------------------------------------------------------------------------
def init_params(key):
    def uniform(key, shape, fan_in):
        bound = 1.0 / jnp.sqrt(fan_in)
        return jax.random.uniform(key, shape, jnp.float32, -bound, bound)

    ks = jax.random.split(key, 8)
    p = {}
    p["w1"] = uniform(ks[0], (16, 1, 3, 3), 1 * 9)      # Conv2d(1, 16, 3)
    p["b1"] = uniform(ks[1], (16,), 1 * 9)
    p["w2"] = uniform(ks[2], (32, 16, 3, 3), 16 * 9)    # Conv2d(16, 32, 3)
    p["b2"] = uniform(ks[3], (32,), 16 * 9)
    p["w3"] = uniform(ks[4], (32, 16, 3, 3), 16 * 9)    # ConvTranspose2d(32, 16, 3)
    p["b3"] = uniform(ks[5], (16,), 16 * 9)
    p["w4"] = uniform(ks[6], (16, 1, 3, 3), 1 * 9)      # ConvTranspose2d(16, 1, 3)
    p["b4"] = uniform(ks[7], (1,), 1 * 9)
    return p


def reference_forward(params, x):
    """Pure-XLA reference with exact PyTorch Conv2d/ConvTranspose2d semantics."""
    dn = ("NCHW", "OIHW", "NCHW")
    hp = jax.lax.Precision.HIGHEST
    h = jax.lax.conv_general_dilated(x, params["w1"], (2, 2), ((1, 1), (1, 1)),
                                     dimension_numbers=dn, precision=hp)
    h = jnp.maximum(h + params["b1"][None, :, None, None], 0.0)
    h = jax.lax.conv_general_dilated(h, params["w2"], (2, 2), ((1, 1), (1, 1)),
                                     dimension_numbers=dn, precision=hp)
    h = jnp.maximum(h + params["b2"][None, :, None, None], 0.0)
    w3 = jnp.flip(params["w3"], axis=(2, 3)).transpose(1, 0, 2, 3)
    h = jax.lax.conv_general_dilated(h, w3, (1, 1), ((1, 2), (1, 2)),
                                     lhs_dilation=(2, 2), dimension_numbers=dn,
                                     precision=hp)
    h = jnp.maximum(h + params["b3"][None, :, None, None], 0.0)
    w4 = jnp.flip(params["w4"], axis=(2, 3)).transpose(1, 0, 2, 3)
    h = jax.lax.conv_general_dilated(h, w4, (1, 1), ((1, 2), (1, 2)),
                                     lhs_dilation=(2, 2), dimension_numbers=dn,
                                     precision=hp)
    return jnp.tanh(h + params["b4"][None, :, None, None])


def folded_forward_jnp(layers, x_flat):
    """Pure-JAX mirror of the kernel math (same folded matrices, same dtypes)."""
    h = x_flat.astype(jnp.float32)
    for m, b, act in layers:
        y = jnp.dot(h.astype(m.dtype), m, preferred_element_type=jnp.float32,
                    precision=jax.lax.Precision.HIGHEST) + b
        h = jnp.maximum(y, 0.0) if act == "relu" else jnp.tanh(y)
    return h


if __name__ == "__main__":
    key = jax.random.PRNGKey(0)
    k_param, k_x = jax.random.split(key)
    params = init_params(k_param)
    # MNIST-like small input: batch=2, 1 channel, 16x16 spatial (NCHW).
    x = jax.random.normal(k_x, (2, 1, 16, 16), dtype=jnp.float32)

    out = jax.jit(siec_autoenkoder_forward)(params, x)
    out = jax.block_until_ready(out)
    assert out.shape == (2, 1, 16, 16), out.shape

    # f32 reference with PyTorch Conv2d / ConvTranspose2d semantics.
    ref = jax.block_until_ready(reference_forward(params, x))

    # (1) Geometry + folding validated tight in pure f32 (catches any wrong
    #     gather/scatter index or tap-ordering bug at ~1e-5).
    layers_f32, (ho, wo) = build_folded_layers(params, 16, 16, jnp.float32)
    fold_ref = folded_forward_jnp(layers_f32, x.reshape(2, -1)).reshape(2, 1, ho, wo)
    err1 = float(jnp.max(jnp.abs(fold_ref - ref)))
    assert jnp.allclose(fold_ref, ref, rtol=1e-5, atol=3e-5), err1

    # (2) Pallas kernel (bf16 MXU operands, f32 accumulate) matches identical
    #     bf16 math tightly -> validates BlockSpecs, padding, kernel plumbing.
    layers_bf16, _ = build_folded_layers(params, 16, 16, jnp.bfloat16)
    bf16_ref = folded_forward_jnp(layers_bf16, x.reshape(2, -1)).reshape(2, 1, ho, wo)
    err2 = float(jnp.max(jnp.abs(out - bf16_ref)))
    assert jnp.allclose(out, bf16_ref, rtol=1e-3, atol=1e-3), err2

    # (3) End-to-end drift vs the f32 reference is bounded by the bf16
    #     quantization of the MXU operands only.
    err3 = float(jnp.max(jnp.abs(out - ref)))
    assert jnp.allclose(out, ref, rtol=0.0, atol=0.1), err3

    print("KERNEL_OK")
</pallas_src>

<mosaic_0001>
module attributes {stable_mosaic.version = 11 : i64} {
  func.func @_autoenkoder_kernel(%arg0: i32, %arg1: memref<8x256xf32, #tpu.memory_space<vmem>>, %arg2: memref<256x1024xbf16, #tpu.memory_space<vmem>>, %arg3: memref<1x1024xf32, #tpu.memory_space<vmem>>, %arg4: memref<1024x512xbf16, #tpu.memory_space<vmem>>, %arg5: memref<1x512xf32, #tpu.memory_space<vmem>>, %arg6: memref<512x1024xbf16, #tpu.memory_space<vmem>>, %arg7: memref<1x1024xf32, #tpu.memory_space<vmem>>, %arg8: memref<1024x256xbf16, #tpu.memory_space<vmem>>, %arg9: memref<1x256xf32, #tpu.memory_space<vmem>>, %arg10: memref<8x256xf32, #tpu.memory_space<vmem>>) attributes {dimension_semantics = [#tpu.dimension_semantics<parallel>], iteration_bounds = array<i64: 1>, scalar_prefetch = 0 : i64, scratch_operands = 0 : i64, tpu.core_type = #tpu.core_type<tc>, window_params = [{transform_indices = @transform_0, window_bounds = array<i64: 8, 256>}, {pipeline_mode = #tpu.pipeline_mode<synchronous>, transform_indices = @transform_1, window_bounds = array<i64: 256, 1024>}, {pipeline_mode = #tpu.pipeline_mode<synchronous>, transform_indices = @transform_2, window_bounds = array<i64: 1, 1024>}, {pipeline_mode = #tpu.pipeline_mode<synchronous>, transform_indices = @transform_3, window_bounds = array<i64: 1024, 512>}, {pipeline_mode = #tpu.pipeline_mode<synchronous>, transform_indices = @transform_4, window_bounds = array<i64: 1, 512>}, {pipeline_mode = #tpu.pipeline_mode<synchronous>, transform_indices = @transform_5, window_bounds = array<i64: 512, 1024>}, {pipeline_mode = #tpu.pipeline_mode<synchronous>, transform_indices = @transform_6, window_bounds = array<i64: 1, 1024>}, {pipeline_mode = #tpu.pipeline_mode<synchronous>, transform_indices = @transform_7, window_bounds = array<i64: 1024, 256>}, {pipeline_mode = #tpu.pipeline_mode<synchronous>, transform_indices = @transform_8, window_bounds = array<i64: 1, 256>}, {transform_indices = @transform_9, window_bounds = array<i64: 8, 256>}]} {
    %c0 = arith.constant 0 : index
    %c0_0 = arith.constant 0 : index
    %0 = vector.load %arg1[%c0, %c0_0] : memref<8x256xf32, #tpu.memory_space<vmem>>, vector<8x256xf32>
    %1 = arith.truncf %0 : vector<8x256xf32> to vector<8x256xbf16>
    %c0_1 = arith.constant 0 : index
    %c0_2 = arith.constant 0 : index
    %2 = vector.load %arg2[%c0_1, %c0_2] : memref<256x1024xbf16, #tpu.memory_space<vmem>>, vector<256x1024xbf16>
    %cst = arith.constant dense<0.000000e+00> : vector<8x1024xf32>
    %3 = tpu.matmul %1, %2, %cst {dimension_numbers = #tpu.dot_dimension_numbers<[1], [0], [0], [1], [0, 0, 1, 1], [], []>} : vector<8x256xbf16>, vector<256x1024xbf16>, vector<8x1024xf32> -> vector<8x1024xf32>
    %c0_3 = arith.constant 0 : index
    %c0_4 = arith.constant 0 : index
    %4 = vector.load %arg3[%c0_3, %c0_4] : memref<1x1024xf32, #tpu.memory_space<vmem>>, vector<1x1024xf32>
    %5 = vector.broadcast %4 : vector<1x1024xf32> to vector<8x1024xf32>
    %6 = arith.addf %3, %5 : vector<8x1024xf32>
    %cst_5 = arith.constant 0.000000e+00 : f32
    %7 = vector.broadcast %cst_5 : f32 to vector<8x1024xf32>
    %8 = arith.maximumf %6, %7 : vector<8x1024xf32>
    %9 = arith.truncf %8 : vector<8x1024xf32> to vector<8x1024xbf16>
    %c0_6 = arith.constant 0 : index
    %c0_7 = arith.constant 0 : index
    %10 = vector.load %arg4[%c0_6, %c0_7] : memref<1024x512xbf16, #tpu.memory_space<vmem>>, vector<1024x512xbf16>
    %cst_8 = arith.constant dense<0.000000e+00> : vector<8x512xf32>
    %11 = tpu.matmul %9, %10, %cst_8 {dimension_numbers = #tpu.dot_dimension_numbers<[1], [0], [0], [1], [0, 0, 1, 1], [], []>} : vector<8x1024xbf16>, vector<1024x512xbf16>, vector<8x512xf32> -> vector<8x512xf32>
    %c0_9 = arith.constant 0 : index
    %c0_10 = arith.constant 0 : index
    %12 = vector.load %arg5[%c0_9, %c0_10] : memref<1x512xf32, #tpu.memory_space<vmem>>, vector<1x512xf32>
    %13 = vector.broadcast %12 : vector<1x512xf32> to vector<8x512xf32>
    %14 = arith.addf %11, %13 : vector<8x512xf32>
    %cst_11 = arith.constant 0.000000e+00 : f32
    %15 = vector.broadcast %cst_11 : f32 to vector<8x512xf32>
    %16 = arith.maximumf %14, %15 : vector<8x512xf32>
    %17 = arith.truncf %16 : vector<8x512xf32> to vector<8x512xbf16>
    %c0_12 = arith.constant 0 : index
    %c0_13 = arith.constant 0 : index
    %18 = vector.load %arg6[%c0_12, %c0_13] : memref<512x1024xbf16, #tpu.memory_space<vmem>>, vector<512x1024xbf16>
    %cst_14 = arith.constant dense<0.000000e+00> : vector<8x1024xf32>
    %19 = tpu.matmul %17, %18, %cst_14 {dimension_numbers = #tpu.dot_dimension_numbers<[1], [0], [0], [1], [0, 0, 1, 1], [], []>} : vector<8x512xbf16>, vector<512x1024xbf16>, vector<8x1024xf32> -> vector<8x1024xf32>
    %c0_15 = arith.constant 0 : index
    %c0_16 = arith.constant 0 : index
    %20 = vector.load %arg7[%c0_15, %c0_16] : memref<1x1024xf32, #tpu.memory_space<vmem>>, vector<1x1024xf32>
    %21 = vector.broadcast %20 : vector<1x1024xf32> to vector<8x1024xf32>
    %22 = arith.addf %19, %21 : vector<8x1024xf32>
    %cst_17 = arith.constant 0.000000e+00 : f32
    %23 = vector.broadcast %cst_17 : f32 to vector<8x1024xf32>
    %24 = arith.maximumf %22, %23 : vector<8x1024xf32>
    %25 = arith.truncf %24 : vector<8x1024xf32> to vector<8x1024xbf16>
    %c0_18 = arith.constant 0 : index
    %c0_19 = arith.constant 0 : index
    %26 = vector.load %arg8[%c0_18, %c0_19] : memref<1024x256xbf16, #tpu.memory_space<vmem>>, vector<1024x256xbf16>
    %cst_20 = arith.constant dense<0.000000e+00> : vector<8x256xf32>
    %27 = tpu.matmul %25, %26, %cst_20 {dimension_numbers = #tpu.dot_dimension_numbers<[1], [0], [0], [1], [0, 0, 1, 1], [], []>} : vector<8x1024xbf16>, vector<1024x256xbf16>, vector<8x256xf32> -> vector<8x256xf32>
    %c0_21 = arith.constant 0 : index
    %c0_22 = arith.constant 0 : index
    %28 = vector.load %arg9[%c0_21, %c0_22] : memref<1x256xf32, #tpu.memory_space<vmem>>, vector<1x256xf32>
    %29 = vector.broadcast %28 : vector<1x256xf32> to vector<8x256xf32>
    %30 = arith.addf %27, %29 : vector<8x256xf32>
    %31 = math.tanh %30 : vector<8x256xf32>
    %c0_23 = arith.constant 0 : index
    %c0_24 = arith.constant 0 : index
    %32 = vector.load %arg10[%c0_23, %c0_24] : memref<8x256xf32, #tpu.memory_space<vmem>>, vector<8x256xf32>
    tpu.vector_store %arg10[%c0_23, %c0_24], %31 {strides = array<i32>} : memref<8x256xf32, #tpu.memory_space<vmem>>, vector<8x256xf32>,
    return
  }
  func.func @transform_0(%arg0: i32) -> (i32, i32) {
    %c0_i32 = arith.constant 0 : i32
    %c0_i32_0 = arith.constant 0 : i32
    return %arg0, %c0_i32 : i32, i32
  }
  func.func @transform_1(%arg0: i32) -> (i32, i32) {
    %c0_i32 = arith.constant 0 : i32
    %c0_i32_0 = arith.constant 0 : i32
    %c0_i32_1 = arith.constant 0 : i32
    return %c0_i32, %c0_i32_0 : i32, i32
  }
  func.func @transform_2(%arg0: i32) -> (i32, i32) {
    %c0_i32 = arith.constant 0 : i32
    %c0_i32_0 = arith.constant 0 : i32
    %c0_i32_1 = arith.constant 0 : i32
    return %c0_i32, %c0_i32_0 : i32, i32
  }
  func.func @transform_3(%arg0: i32) -> (i32, i32) {
    %c0_i32 = arith.constant 0 : i32
    %c0_i32_0 = arith.constant 0 : i32
    %c0_i32_1 = arith.constant 0 : i32
    return %c0_i32, %c0_i32_0 : i32, i32
  }
  func.func @transform_4(%arg0: i32) -> (i32, i32) {
    %c0_i32 = arith.constant 0 : i32
    %c0_i32_0 = arith.constant 0 : i32
    %c0_i32_1 = arith.constant 0 : i32
    return %c0_i32, %c0_i32_0 : i32, i32
  }
  func.func @transform_5(%arg0: i32) -> (i32, i32) {
    %c0_i32 = arith.constant 0 : i32
    %c0_i32_0 = arith.constant 0 : i32
    %c0_i32_1 = arith.constant 0 : i32
    return %c0_i32, %c0_i32_0 : i32, i32
  }
  func.func @transform_6(%arg0: i32) -> (i32, i32) {
    %c0_i32 = arith.constant 0 : i32
    %c0_i32_0 = arith.constant 0 : i32
    %c0_i32_1 = arith.constant 0 : i32
    return %c0_i32, %c0_i32_0 : i32, i32
  }
  func.func @transform_7(%arg0: i32) -> (i32, i32) {
    %c0_i32 = arith.constant 0 : i32
    %c0_i32_0 = arith.constant 0 : i32
    %c0_i32_1 = arith.constant 0 : i32
    return %c0_i32, %c0_i32_0 : i32, i32
  }
  func.func @transform_8(%arg0: i32) -> (i32, i32) {
    %c0_i32 = arith.constant 0 : i32
    %c0_i32_0 = arith.constant 0 : i32
    %c0_i32_1 = arith.constant 0 : i32
    return %c0_i32, %c0_i32_0 : i32, i32
  }
  func.func @transform_9(%arg0: i32) -> (i32, i32) {
    %c0_i32 = arith.constant 0 : i32
    %c0_i32_0 = arith.constant 0 : i32
    return %arg0, %c0_i32 : i32, i32
  }
}

</mosaic_0001>

<bundles_post_ra>
// kernel: siec_autoenkoder_forward.1
= control target key start
LH: loop header
LB: loop body
LE: loop exit
PB: predicated region body
PF: predicated region fallthrough
CT: control target
= control target key end

     0   :  { %s9721_s1 = inlined_call_operand.vmem [shape: bf16[256,1024], index: 1, kind: input, shape index: {}]   ;;  %s9722_s0 = inlined_call_operand.vmem [shape: f32[8,256], index: 0, kind: input, shape index: {}]   ;;  %s9723_s3 = inlined_call_operand.vmem [shape: bf16[1024,512], index: 3, kind: input, shape index: {}]   ;;  %s9724_s2 = inlined_call_operand.vmem [shape: f32[1,1024], index: 2, kind: input, shape index: {}]   ;;  %s9725_s5 = inlined_call_operand.vmem [shape: bf16[512,1024], index: 5, kind: input, shape index: {}]   ;;  %s9726_s4 = inlined_call_operand.vmem [shape: f32[1,512], index: 4, kind: input, shape index: {}]   ;;  %s9727_s7 = inlined_call_operand.vmem [shape: bf16[1024,256], index: 7, kind: input, shape index: {}]   ;;  %s9728_s6 = inlined_call_operand.vmem [shape: f32[1,1024], index: 6, kind: input, shape index: {}]   ;;  %s9729_s8 = inlined_call_operand.vmem [shape: f32[1,256], index: 8, kind: input, shape index: {}]   ;;  %s9730_s9 = inlined_call_operand.vmem [shape: f32[8,256], index: 9, kind: output, shape index: {}]  }
   0x1   :  { %v36_v0 = vld [vmem:[%s9721_s1] sm:$0xff]  ;;  %v33_v17 = vld [vmem:[%s9722_s0 + $0x8] sm:$0xff] }
   0x2   :  { %v40_v1 = vld [vmem:[%s9721_s1 + $0x20] sm:$0xff]  ;;  %v7291_v18 = vpack.c.bf16 %v33_v17, %v33_v17 }
   0x3   :  { %v44_v2 = vld [vmem:[%s9721_s1 + $0x40] sm:$0xff]  ;;  %v5795_v3 = vcombine.high %v36_v0, %v40_v1  ;;  %v5794_v4 = vcombine.low %v36_v0, %v40_v1  ;;  %v37_v1 = vld [vmem:[%s9721_s1 + $0x8] sm:$0xff] }
   0x4   :  { %v48_v5 = vld [vmem:[%s9721_s1 + $0x60] sm:$0xff]  ;;  %878 = vmatprep.mubr.bf16.mxu1 %v7291_v18 }
   0x5   :  { %v5803_v6 = vcombine.high %v44_v2, %v48_v5  ;;  %v52_v7 = vld [vmem:[%s9721_s1 + $0x80] sm:$0xff]  ;;  %846 = vmatprep.subr.bf16.mxu1 %v5795_v3  ;;  %v5802_v9 = vcombine.low %v44_v2, %v48_v5  ;;  %v41_v2 = vld [vmem:[%s9721_s1 + $0x28] sm:$0xff] }
   0x6   :  { %v56_v8 = vld [vmem:[%s9721_s1 + $0xa0] sm:$0xff]  ;;  %847 = vmatpush1.bf16.msra.mxu1 %v5794_v4  ;;  %v5797_v5 = vcombine.high %v37_v1, %v41_v2 }
   0x7   :  { %848 = vmatprep.subr.bf16.mxu1 %v5803_v6  ;;  %v5811_v10 = vcombine.high %v52_v7, %v56_v8  ;;  %v60_v11 = vld [vmem:[%s9721_s1 + $0xc0] sm:$0xff]  ;;  %v5810_v13 = vcombine.low %v52_v7, %v56_v8  ;;  %v45_v6 = vld [vmem:[%s9721_s1 + $0x48] sm:$0xff] }
   0x8   :  { %v64_v12 = vld [vmem:[%s9721_s1 + $0xe0] sm:$0xff]  ;;  %v49_v7 = vld [vmem:[%s9721_s1 + $0x68] sm:$0xff] }
   0x9   :  { %v5819_v14 = vcombine.high %v60_v11, %v64_v12  ;;  %v68_v15 = vld [vmem:[%s9721_s1 + $0x100] sm:$0xff]  ;;  %v5818_v19 = vcombine.low %v60_v11, %v64_v12  ;;  %v53_v11 = vld [vmem:[%s9721_s1 + $0x88] sm:$0xff] }
   0xa   :  { %849 = vmatpush1.bf16.msra.mxu1 %v5802_v9  ;;  %v72_v16 = vld [vmem:[%s9721_s1 + $0x120] sm:$0xff]  ;;  %v5796_v9 = vcombine.low %v37_v1, %v41_v2  ;;  %v57_v12 = vld [vmem:[%s9721_s1 + $0xa8] sm:$0xff] }
   0xb   :  { %850 = vmatprep.subr.bf16.mxu1 %v5811_v10  ;;  %v5827_v20 = vcombine.high %v68_v15, %v72_v16  ;;  %v76_v21 = vld [vmem:[%s9721_s1 + $0x140] sm:$0xff]  ;;  %v5826_v23 = vcombine.low %v68_v15, %v72_v16  ;;  %v5805_v10 = vcombine.high %v45_v6, %v49_v7  ;;  %v61_v15 = vld [vmem:[%s9721_s1 + $0xc8] sm:$0xff]  ;;  %v5812_v17 = vcombine.low %v53_v11, %v57_v12 }
   0xc   :  { %v80_v22 = vld [vmem:[%s9721_s1 + $0x160] sm:$0xff]  ;;  %v65_v16 = vld [vmem:[%s9721_s1 + $0xe8] sm:$0xff] }
   0xd   :  { %v5835_v24 = vcombine.high %v76_v21, %v80_v22  ;;  %v84_v25 = vld [vmem:[%s9721_s1 + $0x180] sm:$0xff]  ;;  %v5834_v27 = vcombine.low %v76_v21, %v80_v22  ;;  %v73_v21 = vld [vmem:[%s9721_s1 + $0x128] sm:$0xff]  ;;  %v5820_v22 = vcombine.low %v61_v15, %v65_v16 }
   0xe   :  { %851 = vmatpush1.bf16.msra.mxu1 %v5810_v13  ;;  %v88_v26 = vld [vmem:[%s9721_s1 + $0x1a0] sm:$0xff]  ;;  %v5804_v13 = vcombine.low %v45_v6, %v49_v7  ;;  %v153_v6 = vld [vmem:[%s9721_s1 + $0x3a8] sm:$0xff] }
   0xf   :  { %852 = vmatprep.subr.bf16.mxu1 %v5819_v14  ;;  %v5843_v28 = vcombine.high %v84_v25, %v88_v26  ;;  %v92_v29 = vld [vmem:[%s9721_s1 + $0x1c0] sm:$0xff]  ;;  %v5842_v31 = vcombine.low %v84_v25, %v88_v26  ;;  %v5813_v14 = vcombine.high %v53_v11, %v57_v12  ;;  %v81_v25 = vld [vmem:[%s9721_s1 + $0x168] sm:$0xff] }
  0x10   :  { %v96_v30 = vld [vmem:[%s9721_s1 + $0x1e0] sm:$0xff]  ;;  %v157_v12 = vld [vmem:[%s9721_s1 + $0x3c8] sm:$0xff] }
  0x11   :  { %v5851_v32 = vcombine.high %v92_v29, %v96_v30  ;;  %v100_v33 = vld [vmem:[%s9721_s1 + $0x200] sm:$0xff]  ;;  %v5850_v35 = vcombine.low %v92_v29, %v96_v30  ;;  %v89_v29 = vld [vmem:[%s9721_s1 + $0x1a8] sm:$0xff] }
  0x12   :  { %853 = vmatpush1.bf16.msra.mxu1 %v5818_v19  ;;  %v104_v34 = vld [vmem:[%s9721_s1 + $0x220] sm:$0xff]  ;;  %v5821_v19 = vcombine.high %v61_v15, %v65_v16 }
  0x13   :  { %854 = vmatprep.subr.bf16.mxu1 %v5827_v20  ;;  %v5859_v36 = vcombine.high %v100_v33, %v104_v34  ;;  %v108_v37 = vld [vmem:[%s9721_s1 + $0x240] sm:$0xff]  ;;  %v5858_v39 = vcombine.low %v100_v33, %v104_v34  ;;  %v69_v20 = vld [vmem:[%s9721_s1 + $0x108] sm:$0xff] }
  0x14   :  { %v112_v38 = vld [vmem:[%s9721_s1 + $0x260] sm:$0xff]  ;;  %v5828_v26 = vcombine.low %v69_v20, %v73_v21  ;;  %v97_v33 = vld [vmem:[%s9721_s1 + $0x1e8] sm:$0xff] }
  0x15   :  { %v5867_v40 = vcombine.high %v108_v37, %v112_v38  ;;  %v116_v41 = vld [vmem:[%s9721_s1 + $0x280] sm:$0xff]  ;;  %v5866_v43 = vcombine.low %v108_v37, %v112_v38  ;;  %v105_v37 = vld [vmem:[%s9721_s1 + $0x228] sm:$0xff] }
  0x16   :  { %855 = vmatpush1.bf16.msra.mxu1 %v5826_v23  ;;  %v120_v42 = vld [vmem:[%s9721_s1 + $0x2a0] sm:$0xff]  ;;  %v5829_v23 = vcombine.high %v69_v20, %v73_v21  ;;  %v42_v20 = vld [vmem:[%s9721_s1 + $0x30] sm:$0xff] }
  0x17   :  { %856 = vmatprep.subr.bf16.mxu1 %v5835_v24  ;;  %v5875_v44 = vcombine.high %v116_v41, %v120_v42  ;;  %v124_v45 = vld [vmem:[%s9721_s1 + $0x2c0] sm:$0xff]  ;;  %v5874_v47 = vcombine.low %v116_v41, %v120_v42  ;;  %v77_v24 = vld [vmem:[%s9721_s1 + $0x148] sm:$0xff] }
  0x18   :  { %v128_v46 = vld [vmem:[%s9721_s1 + $0x2e0] sm:$0xff]  ;;  %v5836_v30 = vcombine.low %v77_v24, %v81_v25 }
  0x19   :  { %v5883_v48 = vcombine.high %v124_v45, %v128_v46  ;;  %v132_v49 = vld [vmem:[%s9721_s1 + $0x300] sm:$0xff]  ;;  %v5882_v51 = vcombine.low %v124_v45, %v128_v46  ;;  %v117_v45 = vld [vmem:[%s9721_s1 + $0x288] sm:$0xff] }
  0x1a   :  { %857 = vmatpush1.bf16.msra.mxu1 %v5834_v27  ;;  %v136_v50 = vld [vmem:[%s9721_s1 + $0x320] sm:$0xff]  ;;  %v5837_v27 = vcombine.high %v77_v24, %v81_v25  ;;  %v121_v46 = vld [vmem:[%s9721_s1 + $0x2a8] sm:$0xff]  ;;  %v46_v25 = vld [vmem:[%s9721_s1 + $0x50] sm:$0xff] }
  0x1b   :  { %858 = vmatprep.subr.bf16.mxu1 %v5843_v28  ;;  %v5891_v52 = vcombine.high %v132_v49, %v136_v50  ;;  %v140_v53 = vld [vmem:[%s9721_s1 + $0x340] sm:$0xff]  ;;  %v5890_v55 = vcombine.low %v132_v49, %v136_v50  ;;  %v85_v28 = vld [vmem:[%s9721_s1 + $0x188] sm:$0xff] }
  0x1c   :  { %v144_v54 = vld [vmem:[%s9721_s1 + $0x360] sm:$0xff]  ;;  %v5844_v34 = vcombine.low %v85_v28, %v89_v29 }
  0x1d   :  { %v5899_v56 = vcombine.high %v140_v53, %v144_v54  ;;  %v148_v57 = vld [vmem:[%s9721_s1 + $0x380] sm:$0xff]  ;;  %v5898_v59 = vcombine.low %v140_v53, %v144_v54  ;;  %v5877_v53 = vcombine.high %v117_v45, %v121_v46 }
  0x1e   :  { %859 = vmatpush1.bf16.msra.mxu1 %v5842_v31  ;;  %v152_v58 = vld [vmem:[%s9721_s1 + $0x3a0] sm:$0xff]  ;;  %v5845_v31 = vcombine.high %v85_v28, %v89_v29 }
  0x1f   :  { %860 = vmatprep.subr.bf16.mxu1 %v5851_v32  ;;  %v5907_v60 = vcombine.high %v148_v57, %v152_v58  ;;  %v156_v61 = vld [vmem:[%s9721_s1 + $0x3c0] sm:$0xff]  ;;  %v5906_v63 = vcombine.low %v148_v57, %v152_v58  ;;  %v93_v32 = vld [vmem:[%s9721_s1 + $0x1c8] sm:$0xff] }
  0x20   :  { %v160_v62 = vld [vmem:[%s9721_s1 + $0x3e0] sm:$0xff]  ;;  %v5852_v38 = vcombine.low %v93_v32, %v97_v33  ;;  %v133_v57 = vld [vmem:[%s9721_s1 + $0x308] sm:$0xff] }
  0x21   :  { %v5915_v0 = vcombine.high %v156_v61, %v160_v62  ;;  %v5914_v3 = vcombine.low %v156_v61, %v160_v62  ;;  %v32_v4 = vld [vmem:[%s9722_s0] sm:$0xff]  ;;  %v137_v58 = vld [vmem:[%s9721_s1 + $0x328] sm:$0xff] }
  0x22   :  { %861 = vmatpush1.bf16.msra.mxu1 %v5850_v35  ;;  %v7375_v8 = vpack.c.bf16 %v32_v4, %v32_v4  ;;  %v5853_v35 = vcombine.high %v93_v32, %v97_v33  ;;  %v6628_v42 = vld [vmem:[%s9723_s3 + $0x4] ss:$16 sps:$4 sm:$0xff]   ;;  %v6633_v49 = vld [vmem:[%s9723_s3 + $0x20] ss:$16 sps:$4 sm:$0xff]   ;;  %v5893_v1 = vcombine.high %v133_v57, %v137_v58  ;;  %v5892_v4 = vcombine.low %v133_v57, %v137_v58 }
  0x23   :  { %862 = vmatprep.subr.bf16.mxu1 %v5859_v36  ;;  %v101_v36 = vld [vmem:[%s9721_s1 + $0x208] sm:$0xff]  ;;  %2584 = vmatprep.subr.bf16.mxu0 %v6628_v42  ;;  %v6634_v54 = vld [vmem:[%s9723_s3 + $0x44] ss:$16 sps:$4 sm:$0xff]   ;;  %v6639_v61 = vld [vmem:[%s9723_s3 + $0x60] ss:$16 sps:$4 sm:$0xff]  }
  0x24   :  { %v5861_v41 = vcombine.high %v101_v36, %v105_v37  ;;  %v6640_v2 = vld [vmem:[%s9723_s3 + $0x84] ss:$16 sps:$4 sm:$0xff]   ;;  %v6648_v16 = vld [vmem:[%s9723_s3 + $0xc0] ss:$16 sps:$4 sm:$0xff]  }
  0x25   :  { %v6646_v15 = vld [vmem:[%s9723_s3 + $0xc4] ss:$16 sps:$4 sm:$0xff]   ;;  %v6654_v29 = vld [vmem:[%s9723_s3 + $0x100] ss:$16 sps:$4 sm:$0xff]  }
  0x26   :  { %863 = vmatpush1.bf16.msra.mxu1 %v5858_v39  ;;  %v109_v39 = vld [vmem:[%s9721_s1 + $0x248] sm:$0xff]  ;;  %v6652_v28 = vld [vmem:[%s9723_s3 + $0x104] ss:$16 sps:$4 sm:$0xff]  }
  0x27   :  { %864 = vmatprep.subr.bf16.mxu1 %v5867_v40  ;;  %v113_v40 = vld [vmem:[%s9721_s1 + $0x268] sm:$0xff]  ;;  %v54_v32 = vld [vmem:[%s9721_s1 + $0x90] sm:$0xff] }
  0x28   :  { %v5868_v50 = vcombine.low %v109_v39, %v113_v40  ;;  %v6655_v33 = vld [vmem:[%s9723_s3 + $0x124] ss:$16 sps:$4 sm:$0xff]  }
  0x29   :  { %v6679_v57 = vld [vmem:[%s9723_s3 + $0x1a4] ss:$16 sps:$4 sm:$0xff]  }
  0x2a   :  { %865 = vmatpush1.bf16.msra.mxu1 %v5866_v43  ;;  %v6630_v43 = vld [vmem:[%s9723_s3] ss:$16 sps:$4 sm:$0xff]  }
  0x2b   :  { %866 = vmatprep.subr.bf16.mxu1 %v5875_v44  ;;  %v5860_v44 = vcombine.low %v101_v36, %v105_v37  ;;  %2585 = vmatpush1.bf16.msra.mxu0 %v6630_v43  ;;  %v62_v37 = vld [vmem:[%s9721_s1 + $0xd0] sm:$0xff] }
  0x2c   :  { %v70_v43 = vld [vmem:[%s9721_s1 + $0x110] sm:$0xff] }
  0x2e   :  { %867 = vmatpush1.bf16.msra.mxu1 %v5874_v47  ;;  %v5869_v47 = vcombine.high %v109_v39, %v113_v40  ;;  %v6661_v39 = vld [vmem:[%s9723_s3 + $0x144] ss:$16 sps:$4 sm:$0xff]  }
  0x2f   :  { %868 = vmatprep.subr.bf16.mxu1 %v5883_v48  ;;  %v6631_v48 = vld [vmem:[%s9723_s3 + $0x24] ss:$16 sps:$4 sm:$0xff]  }
  0x30   :  { %2586 = vmatprep.subr.bf16.mxu0 %v6631_v48 }
  0x31   :  { %2587 = vmatpush1.bf16.msra.mxu0 %v6633_v49  ;;  %v78_v49 = vld [vmem:[%s9721_s1 + $0x150] sm:$0xff] }
  0x32   :  { %869 = vmatpush1.bf16.msra.mxu1 %v5882_v51  ;;  %v125_v51 = vld [vmem:[%s9721_s1 + $0x2c8] sm:$0xff]  ;;  %2588 = vmatprep.subr.bf16.mxu0 %v6634_v54 }
  0x33   :  { %870 = vmatprep.subr.bf16.mxu1 %v5891_v52  ;;  %v129_v52 = vld [vmem:[%s9721_s1 + $0x2e8] sm:$0xff] }
  0x34   :  { %v5884_v62 = vcombine.low %v125_v51, %v129_v52 }
  0x36   :  { %871 = vmatpush1.bf16.msra.mxu1 %v5890_v55  ;;  %v6636_v55 = vld [vmem:[%s9723_s3 + $0x40] ss:$16 sps:$4 sm:$0xff]  }
  0x37   :  { %872 = vmatprep.subr.bf16.mxu1 %v5899_v56  ;;  %v5876_v56 = vcombine.low %v117_v45, %v121_v46  ;;  %2589 = vmatpush1.bf16.msra.mxu0 %v6636_v55  ;;  %v6667_v45 = vld [vmem:[%s9723_s3 + $0x164] ss:$16 sps:$4 sm:$0xff]  }
  0x38   :  { %v86_v55 = vld [vmem:[%s9721_s1 + $0x190] sm:$0xff] }
  0x3a   :  { %873 = vmatpush1.bf16.msra.mxu1 %v5898_v59  ;;  %v5885_v59 = vcombine.high %v125_v51, %v129_v52  ;;  %v6673_v51 = vld [vmem:[%s9723_s3 + $0x184] ss:$16 sps:$4 sm:$0xff]  }
  0x3b   :  { %874 = vmatprep.subr.bf16.mxu1 %v5907_v60  ;;  %v6637_v60 = vld [vmem:[%s9723_s3 + $0x64] ss:$16 sps:$4 sm:$0xff]  }
  0x3c   :  { %2590 = vmatprep.subr.bf16.mxu0 %v6637_v60 }
  0x3d   :  { %2591 = vmatpush1.bf16.msra.mxu0 %v6639_v61 }
  0x3e   :  { %875 = vmatpush1.bf16.msra.mxu1 %v5906_v63  ;;  %v141_v63 = vld [vmem:[%s9721_s1 + $0x348] sm:$0xff]  ;;  %2592 = vmatprep.subr.bf16.mxu0 %v6640_v2 }
  0x3f   :  { %876 = vmatprep.subr.bf16.mxu1 %v5915_v0  ;;  %v145_v0 = vld [vmem:[%s9721_s1 + $0x368] sm:$0xff] }
  0x40   :  { %v5901_v7 = vcombine.high %v141_v63, %v145_v0  ;;  %v5900_v11 = vcombine.low %v141_v63, %v145_v0  ;;  %v6685_v63 = vld [vmem:[%s9723_s3 + $0x1c4] ss:$16 sps:$4 sm:$0xff]  }
  0x41   :  { %v98_v0 = vld [vmem:[%s9721_s1 + $0x1f0] sm:$0xff] }
  0x42   :  { %877 = vmatpush1.bf16.msra.mxu1 %v5914_v3  ;;  %v6642_v3 = vld [vmem:[%s9723_s3 + $0x80] ss:$16 sps:$4 sm:$0xff]  }
  0x43   :  { %887 = vmatprep.subr.bf16.mxu1 %v5797_v5  ;;  %v149_v5 = vld [vmem:[%s9721_s1 + $0x388] sm:$0xff]  ;;  %2593 = vmatpush1.bf16.msra.mxu0 %v6642_v3 }
  0x45   :  { %879 = vmatmul.mubr.bf16.vlgmr.msra.gmra.mrb[0].mxu1 %v7375_v8 }
  0x46   :  { %888 = vmatpush1.bf16.msra.mxu1 %v5796_v9  ;;  %919 = vmatprep.mubr.bf16.mxu1 %v7291_v18  ;;  %v6643_v9 = vld [vmem:[%s9723_s3 + $0xa4] ss:$16 sps:$4 sm:$0xff]  }
  0x47   :  { %889 = vmatprep.subr.bf16.mxu1 %v5805_v10  ;;  %v6645_v10 = vld [vmem:[%s9723_s3 + $0xa0] ss:$16 sps:$4 sm:$0xff]   ;;  %2594 = vmatprep.subr.bf16.mxu0 %v6643_v9 }
  0x48   :  { %2595 = vmatpush1.bf16.msra.mxu0 %v6645_v10 }
  0x49   :  { %2596 = vmatprep.subr.bf16.mxu0 %v6646_v15 }
  0x4a   :  { %890 = vmatpush1.bf16.msra.mxu1 %v5804_v13  ;;  %v161_v13 = vld [vmem:[%s9721_s1 + $0x3e8] sm:$0xff] }
  0x4b   :  { %891 = vmatprep.subr.bf16.mxu1 %v5813_v14  ;;  %v5909_v14 = vcombine.high %v149_v5, %v153_v6  ;;  %v5917_v21 = vcombine.high %v157_v12, %v161_v13  ;;  %v5916_v24 = vcombine.low %v157_v12, %v161_v13  ;;  %v110_v12 = vld [vmem:[%s9721_s1 + $0x250] sm:$0xff] }
  0x4c   :  { %2597 = vmatpush1.bf16.msra.mxu0 %v6648_v16  ;;  %v114_v13 = vld [vmem:[%s9721_s1 + $0x270] sm:$0xff] }
  0x4d   :  { %v5871_v15 = vcombine.high %v110_v12, %v114_v13  ;;  %v118_v16 = vld [vmem:[%s9721_s1 + $0x290] sm:$0xff] }
  0x4e   :  { %892 = vmatpush1.bf16.msra.mxu1 %v5812_v17  ;;  %v5908_v17 = vcombine.low %v149_v5, %v153_v6  ;;  %v6691_v5 = vld [vmem:[%s9723_s3 + $0x1e4] ss:$16 sps:$4 sm:$0xff]  }
  0x4f   :  { %893 = vmatprep.subr.bf16.mxu1 %v5821_v19  ;;  %v38_v19 = vld [vmem:[%s9721_s1 + $0x10] sm:$0xff] }
  0x50   :  { %v106_v6 = vld [vmem:[%s9721_s1 + $0x230] sm:$0xff] }
  0x52   :  { %894 = vmatpush1.bf16.msra.mxu1 %v5820_v22  ;;  %v6649_v22 = vld [vmem:[%s9723_s3 + $0xe4] ss:$16 sps:$4 sm:$0xff]  }
  0x53   :  { %895 = vmatprep.subr.bf16.mxu1 %v5829_v23  ;;  %v6651_v23 = vld [vmem:[%s9723_s3 + $0xe0] ss:$16 sps:$4 sm:$0xff]   ;;  %2598 = vmatprep.subr.bf16.mxu0 %v6649_v22 }
  0x54   :  { %2599 = vmatpush1.bf16.msra.mxu0 %v6651_v23  ;;  %v130_v22 = vld [vmem:[%s9721_s1 + $0x2f0] sm:$0xff] }
  0x55   :  { %2600 = vmatprep.subr.bf16.mxu0 %v6652_v28 }
  0x56   :  { %896 = vmatpush1.bf16.msra.mxu1 %v5828_v26  ;;  %v50_v26 = vld [vmem:[%s9721_s1 + $0x70] sm:$0xff] }
  0x57   :  { %897 = vmatprep.subr.bf16.mxu1 %v5837_v27  ;;  %v5799_v27 = vcombine.high %v38_v19, %v42_v20  ;;  %v5806_v36 = vcombine.low %v46_v25, %v50_v26 }
  0x58   :  { %2601 = vmatpush1.bf16.msra.mxu0 %v6654_v29  ;;  %v142_v29 = vld [vmem:[%s9721_s1 + $0x350] sm:$0xff] }
  0x59   :  { %2602 = vmatprep.subr.bf16.mxu0 %v6655_v33  ;;  %v150_v33 = vld [vmem:[%s9721_s1 + $0x390] sm:$0xff] }
  0x5a   :  { %898 = vmatpush1.bf16.msra.mxu1 %v5836_v30  ;;  %v5798_v30 = vcombine.low %v38_v19, %v42_v20  ;;  %v5870_v19 = vcombine.low %v110_v12, %v114_v13  ;;  %v111_v13 = vld [vmem:[%s9721_s1 + $0x258] sm:$0xff] }
  0x5b   :  { %899 = vmatprep.subr.bf16.mxu1 %v5845_v31  ;;  %v5807_v31 = vcombine.high %v46_v25, %v50_v26  ;;  %v134_v25 = vld [vmem:[%s9721_s1 + $0x310] sm:$0xff] }
  0x5c   :  { %v138_v26 = vld [vmem:[%s9721_s1 + $0x330] sm:$0xff] }
  0x5d   :  { %v5895_v28 = vcombine.high %v134_v25, %v138_v26 }
  0x5e   :  { %900 = vmatpush1.bf16.msra.mxu1 %v5844_v34  ;;  %v58_v34 = vld [vmem:[%s9721_s1 + $0xb0] sm:$0xff] }
  0x5f   :  { %901 = vmatprep.subr.bf16.mxu1 %v5853_v35  ;;  %v6660_v35 = vld [vmem:[%s9723_s3 + $0x120] ss:$16 sps:$4 sm:$0xff]   ;;  %v5815_v40 = vcombine.high %v54_v32, %v58_v34  ;;  %v5814_v42 = vcombine.low %v54_v32, %v58_v34 }
  0x60   :  { %2603 = vmatpush1.bf16.msra.mxu0 %v6660_v35  ;;  %v154_v34 = vld [vmem:[%s9721_s1 + $0x3b0] sm:$0xff] }
  0x61   :  { %2604 = vmatprep.subr.bf16.mxu0 %v6661_v39  ;;  %v5910_v39 = vcombine.low %v150_v33, %v154_v34 }
  0x62   :  { %902 = vmatpush1.bf16.msra.mxu1 %v5852_v38  ;;  %v66_v38 = vld [vmem:[%s9721_s1 + $0xf0] sm:$0xff] }
  0x63   :  { %903 = vmatprep.subr.bf16.mxu1 %v5861_v41  ;;  %v6666_v41 = vld [vmem:[%s9723_s3 + $0x140] ss:$16 sps:$4 sm:$0xff]   ;;  %v5823_v46 = vcombine.high %v62_v37, %v66_v38  ;;  %v5822_v48 = vcombine.low %v62_v37, %v66_v38 }
  0x64   :  { %2605 = vmatpush1.bf16.msra.mxu0 %v6666_v41  ;;  %v158_v37 = vld [vmem:[%s9721_s1 + $0x3d0] sm:$0xff]  ;;  %v39_v41 = vld [vmem:[%s9721_s1 + $0x18] sm:$0xff] }
  0x65   :  { %2606 = vmatprep.subr.bf16.mxu0 %v6667_v45  ;;  %v162_v38 = vld [vmem:[%s9721_s1 + $0x3f0] sm:$0xff]  ;;  %v47_v45 = vld [vmem:[%s9721_s1 + $0x58] sm:$0xff] }
  0x66   :  { %904 = vmatpush1.bf16.msra.mxu1 %v5860_v44  ;;  %v74_v44 = vld [vmem:[%s9721_s1 + $0x130] sm:$0xff] }
  0x67   :  { %905 = vmatprep.subr.bf16.mxu1 %v5869_v47  ;;  %v6672_v47 = vld [vmem:[%s9723_s3 + $0x160] ss:$16 sps:$4 sm:$0xff]   ;;  %v5831_v52 = vcombine.high %v70_v43, %v74_v44  ;;  %v5830_v54 = vcombine.low %v70_v43, %v74_v44  ;;  %v5918_v43 = vcombine.low %v158_v37, %v162_v38 }
  0x68   :  { %2607 = vmatpush1.bf16.msra.mxu0 %v6672_v47 }
  0x69   :  { %2608 = vmatprep.subr.bf16.mxu0 %v6673_v51 }
  0x6a   :  { %906 = vmatpush1.bf16.msra.mxu1 %v5868_v50  ;;  %v82_v50 = vld [vmem:[%s9721_s1 + $0x170] sm:$0xff] }
  0x6b   :  { %907 = vmatprep.subr.bf16.mxu1 %v5877_v53  ;;  %v6678_v53 = vld [vmem:[%s9723_s3 + $0x180] ss:$16 sps:$4 sm:$0xff]   ;;  %v5839_v58 = vcombine.high %v78_v49, %v82_v50  ;;  %v5838_v60 = vcombine.low %v78_v49, %v82_v50  ;;  %v55_v49 = vld [vmem:[%s9721_s1 + $0x98] sm:$0xff] }
  0x6c   :  { %2609 = vmatpush1.bf16.msra.mxu0 %v6678_v53  ;;  %v59_v50 = vld [vmem:[%s9721_s1 + $0xb8] sm:$0xff] }
  0x6d   :  { %2610 = vmatprep.subr.bf16.mxu0 %v6679_v57  ;;  %v63_v53 = vld [vmem:[%s9721_s1 + $0xd8] sm:$0xff] }
  0x6e   :  { %908 = vmatpush1.bf16.msra.mxu1 %v5876_v56  ;;  %v90_v56 = vld [vmem:[%s9721_s1 + $0x1b0] sm:$0xff]  ;;  %v71_v57 = vld [vmem:[%s9721_s1 + $0x118] sm:$0xff] }
  0x6f   :  { %909 = vmatprep.subr.bf16.mxu1 %v5885_v59  ;;  %v6684_v59 = vld [vmem:[%s9723_s3 + $0x1a0] ss:$16 sps:$4 sm:$0xff]   ;;  %v5847_v61 = vcombine.high %v86_v55, %v90_v56  ;;  %v5846_v2 = vcombine.low %v86_v55, %v90_v56  ;;  %v5816_v55 = vcombine.low %v55_v49, %v59_v50 }
  0x70   :  { %2611 = vmatpush1.bf16.msra.mxu0 %v6684_v59 }
  0x71   :  { %2612 = vmatprep.subr.bf16.mxu0 %v6685_v63 }
  0x72   :  { %910 = vmatpush1.bf16.msra.mxu1 %v5884_v62  ;;  %v94_v62 = vld [vmem:[%s9721_s1 + $0x1d0] sm:$0xff] }
  0x73   :  { %911 = vmatprep.subr.bf16.mxu1 %v5893_v1  ;;  %v6690_v1 = vld [vmem:[%s9723_s3 + $0x1c0] ss:$16 sps:$4 sm:$0xff]   ;;  %v5855_v3 = vcombine.high %v94_v62, %v98_v0  ;;  %v5854_v9 = vcombine.low %v94_v62, %v98_v0  ;;  %v87_v0 = vld [vmem:[%s9721_s1 + $0x198] sm:$0xff] }
  0x74   :  { %2613 = vmatpush1.bf16.msra.mxu0 %v6690_v1  ;;  %v91_v1 = vld [vmem:[%s9721_s1 + $0x1b8] sm:$0xff] }
  0x75   :  { %2614 = vmatprep.subr.bf16.mxu0 %v6691_v5  ;;  %v99_v5 = vld [vmem:[%s9721_s1 + $0x1f8] sm:$0xff] }
  0x76   :  { %912 = vmatpush1.bf16.msra.mxu1 %v5892_v4  ;;  %v102_v4 = vld [vmem:[%s9721_s1 + $0x210] sm:$0xff] }
  0x77   :  { %913 = vmatprep.subr.bf16.mxu1 %v5901_v7  ;;  %v6696_v7 = vld [vmem:[%s9723_s3 + $0x1e0] ss:$16 sps:$4 sm:$0xff]   ;;  %v5863_v10 = vcombine.high %v102_v4, %v106_v6 }
  0x78   :  { %2615 = vmatpush1.bf16.msra.mxu0 %v6696_v7 }
  0x7a   :  { %914 = vmatpush1.bf16.msra.mxu1 %v5900_v11  ;;  %v6699_v11 = vld [vmem:[%s9723_s3 + $0x204] ss:$16 sps:$4 sm:$0xff]  }
  0x7b   :  { %915 = vmatprep.subr.bf16.mxu1 %v5909_v14  ;;  %2625 = vmatprep.subr.bf16.mxu0 %v6699_v11  ;;  %v5862_v14 = vcombine.low %v102_v4, %v106_v6  ;;  %v95_v4 = vld [vmem:[%s9721_s1 + $0x1d8] sm:$0xff]  ;;  %v5848_v6 = vcombine.low %v87_v0, %v91_v1 }
  0x7c   :  { %v5857_v7 = vcombine.high %v95_v4, %v99_v5  ;;  %v5856_v11 = vcombine.low %v95_v4, %v99_v5  ;;  %v6702_v5 = vld [vmem:[%s9723_s3 + $0xec] ss:$16 sps:$4 sm:$0xff]  }
  0x7e   :  { %916 = vmatpush1.bf16.msra.mxu1 %v5908_v17  ;;  %v122_v17 = vld [vmem:[%s9721_s1 + $0x2b0] sm:$0xff] }
  0x7f   :  { %917 = vmatprep.subr.bf16.mxu1 %v5917_v21  ;;  %v5879_v20 = vcombine.high %v118_v16, %v122_v17  ;;  %v126_v21 = vld [vmem:[%s9721_s1 + $0x2d0] sm:$0xff]  ;;  %v5878_v23 = vcombine.low %v118_v16, %v122_v17  ;;  %v119_v17 = vld [vmem:[%s9721_s1 + $0x298] sm:$0xff] }
  0x82   :  { %918 = vmatpush1.bf16.msra.mxu1 %v5916_v24  ;;  %v5887_v24 = vcombine.high %v126_v21, %v130_v22 }
  0x83   :  { %928 = vmatprep.subr.bf16.mxu1 %v5799_v27  ;;  %v5886_v27 = vcombine.low %v126_v21, %v130_v22  ;;  %v127_v22 = vld [vmem:[%s9721_s1 + $0x2d8] sm:$0xff] }
  0x85   :  { %920 = vmatmul.mubr.bf16.vlgmr.msra.gmra.mrb[4].mxu1 %v7375_v8 }
  0x86   :  { %929 = vmatpush1.bf16.msra.mxu1 %v5798_v30  ;;  %960 = vmatprep.mubr.bf16.mxu1 %v7291_v18  ;;  %v146_v30 = vld [vmem:[%s9721_s1 + $0x370] sm:$0xff] }
  0x87   :  { %930 = vmatprep.subr.bf16.mxu1 %v5807_v31  ;;  %v5894_v31 = vcombine.low %v134_v25, %v138_v26  ;;  %v5903_v32 = vcombine.high %v142_v29, %v146_v30  ;;  %v5902_v35 = vcombine.low %v142_v29, %v146_v30  ;;  %v135_v26 = vld [vmem:[%s9721_s1 + $0x318] sm:$0xff] }
  0x88   :  { %v143_v30 = vld [vmem:[%s9721_s1 + $0x358] sm:$0xff] }
  0x8a   :  { %931 = vmatpush1.bf16.msra.mxu1 %v5806_v36  ;;  %v5911_v36 = vcombine.high %v150_v33, %v154_v34  ;;  %v151_v34 = vld [vmem:[%s9721_s1 + $0x398] sm:$0xff] }
  0x8b   :  { %932 = vmatprep.subr.bf16.mxu1 %v5815_v40  ;;  %v5919_v40 = vcombine.high %v158_v37, %v162_v38  ;;  %v159_v38 = vld [vmem:[%s9721_s1 + $0x3d8] sm:$0xff] }
  0x8e   :  { %933 = vmatpush1.bf16.msra.mxu1 %v5814_v42  ;;  %v43_v42 = vld [vmem:[%s9721_s1 + $0x38] sm:$0xff] }
  0x8f   :  { %934 = vmatprep.subr.bf16.mxu1 %v5823_v46  ;;  %v5801_v44 = vcombine.high %v39_v41, %v43_v42  ;;  %v51_v46 = vld [vmem:[%s9721_s1 + $0x78] sm:$0xff]  ;;  %v5800_v47 = vcombine.low %v39_v41, %v43_v42 }
  0x90   :  { %v5808_v51 = vcombine.low %v47_v45, %v51_v46 }
  0x92   :  { %935 = vmatpush1.bf16.msra.mxu1 %v5822_v48  ;;  %v5809_v48 = vcombine.high %v47_v45, %v51_v46  ;;  %v6665_v45 = vld [vmem:[%s9723_s3 + $0x2c] ss:$16 sps:$4 sm:$0xff]   ;;  %v6663_v46 = vld [vmem:[%s9723_s3 + $0x28] ss:$16 sps:$4 sm:$0xff]  }
  0x93   :  { %936 = vmatprep.subr.bf16.mxu1 %v5831_v52  ;;  %v5817_v52 = vcombine.high %v55_v49, %v59_v50  ;;  %v6669_v49 = vld [vmem:[%s9723_s3 + $0x48] ss:$16 sps:$4 sm:$0xff]  }
  0x96   :  { %937 = vmatpush1.bf16.msra.mxu1 %v5830_v54  ;;  %v67_v54 = vld [vmem:[%s9721_s1 + $0xf8] sm:$0xff] }
  0x97   :  { %938 = vmatprep.subr.bf16.mxu1 %v5839_v58  ;;  %v5825_v56 = vcombine.high %v63_v53, %v67_v54  ;;  %v5824_v58 = vcombine.low %v63_v53, %v67_v54  ;;  %v6681_v54 = vld [vmem:[%s9723_s3 + $0x88] ss:$16 sps:$4 sm:$0xff]  }
  0x9a   :  { %939 = vmatpush1.bf16.msra.mxu1 %v5838_v60  ;;  %v79_v60 = vld [vmem:[%s9721_s1 + $0x158] sm:$0xff] }
  0x9b   :  { %940 = vmatprep.subr.bf16.mxu1 %v5847_v61  ;;  %v83_v61 = vld [vmem:[%s9721_s1 + $0x178] sm:$0xff] }
  0x9c   :  { %v5841_v63 = vcombine.high %v79_v60, %v83_v61 }
  0x9e   :  { %941 = vmatpush1.bf16.msra.mxu1 %v5846_v2  ;;  %v5840_v2 = vcombine.low %v79_v60, %v83_v61  ;;  %v6695_v60 = vld [vmem:[%s9723_s3 + $0xcc] ss:$16 sps:$4 sm:$0xff]  }
  0x9f   :  { %942 = vmatprep.subr.bf16.mxu1 %v5855_v3  ;;  %v5849_v3 = vcombine.high %v87_v0, %v91_v1 }
  0xa2   :  { %943 = vmatpush1.bf16.msra.mxu1 %v5854_v9  ;;  %v103_v9 = vld [vmem:[%s9721_s1 + $0x218] sm:$0xff] }
  0xa3   :  { %944 = vmatprep.subr.bf16.mxu1 %v5863_v10  ;;  %v107_v10 = vld [vmem:[%s9721_s1 + $0x238] sm:$0xff] }
  0xa4   :  { %v5865_v12 = vcombine.high %v103_v9, %v107_v10 }
  0xa6   :  { %945 = vmatpush1.bf16.msra.mxu1 %v5862_v14  ;;  %v115_v14 = vld [vmem:[%s9721_s1 + $0x278] sm:$0xff] }
  0xa7   :  { %946 = vmatprep.subr.bf16.mxu1 %v5871_v15  ;;  %v5864_v15 = vcombine.low %v103_v9, %v107_v10  ;;  %v5873_v16 = vcombine.high %v111_v13, %v115_v14  ;;  %v6697_v10 = vld [vmem:[%s9723_s3 + $0x200] ss:$16 sps:$4 sm:$0xff]  }
  0xaa   :  { %947 = vmatpush1.bf16.msra.mxu1 %v5870_v19  ;;  %v123_v19 = vld [vmem:[%s9721_s1 + $0x2b8] sm:$0xff] }
  0xab   :  { %948 = vmatprep.subr.bf16.mxu1 %v5879_v20  ;;  %v5872_v20 = vcombine.low %v111_v13, %v115_v14  ;;  %v5881_v21 = vcombine.high %v119_v17, %v123_v19  ;;  %v6708_v13 = vld [vmem:[%s9723_s3 + $0x10c] ss:$16 sps:$4 sm:$0xff]   ;;  %v6703_v14 = vld [vmem:[%s9723_s3 + $0x220] ss:$16 sps:$4 sm:$0xff]  }
  0xae   :  { %949 = vmatpush1.bf16.msra.mxu1 %v5878_v23  ;;  %v131_v23 = vld [vmem:[%s9721_s1 + $0x2f8] sm:$0xff] }
  0xaf   :  { %950 = vmatprep.subr.bf16.mxu1 %v5887_v24  ;;  %v5880_v24 = vcombine.low %v119_v17, %v123_v19  ;;  %v5889_v25 = vcombine.high %v127_v22, %v131_v23  ;;  %v6714_v17 = vld [vmem:[%s9723_s3 + $0x12c] ss:$16 sps:$4 sm:$0xff]   ;;  %v6709_v19 = vld [vmem:[%s9723_s3 + $0x240] ss:$16 sps:$4 sm:$0xff]  }
  0xb2   :  { %951 = vmatpush1.bf16.msra.mxu1 %v5886_v27  ;;  %v139_v27 = vld [vmem:[%s9721_s1 + $0x338] sm:$0xff] }
  0xb3   :  { %952 = vmatprep.subr.bf16.mxu1 %v5895_v28  ;;  %v5888_v28 = vcombine.low %v127_v22, %v131_v23  ;;  %v5897_v29 = vcombine.high %v135_v26, %v139_v27  ;;  %v6720_v22 = vld [vmem:[%s9723_s3 + $0x14c] ss:$16 sps:$4 sm:$0xff]   ;;  %v6715_v23 = vld [vmem:[%s9723_s3 + $0x260] ss:$16 sps:$4 sm:$0xff]  }
  0xb6   :  { %953 = vmatpush1.bf16.msra.mxu1 %v5894_v31  ;;  %v147_v31 = vld [vmem:[%s9721_s1 + $0x378] sm:$0xff] }
  0xb7   :  { %954 = vmatprep.subr.bf16.mxu1 %v5903_v32  ;;  %v5896_v32 = vcombine.low %v135_v26, %v139_v27  ;;  %v5905_v33 = vcombine.high %v143_v30, %v147_v31  ;;  %v6726_v26 = vld [vmem:[%s9723_s3 + $0x16c] ss:$16 sps:$4 sm:$0xff]   ;;  %v6721_v27 = vld [vmem:[%s9723_s3 + $0x280] ss:$16 sps:$4 sm:$0xff]  }
  0xba   :  { %955 = vmatpush1.bf16.msra.mxu1 %v5902_v35  ;;  %v155_v35 = vld [vmem:[%s9721_s1 + $0x3b8] sm:$0xff] }
  0xbb   :  { %956 = vmatprep.subr.bf16.mxu1 %v5911_v36  ;;  %v5904_v36 = vcombine.low %v143_v30, %v147_v31  ;;  %v5913_v37 = vcombine.high %v151_v34, %v155_v35  ;;  %v6732_v30 = vld [vmem:[%s9723_s3 + $0x18c] ss:$16 sps:$4 sm:$0xff]   ;;  %v6727_v31 = vld [vmem:[%s9723_s3 + $0x2a0] ss:$16 sps:$4 sm:$0xff]  }
  0xbe   :  { %957 = vmatpush1.bf16.msra.mxu1 %v5910_v39  ;;  %v163_v39 = vld [vmem:[%s9721_s1 + $0x3f8] sm:$0xff] }
  0xbf   :  { %958 = vmatprep.subr.bf16.mxu1 %v5919_v40  ;;  %v5912_v40 = vcombine.low %v151_v34, %v155_v35  ;;  %v5921_v41 = vcombine.high %v159_v38, %v163_v39  ;;  %v5920_v42 = vcombine.low %v159_v38, %v163_v39  ;;  %v6738_v34 = vld [vmem:[%s9723_s3 + $0x1ac] ss:$16 sps:$4 sm:$0xff]   ;;  %v6733_v35 = vld [vmem:[%s9723_s3 + $0x2c0] ss:$16 sps:$4 sm:$0xff]  }
  0xc0   :  { %v6744_v38 = vld [vmem:[%s9723_s3 + $0x1cc] ss:$16 sps:$4 sm:$0xff]   ;;  %v6739_v39 = vld [vmem:[%s9723_s3 + $0x2e0] ss:$16 sps:$4 sm:$0xff]  }
  0xc2   :  { %959 = vmatpush1.bf16.msra.mxu1 %v5918_v43  ;;  %v6659_v43 = vld [vmem:[%s9723_s3 + $0xc] ss:$16 sps:$4 sm:$0xff]  }
  0xc3   :  { %969 = vmatprep.subr.bf16.mxu1 %v5801_v44  ;;  %v6657_v44 = vld [vmem:[%s9723_s3 + $0x8] ss:$16 sps:$4 sm:$0xff]  }
  0xc5   :  { %961 = vmatmul.mubr.bf16.vlgmr.msra.gmra.mrb[8].mxu1 %v7375_v8 }
  0xc6   :  { %970 = vmatpush1.bf16.msra.mxu1 %v5800_v47  ;;  %1001 = vmatprep.mubr.bf16.mxu1 %v7291_v18  ;;  %v75_v18 = vld [vmem:[%s9721_s1 + $0x138] sm:$0xff] }
  0xc7   :  { %971 = vmatprep.subr.bf16.mxu1 %v5809_v48  ;;  %v5833_v59 = vcombine.high %v71_v57, %v75_v18  ;;  %v5832_v62 = vcombine.low %v71_v57, %v75_v18  ;;  %v6671_v47 = vld [vmem:[%s9723_s3 + $0x4c] ss:$16 sps:$4 sm:$0xff]   ;;  %v166_v48 = vlaneseq }
  0xc8   :  { %v6689_v57 = vld [vmem:[%s9723_s3 + $0xac] ss:$16 sps:$4 sm:$0xff]  }
  0xc9   :  { %v7780_v50 = vshrl.u32 %v166_v48, 7  ;;  %v6754_v48 = vld [vmem:[%s9723_s3 + $0x208] ss:$16 sps:$4 sm:$0xff]  }
  0xca   :  { %972 = vmatpush1.bf16.msra.mxu1 %v5808_v51  ;;  %v6675_v51 = vld [vmem:[%s9723_s3 + $0x68] ss:$16 sps:$4 sm:$0xff]  }
  0xcb   :  { %973 = vmatprep.subr.bf16.mxu1 %v5817_v52  ;;  %v6683_v52 = vld [vmem:[%s9723_s3 + $0x8c] ss:$16 sps:$4 sm:$0xff]   ;;  %v7789_v53 = vsub.s32 0, %v7780_v50 }
  0xce   :  { %974 = vmatpush1.bf16.msra.mxu1 %v5816_v55  ;;  %v7797_v55 = vld [vmem:[%s9724_s2] sm:$0xff] }
  0xcf   :  { %975 = vmatprep.subr.bf16.mxu1 %v5825_v56  ;;  %v7800_v56 = vsub.s32 1, %v7780_v50  ;;  %v169_v18 = vrot.slane %v7797_v55, %v7789_v53 }
  0xd2   :  { %976 = vmatpush1.bf16.msra.mxu1 %v5824_v58  ;;  %v173_v58 = vrot.slane %v7797_v55, %v7800_v56 }
  0xd3   :  { %977 = vmatprep.subr.bf16.mxu1 %v5833_v59  ;;  %v6687_v59 = vld [vmem:[%s9723_s3 + $0xa8] ss:$16 sps:$4 sm:$0xff]  }
  0xd6   :  { %978 = vmatpush1.bf16.msra.mxu1 %v5832_v62 }
  0xd7   :  { %979 = vmatprep.subr.bf16.mxu1 %v5841_v63 }
  0xda   :  { %980 = vmatpush1.bf16.msra.mxu1 %v5840_v2  ;;  %v6693_v2 = vld [vmem:[%s9723_s3 + $0xc8] ss:$16 sps:$4 sm:$0xff]  }
  0xdb   :  { %981 = vmatprep.subr.bf16.mxu1 %v5849_v3 }
  0xde   :  { %982 = vmatpush1.bf16.msra.mxu1 %v5848_v6 }
  0xdf   :  { %983 = vmatprep.subr.bf16.mxu1 %v5857_v7 }
  0xe2   :  { %984 = vmatpush1.bf16.msra.mxu1 %v5856_v11  ;;  %v6700_v11 = vld [vmem:[%s9723_s3 + $0xe8] ss:$16 sps:$4 sm:$0xff]  }
  0xe3   :  { %985 = vmatprep.subr.bf16.mxu1 %v5865_v12  ;;  %v6705_v12 = vld [vmem:[%s9723_s3 + $0x224] ss:$16 sps:$4 sm:$0xff]  }
  0xe6   :  { %986 = vmatpush1.bf16.msra.mxu1 %v5864_v15  ;;  %v6706_v15 = vld [vmem:[%s9723_s3 + $0x108] ss:$16 sps:$4 sm:$0xff]  }
  0xe7   :  { %987 = vmatprep.subr.bf16.mxu1 %v5873_v16  ;;  %v6711_v16 = vld [vmem:[%s9723_s3 + $0x244] ss:$16 sps:$4 sm:$0xff]  }
  0xea   :  { %988 = vmatpush1.bf16.msra.mxu1 %v5872_v20  ;;  %v6712_v20 = vld [vmem:[%s9723_s3 + $0x128] ss:$16 sps:$4 sm:$0xff]  }
  0xeb   :  { %989 = vmatprep.subr.bf16.mxu1 %v5881_v21  ;;  %v6717_v21 = vld [vmem:[%s9723_s3 + $0x264] ss:$16 sps:$4 sm:$0xff]  }
  0xee   :  { %990 = vmatpush1.bf16.msra.mxu1 %v5880_v24  ;;  %v6718_v24 = vld [vmem:[%s9723_s3 + $0x148] ss:$16 sps:$4 sm:$0xff]  }
  0xef   :  { %991 = vmatprep.subr.bf16.mxu1 %v5889_v25  ;;  %v6723_v25 = vld [vmem:[%s9723_s3 + $0x284] ss:$16 sps:$4 sm:$0xff]  }
  0xf2   :  { %992 = vmatpush1.bf16.msra.mxu1 %v5888_v28  ;;  %v6724_v28 = vld [vmem:[%s9723_s3 + $0x168] ss:$16 sps:$4 sm:$0xff]  }
  0xf3   :  { %993 = vmatprep.subr.bf16.mxu1 %v5897_v29  ;;  %v6729_v29 = vld [vmem:[%s9723_s3 + $0x2a4] ss:$16 sps:$4 sm:$0xff]  }
  0xf6   :  { %994 = vmatpush1.bf16.msra.mxu1 %v5896_v32  ;;  %v6730_v32 = vld [vmem:[%s9723_s3 + $0x188] ss:$16 sps:$4 sm:$0xff]  }
  0xf7   :  { %995 = vmatprep.subr.bf16.mxu1 %v5905_v33  ;;  %v6735_v33 = vld [vmem:[%s9723_s3 + $0x2c4] ss:$16 sps:$4 sm:$0xff]  }
  0xfa   :  { %996 = vmatpush1.bf16.msra.mxu1 %v5904_v36  ;;  %v6736_v36 = vld [vmem:[%s9723_s3 + $0x1a8] ss:$16 sps:$4 sm:$0xff]  }
  0xfb   :  { %997 = vmatprep.subr.bf16.mxu1 %v5913_v37  ;;  %v6741_v37 = vld [vmem:[%s9723_s3 + $0x2e4] ss:$16 sps:$4 sm:$0xff]  }
  0xfe   :  { %998 = vmatpush1.bf16.msra.mxu1 %v5912_v40  ;;  %v6742_v40 = vld [vmem:[%s9723_s3 + $0x1c8] ss:$16 sps:$4 sm:$0xff]  }
  0xff   :  { %999 = vmatprep.subr.bf16.mxu1 %v5921_v41  ;;  %v6747_v41 = vld [vmem:[%s9723_s3 + $0x304] ss:$16 sps:$4 sm:$0xff]  }
 0x102   :  { %1000 = vmatpush1.bf16.msra.mxu1 %v5920_v42  ;;  %v6750_v42 = vld [vmem:[%s9723_s3 + $0x1ec] ss:$16 sps:$4 sm:$0xff]  }
 0x103   :  { %2748 = vmatprep.subr.bf16.mxu1 %v6659_v43  ;;  %v6745_v43 = vld [vmem:[%s9723_s3 + $0x300] ss:$16 sps:$4 sm:$0xff]  }
 0x105   :  { %1002 = vmatmul.mubr.bf16.vlgmr.msra.gmra.mrb[12].mxu1 %v7375_v8  ;;  %v6677_v8 = vld [vmem:[%s9723_s3 + $0x6c] ss:$16 sps:$4 sm:$0xff]  }
 0x106   :  { %2749 = vmatpush1.bf16.msra.mxu1 %v6657_v44  ;;  %v6748_v44 = vld [vmem:[%s9723_s3 + $0x1e8] ss:$16 sps:$4 sm:$0xff]  }
 0x107   :  { %2750 = vmatprep.subr.bf16.mxu1 %v6665_v45  ;;  %v6753_v45 = vld [vmem:[%s9723_s3 + $0x324] ss:$16 sps:$4 sm:$0xff]  }
 0x10a   :  { %2751 = vmatpush1.bf16.msra.mxu1 %v6663_v46  ;;  %v6756_v46 = vld [vmem:[%s9723_s3 + $0x20c] ss:$16 sps:$4 sm:$0xff]  }
 0x10b   :  { %2752 = vmatprep.subr.bf16.mxu1 %v6671_v47  ;;  %v6751_v47 = vld [vmem:[%s9723_s3 + $0x320] ss:$16 sps:$4 sm:$0xff]  }
 0x10e   :  { %2753 = vmatpush1.bf16.msra.mxu1 %v6669_v49  ;;  %v6759_v49 = vld [vmem:[%s9723_s3 + $0x344] ss:$16 sps:$4 sm:$0xff]  }
 0x10f   :  { %2754 = vmatprep.subr.bf16.mxu1 %v6677_v8  ;;  %v6762_v8 = vld [vmem:[%s9723_s3 + $0x22c] ss:$16 sps:$4 sm:$0xff]  }
 0x112   :  { %2755 = vmatpush1.bf16.msra.mxu1 %v6675_v51  ;;  %v6757_v51 = vld [vmem:[%s9723_s3 + $0x340] ss:$16 sps:$4 sm:$0xff]  }
 0x113   :  { %2756 = vmatprep.subr.bf16.mxu1 %v6683_v52  ;;  %v6760_v52 = vld [vmem:[%s9723_s3 + $0x228] ss:$16 sps:$4 sm:$0xff]  }
 0x116   :  { %2757 = vmatpush1.bf16.msra.mxu1 %v6681_v54  ;;  %v6765_v54 = vld [vmem:[%s9723_s3 + $0x364] ss:$16 sps:$4 sm:$0xff]  }
 0x117   :  { %2758 = vmatprep.subr.bf16.mxu1 %v6689_v57  ;;  %v6768_v57 = vld [vmem:[%s9723_s3 + $0x24c] ss:$16 sps:$4 sm:$0xff]  }
 0x118   :  { %v880_v61 = vpop.f32.mrb[0].mxu1 }
 0x119   :  { %v881_v62 = vadd.f32 %v880_v61, %v169_v18  ;;  %v882_v63 = vpop.f32.mrb[1].mxu1  ;;  %v6763_v18 = vld [vmem:[%s9723_s3 + $0x360] ss:$16 sps:$4 sm:$0xff]  }
 0x11a   :  { %v883_v0 = vadd.f32 %v882_v63, %v173_v58  ;;  %v884_v1 = vpop.f32.mrb[2].mxu1  ;;  %2759 = vmatpush1.bf16.msra.mxu1 %v6687_v59  ;;  %v6766_v58 = vld [vmem:[%s9723_s3 + $0x248] ss:$16 sps:$4 sm:$0xff]   ;;  %v6771_v59 = vld [vmem:[%s9723_s3 + $0x384] ss:$16 sps:$4 sm:$0xff]  }
 0x11b   :  { %v1010_v3 = vmax.f32 %v881_v62, 0.0  ;;  %v885_v4 = vpop.f32.mrb[3].mxu1  ;;  %2760 = vmatprep.subr.bf16.mxu1 %v6695_v60  ;;  %v6774_v60 = vld [vmem:[%s9723_s3 + $0x26c] ss:$16 sps:$4 sm:$0xff]   ;;  %v6769_v61 = vld [vmem:[%s9723_s3 + $0x380] ss:$16 sps:$4 sm:$0xff]  }
 0x11c   :  { %v1011_v6 = vmax.f32 %v883_v0, 0.0  ;;  %v6772_v62 = vld [vmem:[%s9723_s3 + $0x268] ss:$16 sps:$4 sm:$0xff]   ;;  %v6777_v63 = vld [vmem:[%s9723_s3 + $0x3a4] ss:$16 sps:$4 sm:$0xff]   ;;  %v7982_v1 = vsub.s32 2, %v7780_v50 }
 0x11d   :  { %v7821_v7 = vpack.c.bf16 %v1010_v3, %v1010_v3  ;;  %v6780_v0 = vld [vmem:[%s9723_s3 + $0x28c] ss:$16 sps:$4 sm:$0xff]   ;;  %v6778_v3 = vld [vmem:[%s9723_s3 + $0x288] ss:$16 sps:$4 sm:$0xff]   ;;  %v7991_v4 = vsub.s32 3, %v7780_v50 }
 0x11e   :  { %2761 = vmatpush1.bf16.msra.mxu1 %v6693_v2  ;;  %v1019_v9 = vpack.c.bf16 %v1011_v6, %v1011_v6  ;;  %v6775_v2 = vld [vmem:[%s9723_s3 + $0x3a0] ss:$16 sps:$4 sm:$0xff]   ;;  %v6786_v6 = vld [vmem:[%s9723_s3 + $0x2ac] ss:$16 sps:$4 sm:$0xff]  }
 0x11f   :  { %2762 = vmatprep.subr.bf16.mxu1 %v6702_v5  ;;  %v6783_v5 = vld [vmem:[%s9723_s3 + $0x3c4] ss:$16 sps:$4 sm:$0xff]  }
 0x120   :  { %2616 = vmatprep.mubr.bf16.mxu0 %v1019_v9  ;;  %2780 = vmatprep.mubr.bf16.mxu1 %v1019_v9  ;;  %v181_v9 = vrot.slane %v7797_v55, %v7991_v4 }
 0x121   :  { %2617 = vmatmul.mubr.bf16.vlgmr.msra.gmra.mrb[0].mxu0 %v7821_v7 }
 0x122   :  { %2626 = vmatpush1.bf16.msra.mxu0 %v6697_v10  ;;  %2763 = vmatpush1.bf16.msra.mxu1 %v6700_v11  ;;  %v6781_v10 = vld [vmem:[%s9723_s3 + $0x3c0] ss:$16 sps:$4 sm:$0xff]   ;;  %v6784_v11 = vld [vmem:[%s9723_s3 + $0x2a8] ss:$16 sps:$4 sm:$0xff]  }
 0x123   :  { %2627 = vmatprep.subr.bf16.mxu0 %v6705_v12  ;;  %2764 = vmatprep.subr.bf16.mxu1 %v6708_v13  ;;  %v6789_v12 = vld [vmem:[%s9723_s3 + $0x3e4] ss:$16 sps:$4 sm:$0xff]   ;;  %v6792_v13 = vld [vmem:[%s9723_s3 + $0x2cc] ss:$16 sps:$4 sm:$0xff]  }
 0x126   :  { %2628 = vmatpush1.bf16.msra.mxu0 %v6703_v14  ;;  %2765 = vmatpush1.bf16.msra.mxu1 %v6706_v15 }
 0x127   :  { %2629 = vmatprep.subr.bf16.mxu0 %v6711_v16  ;;  %2766 = vmatprep.subr.bf16.mxu1 %v6714_v17 }
 0x12a   :  { %2630 = vmatpush1.bf16.msra.mxu0 %v6709_v19  ;;  %2767 = vmatpush1.bf16.msra.mxu1 %v6712_v20  ;;  %v6787_v20 = vld [vmem:[%s9723_s3 + $0x3e0] ss:$16 sps:$4 sm:$0xff]  }
 0x12b   :  { %2631 = vmatprep.subr.bf16.mxu0 %v6717_v21  ;;  %2768 = vmatprep.subr.bf16.mxu1 %v6720_v22  ;;  %v6790_v21 = vld [vmem:[%s9723_s3 + $0x2c8] ss:$16 sps:$4 sm:$0xff]  }
 0x12e   :  { %2632 = vmatpush1.bf16.msra.mxu0 %v6715_v23  ;;  %2769 = vmatpush1.bf16.msra.mxu1 %v6718_v24  ;;  %v6795_v24 = vld [vmem:[%s9723_s3 + $0x404] ss:$16 sps:$4 sm:$0xff]  }
 0x12f   :  { %2633 = vmatprep.subr.bf16.mxu0 %v6723_v25  ;;  %2770 = vmatprep.subr.bf16.mxu1 %v6726_v26  ;;  %v6798_v25 = vld [vmem:[%s9723_s3 + $0x2ec] ss:$16 sps:$4 sm:$0xff]  }
 0x132   :  { %2634 = vmatpush1.bf16.msra.mxu0 %v6721_v27  ;;  %2771 = vmatpush1.bf16.msra.mxu1 %v6724_v28 }
 0x133   :  { %2635 = vmatprep.subr.bf16.mxu0 %v6729_v29  ;;  %2772 = vmatprep.subr.bf16.mxu1 %v6732_v30  ;;  %v6793_v29 = vld [vmem:[%s9723_s3 + $0x400] ss:$16 sps:$4 sm:$0xff]   ;;  %v6796_v30 = vld [vmem:[%s9723_s3 + $0x2e8] ss:$16 sps:$4 sm:$0xff]  }
 0x136   :  { %2636 = vmatpush1.bf16.msra.mxu0 %v6727_v31  ;;  %2773 = vmatpush1.bf16.msra.mxu1 %v6730_v32  ;;  %v6801_v31 = vld [vmem:[%s9723_s3 + $0x424] ss:$16 sps:$4 sm:$0xff]   ;;  %v6804_v32 = vld [vmem:[%s9723_s3 + $0x30c] ss:$16 sps:$4 sm:$0xff]  }
 0x137   :  { %2637 = vmatprep.subr.bf16.mxu0 %v6735_v33  ;;  %2774 = vmatprep.subr.bf16.mxu1 %v6738_v34  ;;  %v6799_v33 = vld [vmem:[%s9723_s3 + $0x420] ss:$16 sps:$4 sm:$0xff]   ;;  %v6802_v34 = vld [vmem:[%s9723_s3 + $0x308] ss:$16 sps:$4 sm:$0xff]  }
 0x13a   :  { %2638 = vmatpush1.bf16.msra.mxu0 %v6733_v35  ;;  %2775 = vmatpush1.bf16.msra.mxu1 %v6736_v36  ;;  %v6807_v35 = vld [vmem:[%s9723_s3 + $0x444] ss:$16 sps:$4 sm:$0xff]   ;;  %v6810_v36 = vld [vmem:[%s9723_s3 + $0x32c] ss:$16 sps:$4 sm:$0xff]  }
 0x13b   :  { %2639 = vmatprep.subr.bf16.mxu0 %v6741_v37  ;;  %2776 = vmatprep.subr.bf16.mxu1 %v6744_v38  ;;  %v6805_v37 = vld [vmem:[%s9723_s3 + $0x440] ss:$16 sps:$4 sm:$0xff]   ;;  %v6808_v38 = vld [vmem:[%s9723_s3 + $0x328] ss:$16 sps:$4 sm:$0xff]  }
 0x13e   :  { %2640 = vmatpush1.bf16.msra.mxu0 %v6739_v39  ;;  %2777 = vmatpush1.bf16.msra.mxu1 %v6742_v40  ;;  %v6813_v39 = vld [vmem:[%s9723_s3 + $0x464] ss:$16 sps:$4 sm:$0xff]   ;;  %v6816_v40 = vld [vmem:[%s9723_s3 + $0x34c] ss:$16 sps:$4 sm:$0xff]  }
 0x13f   :  { %2641 = vmatprep.subr.bf16.mxu0 %v6747_v41  ;;  %2778 = vmatprep.subr.bf16.mxu1 %v6750_v42  ;;  %v6811_v41 = vld [vmem:[%s9723_s3 + $0x460] ss:$16 sps:$4 sm:$0xff]   ;;  %v6814_v42 = vld [vmem:[%s9723_s3 + $0x348] ss:$16 sps:$4 sm:$0xff]  }
 0x142   :  { %2642 = vmatpush1.bf16.msra.mxu0 %v6745_v43  ;;  %2779 = vmatpush1.bf16.msra.mxu1 %v6748_v44  ;;  %v6819_v43 = vld [vmem:[%s9723_s3 + $0x484] ss:$16 sps:$4 sm:$0xff]   ;;  %v6822_v44 = vld [vmem:[%s9723_s3 + $0x36c] ss:$16 sps:$4 sm:$0xff]  }
 0x143   :  { %2643 = vmatprep.subr.bf16.mxu0 %v6753_v45  ;;  %2789 = vmatprep.subr.bf16.mxu1 %v6756_v46  ;;  %v6817_v45 = vld [vmem:[%s9723_s3 + $0x480] ss:$16 sps:$4 sm:$0xff]   ;;  %v6820_v46 = vld [vmem:[%s9723_s3 + $0x368] ss:$16 sps:$4 sm:$0xff]  }
 0x145   :  { %2781 = vmatmul.mubr.bf16.vlgmr.msra.gmra.mrb[16].mxu1 %v7821_v7  ;;  %v177_v7 = vrot.slane %v7797_v55, %v7982_v1 }
 0x146   :  { %2644 = vmatpush1.bf16.msra.mxu0 %v6751_v47  ;;  %2790 = vmatpush1.bf16.msra.mxu1 %v6754_v48  ;;  %v6825_v47 = vld [vmem:[%s9723_s3 + $0x4a4] ss:$16 sps:$4 sm:$0xff]   ;;  %v6828_v48 = vld [vmem:[%s9723_s3 + $0x38c] ss:$16 sps:$4 sm:$0xff]  }
 0x147   :  { %2645 = vmatprep.subr.bf16.mxu0 %v6759_v49  ;;  %2791 = vmatprep.subr.bf16.mxu1 %v6762_v8  ;;  %v6823_v49 = vld [vmem:[%s9723_s3 + $0x4a0] ss:$16 sps:$4 sm:$0xff]   ;;  %v6826_v8 = vld [vmem:[%s9723_s3 + $0x388] ss:$16 sps:$4 sm:$0xff]  }
 0x14a   :  { %2646 = vmatpush1.bf16.msra.mxu0 %v6757_v51  ;;  %2792 = vmatpush1.bf16.msra.mxu1 %v6760_v52  ;;  %v6831_v51 = vld [vmem:[%s9723_s3 + $0x4c4] ss:$16 sps:$4 sm:$0xff]   ;;  %v6834_v52 = vld [vmem:[%s9723_s3 + $0x3ac] ss:$16 sps:$4 sm:$0xff]  }
 0x14b   :  { %2647 = vmatprep.subr.bf16.mxu0 %v6765_v54  ;;  %2793 = vmatprep.subr.bf16.mxu1 %v6768_v57  ;;  %v6829_v54 = vld [vmem:[%s9723_s3 + $0x4c0] ss:$16 sps:$4 sm:$0xff]   ;;  %v6832_v57 = vld [vmem:[%s9723_s3 + $0x3a8] ss:$16 sps:$4 sm:$0xff]  }
 0x14e   :  { %2648 = vmatpush1.bf16.msra.mxu0 %v6763_v18  ;;  %2794 = vmatpush1.bf16.msra.mxu1 %v6766_v58  ;;  %v6837_v18 = vld [vmem:[%s9723_s3 + $0x4e4] ss:$16 sps:$4 sm:$0xff]   ;;  %v6840_v58 = vld [vmem:[%s9723_s3 + $0x3cc] ss:$16 sps:$4 sm:$0xff]  }
 0x14f   :  { %2649 = vmatprep.subr.bf16.mxu0 %v6771_v59  ;;  %2795 = vmatprep.subr.bf16.mxu1 %v6774_v60  ;;  %v6835_v59 = vld [vmem:[%s9723_s3 + $0x4e0] ss:$16 sps:$4 sm:$0xff]   ;;  %v6838_v60 = vld [vmem:[%s9723_s3 + $0x3c8] ss:$16 sps:$4 sm:$0xff]  }
 0x152   :  { %2650 = vmatpush1.bf16.msra.mxu0 %v6769_v61  ;;  %2796 = vmatpush1.bf16.msra.mxu1 %v6772_v62  ;;  %v6843_v61 = vld [vmem:[%s9723_s3 + $0x504] ss:$16 sps:$4 sm:$0xff]   ;;  %v6846_v62 = vld [vmem:[%s9723_s3 + $0x3ec] ss:$16 sps:$4 sm:$0xff]  }
 0x153   :  { %2651 = vmatprep.subr.bf16.mxu0 %v6777_v63  ;;  %2797 = vmatprep.subr.bf16.mxu1 %v6780_v0  ;;  %v6841_v63 = vld [vmem:[%s9723_s3 + $0x500] ss:$16 sps:$4 sm:$0xff]   ;;  %v6844_v0 = vld [vmem:[%s9723_s3 + $0x3e8] ss:$16 sps:$4 sm:$0xff]  }
 0x156   :  { %2652 = vmatpush1.bf16.msra.mxu0 %v6775_v2  ;;  %2798 = vmatpush1.bf16.msra.mxu1 %v6778_v3  ;;  %v6849_v2 = vld [vmem:[%s9723_s3 + $0x524] ss:$16 sps:$4 sm:$0xff]   ;;  %v6852_v3 = vld [vmem:[%s9723_s3 + $0x40c] ss:$16 sps:$4 sm:$0xff]  }
 0x157   :  { %2653 = vmatprep.subr.bf16.mxu0 %v6783_v5  ;;  %2799 = vmatprep.subr.bf16.mxu1 %v6786_v6  ;;  %v6847_v5 = vld [vmem:[%s9723_s3 + $0x520] ss:$16 sps:$4 sm:$0xff]   ;;  %v6850_v6 = vld [vmem:[%s9723_s3 + $0x408] ss:$16 sps:$4 sm:$0xff]  }
 0x158   :  { %v921_v14 = vpop.f32.mrb[4].mxu1 }
 0x159   :  { %v922_v15 = vadd.f32 %v921_v14, %v177_v7  ;;  %v923_v16 = vpop.f32.mrb[5].mxu1  ;;  %v6855_v7 = vld [vmem:[%s9723_s3 + $0x544] ss:$16 sps:$4 sm:$0xff]   ;;  %v6859_v14 = vld [vmem:[%s9723_s3 + $0x560] ss:$16 sps:$4 sm:$0xff]  }
 0x15a   :  { %v924_v17 = vadd.f32 %v923_v16, %v181_v9  ;;  %v925_v19 = vpop.f32.mrb[6].mxu1  ;;  %2654 = vmatpush1.bf16.msra.mxu0 %v6781_v10  ;;  %2800 = vmatpush1.bf16.msra.mxu1 %v6784_v11  ;;  %v6858_v9 = vld [vmem:[%s9723_s3 + $0x42c] ss:$16 sps:$4 sm:$0xff]   ;;  %v6853_v10 = vld [vmem:[%s9723_s3 + $0x540] ss:$16 sps:$4 sm:$0xff]  }
 0x15b   :  { %v1012_v22 = vmax.f32 %v922_v15, 0.0  ;;  %v926_v23 = vpop.f32.mrb[7].mxu1  ;;  %2655 = vmatprep.subr.bf16.mxu0 %v6789_v12  ;;  %2801 = vmatprep.subr.bf16.mxu1 %v6792_v13  ;;  %v6856_v11 = vld [vmem:[%s9723_s3 + $0x428] ss:$16 sps:$4 sm:$0xff]   ;;  %v6861_v12 = vld [vmem:[%s9723_s3 + $0x564] ss:$16 sps:$4 sm:$0xff]  }
 0x15c   :  { %v1013_v26 = vmax.f32 %v924_v17, 0.0  ;;  %v6864_v13 = vld [vmem:[%s9723_s3 + $0x44c] ss:$16 sps:$4 sm:$0xff]   ;;  %v6862_v15 = vld [vmem:[%s9723_s3 + $0x448] ss:$16 sps:$4 sm:$0xff]   ;;  %v184_v23 = vsub.s32 4, %v7780_v50 }
 0x15d   :  { %v8027_v27 = vpack.c.bf16 %v1012_v22, %v1012_v22  ;;  %v6867_v16 = vld [vmem:[%s9723_s3 + $0x584] ss:$16 sps:$4 sm:$0xff]   ;;  %v6870_v17 = vld [vmem:[%s9723_s3 + $0x46c] ss:$16 sps:$4 sm:$0xff]   ;;  %v6865_v19 = vld [vmem:[%s9723_s3 + $0x580] ss:$16 sps:$4 sm:$0xff]  }
 0x15e   :  { %v1021_v28 = vpack.c.bf16 %v1013_v26, %v1013_v26  ;;  %2656 = vmatpush1.bf16.msra.mxu0 %v6787_v20  ;;  %2802 = vmatpush1.bf16.msra.mxu1 %v6790_v21  ;;  %v6868_v20 = vld [vmem:[%s9723_s3 + $0x468] ss:$16 sps:$4 sm:$0xff]   ;;  %v6873_v21 = vld [vmem:[%s9723_s3 + $0x5a4] ss:$16 sps:$4 sm:$0xff]   ;;  %v6876_v22 = vld [vmem:[%s9723_s3 + $0x48c] ss:$16 sps:$4 sm:$0xff]  }
 0x15f   :  { %2666 = vmatprep.subr.bf16.mxu0 %v6795_v24  ;;  %2803 = vmatprep.subr.bf16.mxu1 %v6798_v25  ;;  %v6871_v24 = vld [vmem:[%s9723_s3 + $0x5a0] ss:$16 sps:$4 sm:$0xff]   ;;  %v6874_v25 = vld [vmem:[%s9723_s3 + $0x488] ss:$16 sps:$4 sm:$0xff]   ;;  %v188_v26 = vsub.s32 5, %v7780_v50 }
 0x160   :  { %2657 = vmatprep.mubr.bf16.mxu0 %v1021_v28  ;;  %2821 = vmatprep.mubr.bf16.mxu1 %v1021_v28  ;;  %v6882_v28 = vld [vmem:[%s9723_s3 + $0x4ac] ss:$16 sps:$4 sm:$0xff]  }
 0x161   :  { %2658 = vmatmul.mubr.bf16.vlgmr.msra.gmra.mrb[0].mxu0 %v8027_v27 }
 0x162   :  { %2667 = vmatpush1.bf16.msra.mxu0 %v6793_v29  ;;  %2804 = vmatpush1.bf16.msra.mxu1 %v6796_v30  ;;  %v185_v29 = vrot.slane %v7797_v55, %v184_v23  ;;  %v189_v30 = vrot.slane %v7797_v55, %v188_v26 }
 0x163   :  { %2668 = vmatprep.subr.bf16.mxu0 %v6801_v31  ;;  %2805 = vmatprep.subr.bf16.mxu1 %v6804_v32  ;;  %v6877_v31 = vld [vmem:[%s9723_s3 + $0x5c0] ss:$16 sps:$4 sm:$0xff]   ;;  %v6880_v32 = vld [vmem:[%s9723_s3 + $0x4a8] ss:$16 sps:$4 sm:$0xff]  }
 0x166   :  { %2669 = vmatpush1.bf16.msra.mxu0 %v6799_v33  ;;  %2806 = vmatpush1.bf16.msra.mxu1 %v6802_v34  ;;  %v6885_v33 = vld [vmem:[%s9723_s3 + $0x5e4] ss:$16 sps:$4 sm:$0xff]   ;;  %v6888_v34 = vld [vmem:[%s9723_s3 + $0x4cc] ss:$16 sps:$4 sm:$0xff]  }
 0x167   :  { %2670 = vmatprep.subr.bf16.mxu0 %v6807_v35  ;;  %2807 = vmatprep.subr.bf16.mxu1 %v6810_v36 }
 0x16a   :  { %2671 = vmatpush1.bf16.msra.mxu0 %v6805_v37  ;;  %2808 = vmatpush1.bf16.msra.mxu1 %v6808_v38 }
 0x16b   :  { %2672 = vmatprep.subr.bf16.mxu0 %v6813_v39  ;;  %2809 = vmatprep.subr.bf16.mxu1 %v6816_v40  ;;  %v6883_v40 = vld [vmem:[%s9723_s3 + $0x5e0] ss:$16 sps:$4 sm:$0xff]  }
 0x16e   :  { %2673 = vmatpush1.bf16.msra.mxu0 %v6811_v41  ;;  %2810 = vmatpush1.bf16.msra.mxu1 %v6814_v42  ;;  %v6886_v41 = vld [vmem:[%s9723_s3 + $0x4c8] ss:$16 sps:$4 sm:$0xff]  }
 0x16f   :  { %2674 = vmatprep.subr.bf16.mxu0 %v6819_v43  ;;  %2811 = vmatprep.subr.bf16.mxu1 %v6822_v44  ;;  %v6891_v44 = vld [vmem:[%s9723_s3 + $0x604] ss:$16 sps:$4 sm:$0xff]  }
 0x172   :  { %2675 = vmatpush1.bf16.msra.mxu0 %v6817_v45  ;;  %2812 = vmatpush1.bf16.msra.mxu1 %v6820_v46  ;;  %v6894_v45 = vld [vmem:[%s9723_s3 + $0x4ec] ss:$16 sps:$4 sm:$0xff]  }
 0x173   :  { %2676 = vmatprep.subr.bf16.mxu0 %v6825_v47  ;;  %2813 = vmatprep.subr.bf16.mxu1 %v6828_v48 }
 0x176   :  { %2677 = vmatpush1.bf16.msra.mxu0 %v6823_v49  ;;  %2814 = vmatpush1.bf16.msra.mxu1 %v6826_v8  ;;  %v6889_v49 = vld [vmem:[%s9723_s3 + $0x600] ss:$16 sps:$4 sm:$0xff]   ;;  %v6892_v8 = vld [vmem:[%s9723_s3 + $0x4e8] ss:$16 sps:$4 sm:$0xff]  }
 0x177   :  { %2678 = vmatprep.subr.bf16.mxu0 %v6831_v51  ;;  %2815 = vmatprep.subr.bf16.mxu1 %v6834_v52  ;;  %v6897_v51 = vld [vmem:[%s9723_s3 + $0x624] ss:$16 sps:$4 sm:$0xff]   ;;  %v6900_v52 = vld [vmem:[%s9723_s3 + $0x50c] ss:$16 sps:$4 sm:$0xff]  }
 0x17a   :  { %2679 = vmatpush1.bf16.msra.mxu0 %v6829_v54  ;;  %2816 = vmatpush1.bf16.msra.mxu1 %v6832_v57  ;;  %v6895_v54 = vld [vmem:[%s9723_s3 + $0x620] ss:$16 sps:$4 sm:$0xff]   ;;  %v6898_v57 = vld [vmem:[%s9723_s3 + $0x508] ss:$16 sps:$4 sm:$0xff]  }
 0x17b   :  { %2680 = vmatprep.subr.bf16.mxu0 %v6837_v18  ;;  %2817 = vmatprep.subr.bf16.mxu1 %v6840_v58  ;;  %v6903_v18 = vld [vmem:[%s9723_s3 + $0x644] ss:$16 sps:$4 sm:$0xff]   ;;  %v6906_v58 = vld [vmem:[%s9723_s3 + $0x52c] ss:$16 sps:$4 sm:$0xff]  }
 0x17e   :  { %2681 = vmatpush1.bf16.msra.mxu0 %v6835_v59  ;;  %2818 = vmatpush1.bf16.msra.mxu1 %v6838_v60  ;;  %v6901_v59 = vld [vmem:[%s9723_s3 + $0x640] ss:$16 sps:$4 sm:$0xff]   ;;  %v6904_v60 = vld [vmem:[%s9723_s3 + $0x528] ss:$16 sps:$4 sm:$0xff]  }
 0x17f   :  { %2682 = vmatprep.subr.bf16.mxu0 %v6843_v61  ;;  %2819 = vmatprep.subr.bf16.mxu1 %v6846_v62  ;;  %v6909_v61 = vld [vmem:[%s9723_s3 + $0x664] ss:$16 sps:$4 sm:$0xff]   ;;  %v6912_v62 = vld [vmem:[%s9723_s3 + $0x54c] ss:$16 sps:$4 sm:$0xff]  }
 0x182   :  { %2683 = vmatpush1.bf16.msra.mxu0 %v6841_v63  ;;  %2820 = vmatpush1.bf16.msra.mxu1 %v6844_v0  ;;  %v6907_v63 = vld [vmem:[%s9723_s3 + $0x660] ss:$16 sps:$4 sm:$0xff]   ;;  %v6910_v0 = vld [vmem:[%s9723_s3 + $0x548] ss:$16 sps:$4 sm:$0xff]  }
 0x183   :  { %2684 = vmatprep.subr.bf16.mxu0 %v6849_v2  ;;  %2830 = vmatprep.subr.bf16.mxu1 %v6852_v3  ;;  %v6915_v2 = vld [vmem:[%s9723_s3 + $0x684] ss:$16 sps:$4 sm:$0xff]   ;;  %v6918_v3 = vld [vmem:[%s9723_s3 + $0x56c] ss:$16 sps:$4 sm:$0xff]  }
 0x185   :  { %2822 = vmatmul.mubr.bf16.vlgmr.msra.gmra.mrb[16].mxu1 %v8027_v27  ;;  %v6879_v27 = vld [vmem:[%s9723_s3 + $0x5c4] ss:$16 sps:$4 sm:$0xff]  }
 0x186   :  { %2685 = vmatpush1.bf16.msra.mxu0 %v6847_v5  ;;  %2831 = vmatpush1.bf16.msra.mxu1 %v6850_v6  ;;  %v6913_v5 = vld [vmem:[%s9723_s3 + $0x680] ss:$16 sps:$4 sm:$0xff]   ;;  %v6916_v6 = vld [vmem:[%s9723_s3 + $0x568] ss:$16 sps:$4 sm:$0xff]  }
 0x187   :  { %2686 = vmatprep.subr.bf16.mxu0 %v6855_v7  ;;  %2832 = vmatprep.subr.bf16.mxu1 %v6858_v9  ;;  %v6921_v7 = vld [vmem:[%s9723_s3 + $0x6a4] ss:$16 sps:$4 sm:$0xff]   ;;  %v6924_v9 = vld [vmem:[%s9723_s3 + $0x58c] ss:$16 sps:$4 sm:$0xff]  }
 0x18a   :  { %2687 = vmatpush1.bf16.msra.mxu0 %v6853_v10  ;;  %2833 = vmatpush1.bf16.msra.mxu1 %v6856_v11  ;;  %v6919_v10 = vld [vmem:[%s9723_s3 + $0x6a0] ss:$16 sps:$4 sm:$0xff]   ;;  %v6922_v11 = vld [vmem:[%s9723_s3 + $0x588] ss:$16 sps:$4 sm:$0xff]  }
 0x18b   :  { %2688 = vmatprep.subr.bf16.mxu0 %v6861_v12  ;;  %2834 = vmatprep.subr.bf16.mxu1 %v6864_v13  ;;  %v6927_v12 = vld [vmem:[%s9723_s3 + $0x6c4] ss:$16 sps:$4 sm:$0xff]   ;;  %v6930_v13 = vld [vmem:[%s9723_s3 + $0x5ac] ss:$16 sps:$4 sm:$0xff]  }
 0x18e   :  { %2689 = vmatpush1.bf16.msra.mxu0 %v6859_v14  ;;  %2835 = vmatpush1.bf16.msra.mxu1 %v6862_v15  ;;  %v6925_v14 = vld [vmem:[%s9723_s3 + $0x6c0] ss:$16 sps:$4 sm:$0xff]   ;;  %v6928_v15 = vld [vmem:[%s9723_s3 + $0x5a8] ss:$16 sps:$4 sm:$0xff]  }
 0x18f   :  { %2690 = vmatprep.subr.bf16.mxu0 %v6867_v16  ;;  %2836 = vmatprep.subr.bf16.mxu1 %v6870_v17  ;;  %v6933_v16 = vld [vmem:[%s9723_s3 + $0x6e4] ss:$16 sps:$4 sm:$0xff]   ;;  %v6936_v17 = vld [vmem:[%s9723_s3 + $0x5cc] ss:$16 sps:$4 sm:$0xff]  }
 0x192   :  { %2691 = vmatpush1.bf16.msra.mxu0 %v6865_v19  ;;  %2837 = vmatpush1.bf16.msra.mxu1 %v6868_v20  ;;  %v6931_v19 = vld [vmem:[%s9723_s3 + $0x6e0] ss:$16 sps:$4 sm:$0xff]   ;;  %v6934_v20 = vld [vmem:[%s9723_s3 + $0x5c8] ss:$16 sps:$4 sm:$0xff]  }
 0x193   :  { %2692 = vmatprep.subr.bf16.mxu0 %v6873_v21  ;;  %2838 = vmatprep.subr.bf16.mxu1 %v6876_v22  ;;  %v6939_v21 = vld [vmem:[%s9723_s3 + $0x704] ss:$16 sps:$4 sm:$0xff]   ;;  %v6942_v22 = vld [vmem:[%s9723_s3 + $0x5ec] ss:$16 sps:$4 sm:$0xff]  }
 0x196   :  { %2693 = vmatpush1.bf16.msra.mxu0 %v6871_v24  ;;  %2839 = vmatpush1.bf16.msra.mxu1 %v6874_v25  ;;  %v6937_v24 = vld [vmem:[%s9723_s3 + $0x700] ss:$16 sps:$4 sm:$0xff]   ;;  %v6940_v25 = vld [vmem:[%s9723_s3 + $0x5e8] ss:$16 sps:$4 sm:$0xff]  }
 0x197   :  { %2694 = vmatprep.subr.bf16.mxu0 %v6879_v27  ;;  %2840 = vmatprep.subr.bf16.mxu1 %v6882_v28  ;;  %v6945_v27 = vld [vmem:[%s9723_s3 + $0x724] ss:$16 sps:$4 sm:$0xff]   ;;  %v6948_v28 = vld [vmem:[%s9723_s3 + $0x60c] ss:$16 sps:$4 sm:$0xff]  }
 0x198   :  { %v962_v35 = vpop.f32.mrb[8].mxu1 }
 0x199   :  { %v963_v36 = vadd.f32 %v962_v35, %v185_v29  ;;  %v964_v37 = vpop.f32.mrb[9].mxu1  ;;  %v6943_v29 = vld [vmem:[%s9723_s3 + $0x720] ss:$16 sps:$4 sm:$0xff]   ;;  %v6957_v35 = vld [vmem:[%s9723_s3 + $0x764] ss:$16 sps:$4 sm:$0xff]  }
 0x19a   :  { %v965_v38 = vadd.f32 %v964_v37, %v189_v30  ;;  %v966_v39 = vpop.f32.mrb[10].mxu1  ;;  %2695 = vmatpush1.bf16.msra.mxu0 %v6877_v31  ;;  %2841 = vmatpush1.bf16.msra.mxu1 %v6880_v32  ;;  %v6946_v30 = vld [vmem:[%s9723_s3 + $0x608] ss:$16 sps:$4 sm:$0xff]   ;;  %v6951_v31 = vld [vmem:[%s9723_s3 + $0x744] ss:$16 sps:$4 sm:$0xff]  }
 0x19b   :  { %v1014_v42 = vmax.f32 %v963_v36, 0.0  ;;  %v967_v43 = vpop.f32.mrb[11].mxu1  ;;  %2696 = vmatprep.subr.bf16.mxu0 %v6885_v33  ;;  %2842 = vmatprep.subr.bf16.mxu1 %v6888_v34  ;;  %v6954_v32 = vld [vmem:[%s9723_s3 + $0x62c] ss:$16 sps:$4 sm:$0xff]   ;;  %v6949_v33 = vld [vmem:[%s9723_s3 + $0x740] ss:$16 sps:$4 sm:$0xff]  }
 0x19c   :  { %v1015_v46 = vmax.f32 %v965_v38, 0.0  ;;  %v6952_v34 = vld [vmem:[%s9723_s3 + $0x628] ss:$16 sps:$4 sm:$0xff]   ;;  %v6960_v36 = vld [vmem:[%s9723_s3 + $0x64c] ss:$16 sps:$4 sm:$0xff]  }
 0x19d   :  { %v8231_v47 = vpack.c.bf16 %v1014_v42, %v1014_v42  ;;  %v6955_v37 = vld [vmem:[%s9723_s3 + $0x760] ss:$16 sps:$4 sm:$0xff]   ;;  %v6958_v38 = vld [vmem:[%s9723_s3 + $0x648] ss:$16 sps:$4 sm:$0xff]   ;;  %v6963_v39 = vld [vmem:[%s9723_s3 + $0x784] ss:$16 sps:$4 sm:$0xff]  }
 0x19e   :  { %v1023_v48 = vpack.c.bf16 %v1015_v46, %v1015_v46  ;;  %2697 = vmatpush1.bf16.msra.mxu0 %v6883_v40  ;;  %2843 = vmatpush1.bf16.msra.mxu1 %v6886_v41  ;;  %v6966_v40 = vld [vmem:[%s9723_s3 + $0x66c] ss:$16 sps:$4 sm:$0xff]   ;;  %v6961_v41 = vld [vmem:[%s9723_s3 + $0x780] ss:$16 sps:$4 sm:$0xff]   ;;  %v6964_v42 = vld [vmem:[%s9723_s3 + $0x668] ss:$16 sps:$4 sm:$0xff]  }
 0x19f   :  { %2707 = vmatprep.subr.bf16.mxu0 %v6891_v44  ;;  %2844 = vmatprep.subr.bf16.mxu1 %v6894_v45  ;;  %v6969_v43 = vld [vmem:[%s9723_s3 + $0x7a4] ss:$16 sps:$4 sm:$0xff]   ;;  %v6972_v44 = vld [vmem:[%s9723_s3 + $0x68c] ss:$16 sps:$4 sm:$0xff]   ;;  %v192_v45 = vsub.s32 6, %v7780_v50 }
 0x1a0   :  { %2698 = vmatprep.mubr.bf16.mxu0 %v1023_v48  ;;  %2862 = vmatprep.mubr.bf16.mxu1 %v1023_v48  ;;  %v6967_v46 = vld [vmem:[%s9723_s3 + $0x7a0] ss:$16 sps:$4 sm:$0xff]   ;;  %v196_v48 = vsub.s32 7, %v7780_v50 }
 0x1a1   :  { %2699 = vmatmul.mubr.bf16.vlgmr.msra.gmra.mrb[0].mxu0 %v8231_v47  ;;  %v7201_v50 = vld [vmem:[%s9727_s7 + $0x3f0] ss:$8 sps:$4 sm:$0xff]  }
 0x1a2   :  { %2708 = vmatpush1.bf16.msra.mxu0 %v6889_v49  ;;  %2845 = vmatpush1.bf16.msra.mxu1 %v6892_v8  ;;  %v6975_v49 = vld [vmem:[%s9723_s3 + $0x7c4] ss:$16 sps:$4 sm:$0xff]   ;;  %v6978_v8 = vld [vmem:[%s9723_s3 + $0x6ac] ss:$16 sps:$4 sm:$0xff]  }
 0x1a3   :  { %2709 = vmatprep.subr.bf16.mxu0 %v6897_v51  ;;  %2846 = vmatprep.subr.bf16.mxu1 %v6900_v52  ;;  %v193_v51 = vrot.slane %v7797_v55, %v192_v45  ;;  %v197_v52 = vrot.slane %v7797_v55, %v196_v48  ;;  %v2920_v55 = vld [vmem:[%s9725_s5] sm:$0xff] }
 0x1a6   :  { %2710 = vmatpush1.bf16.msra.mxu0 %v6895_v54  ;;  %2847 = vmatpush1.bf16.msra.mxu1 %v6898_v57  ;;  %v6973_v54 = vld [vmem:[%s9723_s3 + $0x7c0] ss:$16 sps:$4 sm:$0xff]   ;;  %v6976_v57 = vld [vmem:[%s9723_s3 + $0x6a8] ss:$16 sps:$4 sm:$0xff]  }
 0x1a7   :  { %2711 = vmatprep.subr.bf16.mxu0 %v6903_v18  ;;  %2848 = vmatprep.subr.bf16.mxu1 %v6906_v58  ;;  %v6981_v18 = vld [vmem:[%s9723_s3 + $0x7e4] ss:$16 sps:$4 sm:$0xff]   ;;  %v6984_v58 = vld [vmem:[%s9723_s3 + $0x6cc] ss:$16 sps:$4 sm:$0xff]  }
 0x1aa   :  { %2712 = vmatpush1.bf16.msra.mxu0 %v6901_v59  ;;  %2849 = vmatpush1.bf16.msra.mxu1 %v6904_v60  ;;  %v2924_v60 = vld [vmem:[%s9725_s5 + $0x20] sm:$0xff] }
 0x1ab   :  { %2713 = vmatprep.subr.bf16.mxu0 %v6909_v61  ;;  %2850 = vmatprep.subr.bf16.mxu1 %v6912_v62 }
 0x1ae   :  { %2714 = vmatpush1.bf16.msra.mxu0 %v6907_v63  ;;  %2851 = vmatpush1.bf16.msra.mxu1 %v6910_v0 }
 0x1af   :  { %2715 = vmatprep.subr.bf16.mxu0 %v6915_v2  ;;  %2852 = vmatprep.subr.bf16.mxu1 %v6918_v3  ;;  %v6979_v2 = vld [vmem:[%s9723_s3 + $0x7e0] ss:$16 sps:$4 sm:$0xff]   ;;  %v6982_v3 = vld [vmem:[%s9723_s3 + $0x6c8] ss:$16 sps:$4 sm:$0xff]  }
 0x1b2   :  { %2716 = vmatpush1.bf16.msra.mxu0 %v6913_v5  ;;  %2853 = vmatpush1.bf16.msra.mxu1 %v6916_v6 }
 0x1b3   :  { %2717 = vmatprep.subr.bf16.mxu0 %v6921_v7  ;;  %2854 = vmatprep.subr.bf16.mxu1 %v6924_v9  ;;  %v6987_v7 = vld [vmem:[%s9723_s3 + $0x6ec] ss:$16 sps:$4 sm:$0xff]   ;;  %v6179_v9 = vcombine.high %v2920_v55, %v2924_v60 }
 0x1b6   :  { %2718 = vmatpush1.bf16.msra.mxu0 %v6919_v10  ;;  %2855 = vmatpush1.bf16.msra.mxu1 %v6922_v11  ;;  %v2928_v11 = vld [vmem:[%s9725_s5 + $0x40] sm:$0xff] }
 0x1b7   :  { %2719 = vmatprep.subr.bf16.mxu0 %v6927_v12  ;;  %2856 = vmatprep.subr.bf16.mxu1 %v6930_v13  ;;  %v2932_v12 = vld [vmem:[%s9725_s5 + $0x60] sm:$0xff] }
 0x1ba   :  { %2720 = vmatpush1.bf16.msra.mxu0 %v6925_v14  ;;  %2857 = vmatpush1.bf16.msra.mxu1 %v6928_v15  ;;  %v6985_v14 = vld [vmem:[%s9723_s3 + $0x6e8] ss:$16 sps:$4 sm:$0xff]   ;;  %v6178_v15 = vcombine.low %v2920_v55, %v2924_v60  ;;  %v7008_v55 = vld [vmem:[%s9723_s3 + $0x7cc] ss:$16 sps:$4 sm:$0xff]  }
 0x1bb   :  { %2721 = vmatprep.subr.bf16.mxu0 %v6933_v16  ;;  %2858 = vmatprep.subr.bf16.mxu1 %v6936_v17  ;;  %v6990_v17 = vld [vmem:[%s9723_s3 + $0x70c] ss:$16 sps:$4 sm:$0xff]  }
 0x1be   :  { %2722 = vmatpush1.bf16.msra.mxu0 %v6931_v19  ;;  %2859 = vmatpush1.bf16.msra.mxu1 %v6934_v20  ;;  %v6187_v19 = vcombine.high %v2928_v11, %v2932_v12  ;;  %v2936_v20 = vld [vmem:[%s9725_s5 + $0x80] sm:$0xff] }
 0x1bf   :  { %2723 = vmatprep.subr.bf16.mxu0 %v6939_v21  ;;  %2860 = vmatprep.subr.bf16.mxu1 %v6942_v22  ;;  %v2940_v21 = vld [vmem:[%s9725_s5 + $0xa0] sm:$0xff]  ;;  %v6988_v22 = vld [vmem:[%s9723_s3 + $0x708] ss:$16 sps:$4 sm:$0xff]  }
 0x1c2   :  { %2724 = vmatpush1.bf16.msra.mxu0 %v6937_v24  ;;  %2861 = vmatpush1.bf16.msra.mxu1 %v6940_v25  ;;  %v6186_v24 = vcombine.low %v2928_v11, %v2932_v12  ;;  %v6993_v25 = vld [vmem:[%s9723_s3 + $0x72c] ss:$16 sps:$4 sm:$0xff]  }
 0x1c3   :  { %2725 = vmatprep.subr.bf16.mxu0 %v6945_v27  ;;  %2871 = vmatprep.subr.bf16.mxu1 %v6948_v28  ;;  %v6195_v27 = vcombine.high %v2936_v20, %v2940_v21  ;;  %v2944_v28 = vld [vmem:[%s9725_s5 + $0xc0] sm:$0xff] }
 0x1c5   :  { %2863 = vmatmul.mubr.bf16.vlgmr.msra.gmra.mrb[16].mxu1 %v8231_v47  ;;  %v6970_v47 = vld [vmem:[%s9723_s3 + $0x688] ss:$16 sps:$4 sm:$0xff]  }
 0x1c6   :  { %2726 = vmatpush1.bf16.msra.mxu0 %v6943_v29  ;;  %2872 = vmatpush1.bf16.msra.mxu1 %v6946_v30  ;;  %v2948_v29 = vld [vmem:[%s9725_s5 + $0xe0] sm:$0xff]  ;;  %v6991_v30 = vld [vmem:[%s9723_s3 + $0x728] ss:$16 sps:$4 sm:$0xff]  }
 0x1c7   :  { %2727 = vmatprep.subr.bf16.mxu0 %v6951_v31  ;;  %2873 = vmatprep.subr.bf16.mxu1 %v6954_v32  ;;  %v6194_v31 = vcombine.low %v2936_v20, %v2940_v21  ;;  %v6996_v32 = vld [vmem:[%s9723_s3 + $0x74c] ss:$16 sps:$4 sm:$0xff]  }
 0x1ca   :  { %2728 = vmatpush1.bf16.msra.mxu0 %v6949_v33  ;;  %2874 = vmatpush1.bf16.msra.mxu1 %v6952_v34  ;;  %v6203_v33 = vcombine.high %v2944_v28, %v2948_v29  ;;  %v2952_v34 = vld [vmem:[%s9725_s5 + $0x100] sm:$0xff] }
 0x1cb   :  { %2729 = vmatprep.subr.bf16.mxu0 %v6957_v35  ;;  %2875 = vmatprep.subr.bf16.mxu1 %v6960_v36  ;;  %v2956_v35 = vld [vmem:[%s9725_s5 + $0x120] sm:$0xff]  ;;  %v6994_v36 = vld [vmem:[%s9723_s3 + $0x748] ss:$16 sps:$4 sm:$0xff]  }
 0x1ce   :  { %2730 = vmatpush1.bf16.msra.mxu0 %v6955_v37  ;;  %2876 = vmatpush1.bf16.msra.mxu1 %v6958_v38  ;;  %v6202_v37 = vcombine.low %v2944_v28, %v2948_v29  ;;  %v6999_v38 = vld [vmem:[%s9723_s3 + $0x76c] ss:$16 sps:$4 sm:$0xff]   ;;  %v3008_v28 = vld [vmem:[%s9725_s5 + $0x2c0] sm:$0xff] }
 0x1cf   :  { %2731 = vmatprep.subr.bf16.mxu0 %v6963_v39  ;;  %2877 = vmatprep.subr.bf16.mxu1 %v6966_v40  ;;  %v6211_v39 = vcombine.high %v2952_v34, %v2956_v35  ;;  %v2960_v40 = vld [vmem:[%s9725_s5 + $0x140] sm:$0xff] }
 0x1d0   :  { %v3012_v29 = vld [vmem:[%s9725_s5 + $0x2e0] sm:$0xff] }
 0x1d2   :  { %2732 = vmatpush1.bf16.msra.mxu0 %v6961_v41  ;;  %2878 = vmatpush1.bf16.msra.mxu1 %v6964_v42  ;;  %v2964_v41 = vld [vmem:[%s9725_s5 + $0x160] sm:$0xff]  ;;  %v6997_v42 = vld [vmem:[%s9723_s3 + $0x768] ss:$16 sps:$4 sm:$0xff]  }
 0x1d3   :  { %2733 = vmatprep.subr.bf16.mxu0 %v6969_v43  ;;  %2879 = vmatprep.subr.bf16.mxu1 %v6972_v44  ;;  %v6210_v43 = vcombine.low %v2952_v34, %v2956_v35  ;;  %v7002_v44 = vld [vmem:[%s9723_s3 + $0x78c] ss:$16 sps:$4 sm:$0xff]   ;;  %v6267_v34 = vcombine.high %v3008_v28, %v3012_v29 }
 0x1d4   :  { %v2949_v35 = vld [vmem:[%s9725_s5 + $0xe8] sm:$0xff] }
 0x1d6   :  { %2734 = vmatpush1.bf16.msra.mxu0 %v6967_v46  ;;  %2880 = vmatpush1.bf16.msra.mxu1 %v6970_v47  ;;  %v6219_v46 = vcombine.high %v2960_v40, %v2964_v41  ;;  %v2968_v47 = vld [vmem:[%s9725_s5 + $0x180] sm:$0xff] }
 0x1d7   :  { %2735 = vmatprep.subr.bf16.mxu0 %v6975_v49  ;;  %2881 = vmatprep.subr.bf16.mxu1 %v6978_v8  ;;  %v2972_v49 = vld [vmem:[%s9725_s5 + $0x1a0] sm:$0xff]  ;;  %v7000_v8 = vld [vmem:[%s9723_s3 + $0x788] ss:$16 sps:$4 sm:$0xff]  }
 0x1d8   :  { %v1003_v59 = vpop.f32.mrb[12].mxu1 }
 0x1d9   :  { %v1004_v61 = vadd.f32 %v1003_v59, %v193_v51  ;;  %v1005_v62 = vpop.f32.mrb[13].mxu1  ;;  %v6218_v51 = vcombine.low %v2960_v40, %v2964_v41  ;;  %v6226_v59 = vcombine.low %v2968_v47, %v2972_v49  ;;  %v2953_v40 = vld [vmem:[%s9725_s5 + $0x108] sm:$0xff] }
 0x1da   :  { %v1006_v63 = vadd.f32 %v1005_v62, %v197_v52  ;;  %v1007_v0 = vpop.f32.mrb[14].mxu1  ;;  %2736 = vmatpush1.bf16.msra.mxu0 %v6973_v54  ;;  %2882 = vmatpush1.bf16.msra.mxu1 %v6976_v57  ;;  %v7005_v52 = vld [vmem:[%s9723_s3 + $0x7ac] ss:$16 sps:$4 sm:$0xff]   ;;  %v6227_v54 = vcombine.high %v2968_v47, %v2972_v49  ;;  %v2976_v57 = vld [vmem:[%s9725_s5 + $0x1c0] sm:$0xff] }
 0x1db   :  { %v1016_v5 = vmax.f32 %v1004_v61, 0.0  ;;  %v1008_v6 = vpop.f32.mrb[15].mxu1  ;;  %2737 = vmatprep.subr.bf16.mxu0 %v6981_v18  ;;  %2883 = vmatprep.subr.bf16.mxu1 %v6984_v58  ;;  %v2980_v18 = vld [vmem:[%s9725_s5 + $0x1e0] sm:$0xff]  ;;  %v7003_v58 = vld [vmem:[%s9723_s3 + $0x7a8] ss:$16 sps:$4 sm:$0xff]  }
 0x1dc   :  { %v1017_v10 = vmax.f32 %v1006_v63, 0.0  ;;  %v6235_v60 = vcombine.high %v2976_v57, %v2980_v18  ;;  %v2984_v61 = vld [vmem:[%s9725_s5 + $0x200] sm:$0xff]  ;;  %v7006_v63 = vld [vmem:[%s9723_s3 + $0x7c8] ss:$16 sps:$4 sm:$0xff]   ;;  %v6234_v0 = vcombine.low %v2976_v57, %v2980_v18 }
 0x1dd   :  { %v8447_v16 = vpack.c.bf16 %v1016_v5, %v1016_v5  ;;  %v2988_v62 = vld [vmem:[%s9725_s5 + $0x220] sm:$0xff]  ;;  %v2925_v6 = vld [vmem:[%s9725_s5 + $0x28] sm:$0xff] }
 0x1de   :  { %v1025_v13 = vpack.c.bf16 %v1017_v10, %v1017_v10  ;;  %2738 = vmatpush1.bf16.msra.mxu0 %v6979_v2  ;;  %2884 = vmatpush1.bf16.msra.mxu1 %v6982_v3  ;;  %v7011_v2 = vld [vmem:[%s9723_s3 + $0x7ec] ss:$16 sps:$4 sm:$0xff]   ;;  %v6243_v5 = vcombine.high %v2984_v61, %v2988_v62  ;;  %v7009_v10 = vld [vmem:[%s9723_s3 + $0x7e8] ss:$16 sps:$4 sm:$0xff]   ;;  %v6242_v11 = vcombine.low %v2984_v61, %v2988_v62 }
 0x1df   :  { %2885 = vmatprep.subr.bf16.mxu1 %v6987_v7  ;;  %4498 = vmatprep.subr.bf16.mxu0 %v6179_v9  ;;  %v2921_v3 = vld [vmem:[%s9725_s5 + $0x8] sm:$0xff]  ;;  %v2992_v7 = vld [vmem:[%s9725_s5 + $0x240] sm:$0xff] }
 0x1e0   :  { %2739 = vmatprep.mubr.bf16.mxu0 %v1025_v13  ;;  %2903 = vmatprep.mubr.bf16.mxu1 %v1025_v13  ;;  %v2996_v9 = vld [vmem:[%s9725_s5 + $0x260] sm:$0xff]  ;;  %v6181_v12 = vcombine.high %v2921_v3, %v2925_v6  ;;  %v2929_v13 = vld [vmem:[%s9725_s5 + $0x48] sm:$0xff]  ;;  %v6180_v20 = vcombine.low %v2921_v3, %v2925_v6 }
 0x1e1   :  { %2740 = vmatmul.mubr.bf16.vlgmr.msra.gmra.mrb[0].mxu0 %v8447_v16  ;;  %v6250_v21 = vcombine.low %v2992_v7, %v2996_v9  ;;  %v2977_v61 = vld [vmem:[%s9725_s5 + $0x1c8] sm:$0xff] }
 0x1e2   :  { %2886 = vmatpush1.bf16.msra.mxu1 %v6985_v14  ;;  %4499 = vmatpush1.bf16.msra.mxu0 %v6178_v15  ;;  %v6251_v14 = vcombine.high %v2992_v7, %v2996_v9  ;;  %v2933_v15 = vld [vmem:[%s9725_s5 + $0x68] sm:$0xff] }
 0x1e3   :  { %2887 = vmatprep.subr.bf16.mxu1 %v6990_v17  ;;  %4500 = vmatprep.subr.bf16.mxu0 %v6187_v19  ;;  %v3000_v17 = vld [vmem:[%s9725_s5 + $0x280] sm:$0xff]  ;;  %v2981_v62 = vld [vmem:[%s9725_s5 + $0x1e8] sm:$0xff] }
 0x1e4   :  { %v3004_v19 = vld [vmem:[%s9725_s5 + $0x2a0] sm:$0xff]  ;;  %v2989_v3 = vld [vmem:[%s9725_s5 + $0x228] sm:$0xff] }
 0x1e5   :  { %v2993_v7 = vld [vmem:[%s9725_s5 + $0x248] sm:$0xff] }
 0x1e6   :  { %2888 = vmatpush1.bf16.msra.mxu1 %v6988_v22  ;;  %4501 = vmatpush1.bf16.msra.mxu0 %v6186_v24  ;;  %v6189_v22 = vcombine.high %v2929_v13, %v2933_v15  ;;  %v2937_v24 = vld [vmem:[%s9725_s5 + $0x88] sm:$0xff] }
 0x1e7   :  { %2889 = vmatprep.subr.bf16.mxu1 %v6993_v25  ;;  %4502 = vmatprep.subr.bf16.mxu0 %v6195_v27  ;;  %v6259_v25 = vcombine.high %v3000_v17, %v3004_v19  ;;  %v2941_v27 = vld [vmem:[%s9725_s5 + $0xa8] sm:$0xff] }
 0x1e8   :  { %v2997_v9 = vld [vmem:[%s9725_s5 + $0x268] sm:$0xff] }
 0x1ea   :  { %2890 = vmatpush1.bf16.msra.mxu1 %v6991_v30  ;;  %4503 = vmatpush1.bf16.msra.mxu0 %v6194_v31  ;;  %v6188_v30 = vcombine.low %v2929_v13, %v2933_v15  ;;  %v6258_v31 = vcombine.low %v3000_v17, %v3004_v19  ;;  %v3005_v13 = vld [vmem:[%s9725_s5 + $0x2a8] sm:$0xff] }
 0x1eb   :  { %2891 = vmatprep.subr.bf16.mxu1 %v6996_v32  ;;  %4504 = vmatprep.subr.bf16.mxu0 %v6203_v33  ;;  %v6197_v32 = vcombine.high %v2937_v24, %v2941_v27  ;;  %v2945_v33 = vld [vmem:[%s9725_s5 + $0xc8] sm:$0xff] }
 0x1ec   :  { %v3009_v17 = vld [vmem:[%s9725_s5 + $0x2c8] sm:$0xff] }
 0x1ed   :  { %v3013_v19 = vld [vmem:[%s9725_s5 + $0x2e8] sm:$0xff] }
 0x1ee   :  { %2892 = vmatpush1.bf16.msra.mxu1 %v6994_v36  ;;  %4505 = vmatpush1.bf16.msra.mxu0 %v6202_v37  ;;  %v3020_v36 = vld [vmem:[%s9725_s5 + $0x320] sm:$0xff]  ;;  %v6196_v37 = vcombine.low %v2937_v24, %v2941_v27  ;;  %v3021_v24 = vld [vmem:[%s9725_s5 + $0x328] sm:$0xff] }
 0x1ef   :  { %2893 = vmatprep.subr.bf16.mxu1 %v6999_v38  ;;  %4506 = vmatprep.subr.bf16.mxu0 %v6211_v39  ;;  %v6266_v38 = vcombine.low %v3008_v28, %v3012_v29  ;;  %v6205_v39 = vcombine.high %v2945_v33, %v2949_v35  ;;  %v3025_v28 = vld [vmem:[%s9725_s5 + $0x348] sm:$0xff] }
 0x1f0   :  { %v3029_v29 = vld [vmem:[%s9725_s5 + $0x368] sm:$0xff] }
 0x1f2   :  { %2894 = vmatpush1.bf16.msra.mxu1 %v6997_v42  ;;  %4507 = vmatpush1.bf16.msra.mxu0 %v6210_v43  ;;  %v2957_v42 = vld [vmem:[%s9725_s5 + $0x128] sm:$0xff]  ;;  %v3024_v43 = vld [vmem:[%s9725_s5 + $0x340] sm:$0xff] }
 0x1f3   :  { %2895 = vmatprep.subr.bf16.mxu1 %v7002_v44  ;;  %4508 = vmatprep.subr.bf16.mxu0 %v6219_v46  ;;  %v3028_v44 = vld [vmem:[%s9725_s5 + $0x360] sm:$0xff]  ;;  %v6204_v46 = vcombine.low %v2945_v33, %v2949_v35  ;;  %v6213_v49 = vcombine.high %v2953_v40, %v2957_v42 }
 0x1f4   :  { %v6282_v57 = vcombine.low %v3024_v43, %v3028_v44 }
 0x1f6   :  { %2896 = vmatpush1.bf16.msra.mxu1 %v7000_v8  ;;  %4509 = vmatpush1.bf16.msra.mxu0 %v6218_v51  ;;  %v6283_v8 = vcombine.high %v3024_v43, %v3028_v44  ;;  %v2961_v51 = vld [vmem:[%s9725_s5 + $0x148] sm:$0xff] }
 0x1f7   :  { %2897 = vmatprep.subr.bf16.mxu1 %v7005_v52  ;;  %4510 = vmatprep.subr.bf16.mxu0 %v6227_v54  ;;  %v2965_v52 = vld [vmem:[%s9725_s5 + $0x168] sm:$0xff]  ;;  %v6212_v54 = vcombine.low %v2953_v40, %v2957_v42 }
 0x1f8   :  { %v6221_v18 = vcombine.high %v2961_v51, %v2965_v52  ;;  %v3041_v43 = vld [vmem:[%s9725_s5 + $0x3c8] sm:$0xff] }
 0x1f9   :  { %v3045_v44 = vld [vmem:[%s9725_s5 + $0x3e8] sm:$0xff] }
 0x1fa   :  { %2898 = vmatpush1.bf16.msra.mxu1 %v7003_v58  ;;  %4511 = vmatpush1.bf16.msra.mxu0 %v6226_v59  ;;  %v2969_v58 = vld [vmem:[%s9725_s5 + $0x188] sm:$0xff] }
 0x1fb   :  { %2899 = vmatprep.subr.bf16.mxu1 %v7008_v55  ;;  %4512 = vmatprep.subr.bf16.mxu0 %v6235_v60  ;;  %v2973_v59 = vld [vmem:[%s9725_s5 + $0x1a8] sm:$0xff]  ;;  %v6220_v55 = vcombine.low %v2961_v51, %v2965_v52 }
 0x1fc   :  { %v6229_v60 = vcombine.high %v2969_v58, %v2973_v59  ;;  %v3053_v52 = vld [vmem:[%s9725_s5 + $0x428] sm:$0xff] }
 0x1fe   :  { %2900 = vmatpush1.bf16.msra.mxu1 %v7006_v63  ;;  %4513 = vmatpush1.bf16.msra.mxu0 %v6234_v0  ;;  %v6228_v63 = vcombine.low %v2969_v58, %v2973_v59  ;;  %v6237_v0 = vcombine.high %v2977_v61, %v2981_v62  ;;  %v6300_v58 = vcombine.low %v3041_v43, %v3045_v44 }
 0x1ff   :  { %2901 = vmatprep.subr.bf16.mxu1 %v7011_v2  ;;  %4514 = vmatprep.subr.bf16.mxu0 %v6243_v5  ;;  %v2985_v2 = vld [vmem:[%s9725_s5 + $0x208] sm:$0xff]  ;;  %v6236_v5 = vcombine.low %v2977_v61, %v2981_v62 }
 0x200   :  { %v6245_v6 = vcombine.high %v2985_v2, %v2989_v3 }
 0x202   :  { %2902 = vmatpush1.bf16.msra.mxu1 %v7009_v10  ;;  %4515 = vmatpush1.bf16.msra.mxu0 %v6242_v11  ;;  %v6244_v10 = vcombine.low %v2985_v2, %v2989_v3  ;;  %v6253_v11 = vcombine.high %v2993_v7, %v2997_v9 }
 0x203   :  { %4580 = vmatprep.subr.bf16.mxu1 %v6181_v12  ;;  %4516 = vmatprep.subr.bf16.mxu0 %v6251_v14  ;;  %v3001_v12 = vld [vmem:[%s9725_s5 + $0x288] sm:$0xff]  ;;  %v6252_v14 = vcombine.low %v2993_v7, %v2997_v9  ;;  %v3056_v7 = vld [vmem:[%s9725_s5 + $0x440] sm:$0xff] }
 0x204   :  { %v6261_v15 = vcombine.high %v3001_v12, %v3005_v13 }
 0x205   :  { %2904 = vmatmul.mubr.bf16.vlgmr.msra.gmra.mrb[16].mxu1 %v8447_v16  ;;  %v3016_v16 = vld [vmem:[%s9725_s5 + $0x300] sm:$0xff] }
 0x206   :  { %4581 = vmatpush1.bf16.msra.mxu1 %v6180_v20  ;;  %4517 = vmatpush1.bf16.msra.mxu0 %v6250_v21  ;;  %v6275_v41 = vcombine.high %v3016_v16, %v3020_v36  ;;  %v6274_v47 = vcombine.low %v3016_v16, %v3020_v36  ;;  %v6260_v20 = vcombine.low %v3001_v12, %v3005_v13  ;;  %v3033_v16 = vld [vmem:[%s9725_s5 + $0x388] sm:$0xff] }
 0x207   :  { %4582 = vmatprep.subr.bf16.mxu1 %v6189_v22  ;;  %4518 = vmatprep.subr.bf16.mxu0 %v6259_v25  ;;  %v6269_v21 = vcombine.high %v3009_v17, %v3013_v19  ;;  %v3017_v22 = vld [vmem:[%s9725_s5 + $0x308] sm:$0xff]  ;;  %v6268_v25 = vcombine.low %v3009_v17, %v3013_v19  ;;  %v3064_v19 = vld [vmem:[%s9725_s5 + $0x480] sm:$0xff] }
 0x208   :  { %v6277_v27 = vcombine.high %v3017_v22, %v3021_v24  ;;  %v3037_v36 = vld [vmem:[%s9725_s5 + $0x3a8] sm:$0xff] }
 0x209   :  { %v3061_v12 = vld [vmem:[%s9725_s5 + $0x468] sm:$0xff] }
 0x20a   :  { %4583 = vmatpush1.bf16.msra.mxu1 %v6188_v30  ;;  %4519 = vmatpush1.bf16.msra.mxu0 %v6258_v31  ;;  %v3032_v30 = vld [vmem:[%s9725_s5 + $0x380] sm:$0xff] }
 0x20b   :  { %4584 = vmatprep.subr.bf16.mxu1 %v6197_v32  ;;  %4520 = vmatprep.subr.bf16.mxu0 %v6267_v34  ;;  %v3036_v31 = vld [vmem:[%s9725_s5 + $0x3a0] sm:$0xff]  ;;  %v6276_v32 = vcombine.low %v3017_v22, %v3021_v24  ;;  %v6285_v34 = vcombine.high %v3025_v28, %v3029_v29  ;;  %v3069_v22 = vld [vmem:[%s9725_s5 + $0x4a8] sm:$0xff] }
 0x20c   :  { %v6291_v33 = vcombine.high %v3032_v30, %v3036_v31  ;;  %v6290_v35 = vcombine.low %v3032_v30, %v3036_v31  ;;  %v3076_v30 = vld [vmem:[%s9725_s5 + $0x4e0] sm:$0xff]  ;;  %v3073_v31 = vld [vmem:[%s9725_s5 + $0x4c8] sm:$0xff] }
 0x20e   :  { %4585 = vmatpush1.bf16.msra.mxu1 %v6196_v37  ;;  %4521 = vmatpush1.bf16.msra.mxu0 %v6266_v38  ;;  %v3040_v37 = vld [vmem:[%s9725_s5 + $0x3c0] sm:$0xff] }
 0x20f   :  { %4586 = vmatprep.subr.bf16.mxu1 %v6205_v39  ;;  %4522 = vmatprep.subr.bf16.mxu0 %v6275_v41  ;;  %v3044_v38 = vld [vmem:[%s9725_s5 + $0x3e0] sm:$0xff]  ;;  %v6284_v39 = vcombine.low %v3025_v28, %v3029_v29  ;;  %v6293_v41 = vcombine.high %v3033_v16, %v3037_v36 }
 0x210   :  { %v6299_v40 = vcombine.high %v3040_v37, %v3044_v38  ;;  %v6298_v42 = vcombine.low %v3040_v37, %v3044_v38  ;;  %v3072_v29 = vld [vmem:[%s9725_s5 + $0x4c0] sm:$0xff]  ;;  %v3081_v38 = vld [vmem:[%s9725_s5 + $0x508] sm:$0xff] }
 0x211   :  { %v3084_v37 = vld [vmem:[%s9725_s5 + $0x520] sm:$0xff] }
 0x212   :  { %4587 = vmatpush1.bf16.msra.mxu1 %v6204_v46  ;;  %4523 = vmatpush1.bf16.msra.mxu0 %v6274_v47  ;;  %v3048_v46 = vld [vmem:[%s9725_s5 + $0x400] sm:$0xff] }
 0x213   :  { %4588 = vmatprep.subr.bf16.mxu1 %v6213_v49  ;;  %4524 = vmatprep.subr.bf16.mxu0 %v6283_v8  ;;  %v3052_v47 = vld [vmem:[%s9725_s5 + $0x420] sm:$0xff]  ;;  %v3049_v49 = vld [vmem:[%s9725_s5 + $0x408] sm:$0xff]  ;;  %v6292_v8 = vcombine.low %v3033_v16, %v3037_v36 }
 0x214   :  { %v6307_v51 = vcombine.high %v3048_v46, %v3052_v47  ;;  %v6309_v59 = vcombine.high %v3049_v49, %v3053_v52  ;;  %v3080_v36 = vld [vmem:[%s9725_s5 + $0x500] sm:$0xff] }
 0x216   :  { %4589 = vmatpush1.bf16.msra.mxu1 %v6212_v54  ;;  %4525 = vmatpush1.bf16.msra.mxu0 %v6282_v57  ;;  %v6301_v54 = vcombine.high %v3041_v43, %v3045_v44  ;;  %v6306_v57 = vcombine.low %v3048_v46, %v3052_v47  ;;  %v3088_v44 = vld [vmem:[%s9725_s5 + $0x540] sm:$0xff]  ;;  %v3089_v47 = vld [vmem:[%s9725_s5 + $0x548] sm:$0xff] }
 0x217   :  { %4590 = vmatprep.subr.bf16.mxu1 %v6221_v18  ;;  %4526 = vmatprep.subr.bf16.mxu0 %v6291_v33  ;;  %v6308_v18 = vcombine.low %v3049_v49, %v3053_v52  ;;  %v3092_v46 = vld [vmem:[%s9725_s5 + $0x560] sm:$0xff]  ;;  %v3093_v49 = vld [vmem:[%s9725_s5 + $0x568] sm:$0xff] }
 0x218   :  { %v6347_v52 = vcombine.high %v3088_v44, %v3092_v46 }
 0x21a   :  { %4591 = vmatpush1.bf16.msra.mxu1 %v6220_v55  ;;  %4527 = vmatpush1.bf16.msra.mxu0 %v6290_v35  ;;  %v8694_v55 = vld [vmem:[%s9726_s4] sm:$0xf]  ;;  %v6331_v35 = vcombine.high %v3072_v29, %v3076_v30 }
 0x21b   :  { %4592 = vmatprep.subr.bf16.mxu1 %v6229_v60  ;;  %4528 = vmatprep.subr.bf16.mxu0 %v6299_v40  ;;  %v1287_v60 = vrot.slane %v8694_v55, %v7789_v53  ;;  %v1291_v61 = vrot.slane %v8694_v55, %v7800_v56  ;;  %v6330_v40 = vcombine.low %v3072_v29, %v3076_v30  ;;  %v3121_v29 = vld [vmem:[%s9725_s5 + $0x648] sm:$0xff] }
 0x21c   :  { %v3125_v30 = vld [vmem:[%s9725_s5 + $0x668] sm:$0xff] }
 0x21e   :  { %4593 = vmatpush1.bf16.msra.mxu1 %v6228_v63  ;;  %4529 = vmatpush1.bf16.msra.mxu0 %v6298_v42  ;;  %v6339_v42 = vcombine.high %v3080_v36, %v3084_v37 }
 0x21f   :  { %4594 = vmatprep.subr.bf16.mxu1 %v6237_v0  ;;  %4539 = vmatprep.subr.bf16.mxu0 %v6307_v51 }
 0x222   :  { %4595 = vmatpush1.bf16.msra.mxu1 %v6236_v5 }
 0x223   :  { %4596 = vmatprep.subr.bf16.mxu1 %v6245_v6 }
 0x226   :  { %4597 = vmatpush1.bf16.msra.mxu1 %v6244_v10  ;;  %v3060_v10 = vld [vmem:[%s9725_s5 + $0x460] sm:$0xff] }
 0x227   :  { %4598 = vmatprep.subr.bf16.mxu1 %v6253_v11  ;;  %v3057_v11 = vld [vmem:[%s9725_s5 + $0x448] sm:$0xff]  ;;  %v6314_v24 = vcombine.low %v3056_v7, %v3060_v10 }
 0x228   :  { %v6317_v17 = vcombine.high %v3057_v11, %v3061_v12 }
 0x22a   :  { %4599 = vmatpush1.bf16.msra.mxu1 %v6252_v14 }
 0x22b   :  { %4600 = vmatprep.subr.bf16.mxu1 %v6261_v15  ;;  %v6315_v15 = vcombine.high %v3056_v7, %v3060_v10 }
 0x22e   :  { %4601 = vmatpush1.bf16.msra.mxu1 %v6260_v20  ;;  %v3068_v20 = vld [vmem:[%s9725_s5 + $0x4a0] sm:$0xff] }
 0x22f   :  { %4602 = vmatprep.subr.bf16.mxu1 %v6269_v21  ;;  %v3065_v21 = vld [vmem:[%s9725_s5 + $0x488] sm:$0xff]  ;;  %v6322_v33 = vcombine.low %v3064_v19, %v3068_v20 }
 0x230   :  { %v6325_v28 = vcombine.high %v3065_v21, %v3069_v22 }
 0x232   :  { %4603 = vmatpush1.bf16.msra.mxu1 %v6268_v25  ;;  %v6316_v25 = vcombine.low %v3057_v11, %v3061_v12  ;;  %v3112_v11 = vld [vmem:[%s9725_s5 + $0x600] sm:$0xff] }
 0x233   :  { %4604 = vmatprep.subr.bf16.mxu1 %v6277_v27  ;;  %v6323_v27 = vcombine.high %v3064_v19, %v3068_v20  ;;  %v3116_v12 = vld [vmem:[%s9725_s5 + $0x620] sm:$0xff] }
 0x236   :  { %4605 = vmatpush1.bf16.msra.mxu1 %v6276_v32  ;;  %v3077_v32 = vld [vmem:[%s9725_s5 + $0x4e8] sm:$0xff] }
 0x237   :  { %4606 = vmatprep.subr.bf16.mxu1 %v6285_v34  ;;  %v6324_v34 = vcombine.low %v3065_v21, %v3069_v22  ;;  %v6333_v16 = vcombine.high %v3073_v31, %v3077_v32  ;;  %v1299_v21 = vrot.slane %v8694_v55, %v7991_v4  ;;  %v6371_v22 = vcombine.high %v3112_v11, %v3116_v12 }
 0x23a   :  { %4607 = vmatpush1.bf16.msra.mxu1 %v6284_v39  ;;  %v3085_v39 = vld [vmem:[%s9725_s5 + $0x528] sm:$0xff] }
 0x23b   :  { %4608 = vmatprep.subr.bf16.mxu1 %v6293_v41  ;;  %v6332_v41 = vcombine.low %v3073_v31, %v3077_v32  ;;  %v6341_v43 = vcombine.high %v3081_v38, %v3085_v39  ;;  %v6340_v51 = vcombine.low %v3081_v38, %v3085_v39  ;;  %v3128_v38 = vld [vmem:[%s9725_s5 + $0x680] sm:$0xff] }
 0x23e   :  { %4609 = vmatpush1.bf16.msra.mxu1 %v6292_v8  ;;  %v6338_v8 = vcombine.low %v3080_v36, %v3084_v37  ;;  %v6381_v37 = vcombine.high %v3121_v29, %v3125_v30 }
 0x23f   :  { %4610 = vmatprep.subr.bf16.mxu1 %v6301_v54  ;;  %v6349_v54 = vcombine.high %v3089_v47, %v3093_v49 }
 0x242   :  { %4611 = vmatpush1.bf16.msra.mxu1 %v6300_v58  ;;  %v3097_v58 = vld [vmem:[%s9725_s5 + $0x588] sm:$0xff] }
 0x243   :  { %4621 = vmatprep.subr.bf16.mxu1 %v6309_v59  ;;  %v3101_v59 = vld [vmem:[%s9725_s5 + $0x5a8] sm:$0xff] }
 0x244   :  { %v6356_v7 = vcombine.low %v3097_v58, %v3101_v59 }
 0x2b4   :  { %v2741_v62 = vpop.f32.mrb[0].mxu0 }
 0x2b5   :  { %v6562_v63 = vadd.f32 %v2741_v62, %v1287_v60  ;;  %v2743_v0 = vpop.f32.mrb[1].mxu0  ;;  %v6346_v60 = vcombine.low %v3088_v44, %v3092_v46  ;;  %v6380_v46 = vcombine.low %v3121_v29, %v3125_v30 }
 0x2b6   :  { %v6563_v2 = vadd.f32 %v2743_v0, %v1291_v61  ;;  %v2745_v3 = vpop.f32.mrb[2].mxu0  ;;  %v6348_v61 = vcombine.low %v3089_v47, %v3093_v49  ;;  %v3104_v0 = vld [vmem:[%s9725_s5 + $0x5c0] sm:$0xff] }
 0x2b7   :  { %v2912_v5 = vmax.f32 %v6562_v63, 0.0  ;;  %v2746_v6 = vpop.f32.mrb[3].mxu0  ;;  %v6357_v63 = vcombine.high %v3097_v58, %v3101_v59  ;;  %v3105_v3 = vld [vmem:[%s9725_s5 + $0x5c8] sm:$0xff] }
 0x2b8   :  { %v2913_v9 = vmax.f32 %v6563_v2, 0.0  ;;  %v3108_v2 = vld [vmem:[%s9725_s5 + $0x5e0] sm:$0xff] }
 0x2b9   :  { %v8714_v14 = vpack.c.bf16 %v2912_v5, %v2912_v5  ;;  %v3109_v5 = vld [vmem:[%s9725_s5 + $0x5e8] sm:$0xff]  ;;  %v6362_v19 = vcombine.low %v3104_v0, %v3108_v2 }
 0x2ba   :  { %v8712_v13 = vpack.c.bf16 %v2913_v9, %v2913_v9  ;;  %v6363_v9 = vcombine.high %v3104_v0, %v3108_v2  ;;  %v6365_v10 = vcombine.high %v3105_v3, %v3109_v5  ;;  %v6364_v20 = vcombine.low %v3105_v3, %v3109_v5 }
 0x2bc   :  { %4530 = vmatprep.mubr.bf16.mxu0 %v8712_v13  ;;  %4612 = vmatprep.mubr.bf16.mxu1 %v8712_v13 }
 0x2bd   :  { %4531 = vmatmul.mubr.bf16.vlgmr.msra.gmra.mrb[4].mxu0 %v8714_v14  ;;  %4613 = vmatmul.mubr.bf16.vlgmr.msra.gmra.mrb[20].mxu1 %v8714_v14 }
 0x2be   :  { %4540 = vmatpush1.bf16.msra.mxu0 %v6306_v57  ;;  %4622 = vmatpush1.bf16.msra.mxu1 %v6308_v18  ;;  %v3096_v57 = vld [vmem:[%s9725_s5 + $0x580] sm:$0xff] }
 0x2bf   :  { %4541 = vmatprep.subr.bf16.mxu0 %v6315_v15  ;;  %4623 = vmatprep.subr.bf16.mxu1 %v6317_v17  ;;  %v3100_v18 = vld [vmem:[%s9725_s5 + $0x5a0] sm:$0xff]  ;;  %v3113_v15 = vld [vmem:[%s9725_s5 + $0x608] sm:$0xff] }
 0x2c0   :  { %v6355_v62 = vcombine.high %v3096_v57, %v3100_v18  ;;  %v6354_v6 = vcombine.low %v3096_v57, %v3100_v18  ;;  %v3117_v17 = vld [vmem:[%s9725_s5 + $0x628] sm:$0xff] }
 0x2c2   :  { %4542 = vmatpush1.bf16.msra.mxu0 %v6314_v24  ;;  %4624 = vmatpush1.bf16.msra.mxu1 %v6316_v25  ;;  %v6373_v24 = vcombine.high %v3113_v15, %v3117_v17  ;;  %v3120_v25 = vld [vmem:[%s9725_s5 + $0x640] sm:$0xff] }
 0x2c3   :  { %4543 = vmatprep.subr.bf16.mxu0 %v6323_v27  ;;  %4625 = vmatprep.subr.bf16.mxu1 %v6325_v28  ;;  %v3124_v28 = vld [vmem:[%s9725_s5 + $0x660] sm:$0xff] }
 0x2c4   :  { %v6379_v36 = vcombine.high %v3120_v25, %v3124_v28  ;;  %v6378_v44 = vcombine.low %v3120_v25, %v3124_v28  ;;  %v1295_v28 = vrot.slane %v8694_v55, %v7982_v1  ;;  %v3173_v55 = vld [vmem:[%s9725_s5 + $0x7e8] sm:$0xff] }
 0x2c6   :  { %4544 = vmatpush1.bf16.msra.mxu0 %v6322_v33  ;;  %4626 = vmatpush1.bf16.msra.mxu1 %v6324_v34  ;;  %v6370_v34 = vcombine.low %v3112_v11, %v3116_v12 }
 0x2c7   :  { %4545 = vmatprep.subr.bf16.mxu0 %v6331_v35  ;;  %4627 = vmatprep.subr.bf16.mxu1 %v6333_v16  ;;  %v6372_v35 = vcombine.low %v3113_v15, %v3117_v17 }
 0x2ca   :  { %4546 = vmatpush1.bf16.msra.mxu0 %v6330_v40  ;;  %4628 = vmatpush1.bf16.msra.mxu1 %v6332_v41  ;;  %v3132_v40 = vld [vmem:[%s9725_s5 + $0x6a0] sm:$0xff]  ;;  %v3129_v41 = vld [vmem:[%s9725_s5 + $0x688] sm:$0xff] }
 0x2cb   :  { %4547 = vmatprep.subr.bf16.mxu0 %v6339_v42  ;;  %4629 = vmatprep.subr.bf16.mxu1 %v6341_v43  ;;  %v3133_v42 = vld [vmem:[%s9725_s5 + $0x6a8] sm:$0xff]  ;;  %v6387_v47 = vcombine.high %v3128_v38, %v3132_v40  ;;  %v6386_v57 = vcombine.low %v3128_v38, %v3132_v40  ;;  %v2922_v38 = vld [vmem:[%s9725_s5 + $0x10] sm:$0xff]  ;;  %v2923_v40 = vld [vmem:[%s9725_s5 + $0x18] sm:$0xff] }
 0x2cc   :  { %v6389_v49 = vcombine.high %v3129_v41, %v3133_v42  ;;  %v6388_v18 = vcombine.low %v3129_v41, %v3133_v42 }
 0x2ce   :  { %4548 = vmatpush1.bf16.msra.mxu0 %v6338_v8  ;;  %4630 = vmatpush1.bf16.msra.mxu1 %v6340_v51  ;;  %v3136_v8 = vld [vmem:[%s9725_s5 + $0x6c0] sm:$0xff] }
 0x2cf   :  { %4549 = vmatprep.subr.bf16.mxu0 %v6347_v52  ;;  %4631 = vmatprep.subr.bf16.mxu1 %v6349_v54  ;;  %v3140_v51 = vld [vmem:[%s9725_s5 + $0x6e0] sm:$0xff]  ;;  %v3137_v52 = vld [vmem:[%s9725_s5 + $0x6c8] sm:$0xff] }
 0x2d0   :  { %v3141_v54 = vld [vmem:[%s9725_s5 + $0x6e8] sm:$0xff]  ;;  %v6395_v58 = vcombine.high %v3136_v8, %v3140_v51  ;;  %v6394_v0 = vcombine.low %v3136_v8, %v3140_v51  ;;  %v2934_v8 = vld [vmem:[%s9725_s5 + $0x70] sm:$0xff]  ;;  %v2931_v51 = vld [vmem:[%s9725_s5 + $0x58] sm:$0xff] }
 0x2d1   :  { %v6397_v59 = vcombine.high %v3137_v52, %v3141_v54  ;;  %v6396_v2 = vcombine.low %v3137_v52, %v3141_v54  ;;  %v2935_v52 = vld [vmem:[%s9725_s5 + $0x78] sm:$0xff] }
 0x2d2   :  { %4550 = vmatpush1.bf16.msra.mxu0 %v6346_v60  ;;  %4632 = vmatpush1.bf16.msra.mxu1 %v6348_v61  ;;  %v3144_v60 = vld [vmem:[%s9725_s5 + $0x700] sm:$0xff] }
 0x2d3   :  { %4551 = vmatprep.subr.bf16.mxu0 %v6355_v62  ;;  %4633 = vmatprep.subr.bf16.mxu1 %v6357_v63  ;;  %v3148_v61 = vld [vmem:[%s9725_s5 + $0x720] sm:$0xff]  ;;  %v3145_v62 = vld [vmem:[%s9725_s5 + $0x708] sm:$0xff] }
 0x2d4   :  { %v3149_v63 = vld [vmem:[%s9725_s5 + $0x728] sm:$0xff]  ;;  %v6403_v3 = vcombine.high %v3144_v60, %v3148_v61  ;;  %v6402_v11 = vcombine.low %v3144_v60, %v3148_v61  ;;  %v2938_v60 = vld [vmem:[%s9725_s5 + $0x90] sm:$0xff] }
 0x2d5   :  { %v6405_v5 = vcombine.high %v3145_v62, %v3149_v63  ;;  %v6404_v12 = vcombine.low %v3145_v62, %v3149_v63  ;;  %v2942_v61 = vld [vmem:[%s9725_s5 + $0xb0] sm:$0xff]  ;;  %v2939_v62 = vld [vmem:[%s9725_s5 + $0x98] sm:$0xff] }
 0x2d6   :  { %4552 = vmatpush1.bf16.msra.mxu0 %v6354_v6  ;;  %4634 = vmatpush1.bf16.msra.mxu1 %v6356_v7  ;;  %v3152_v6 = vld [vmem:[%s9725_s5 + $0x740] sm:$0xff]  ;;  %v2943_v63 = vld [vmem:[%s9725_s5 + $0xb8] sm:$0xff] }
 0x2d7   :  { %4553 = vmatprep.subr.bf16.mxu0 %v6363_v9  ;;  %4635 = vmatprep.subr.bf16.mxu1 %v6365_v10  ;;  %v3156_v7 = vld [vmem:[%s9725_s5 + $0x760] sm:$0xff]  ;;  %v3153_v9 = vld [vmem:[%s9725_s5 + $0x748] sm:$0xff] }
 0x2d8   :  { %v8809_v27 = vpop.f32.mrb[16].mxu1  ;;  %v3157_v10 = vld [vmem:[%s9725_s5 + $0x768] sm:$0xff]  ;;  %v6411_v15 = vcombine.high %v3152_v6, %v3156_v7 }
 0x2d9   :  { %v2907_v31 = vpop.f32.mrb[17].mxu1  ;;  %v6413_v17 = vcombine.high %v3153_v9, %v3157_v10  ;;  %v6412_v25 = vcombine.low %v3153_v9, %v3157_v10  ;;  %v2947_v9 = vld [vmem:[%s9725_s5 + $0xd8] sm:$0xff]  ;;  %v6198_v10 = vcombine.low %v2938_v60, %v2942_v61 }
 0x2da   :  { %v6565_v32 = vadd.f32 %v2907_v31, %v1299_v21  ;;  %4554 = vmatpush1.bf16.msra.mxu0 %v6362_v19  ;;  %4636 = vmatpush1.bf16.msra.mxu1 %v6364_v20  ;;  %v2909_v33 = vpop.f32.mrb[18].mxu1  ;;  %v3160_v19 = vld [vmem:[%s9725_s5 + $0x780] sm:$0xff]  ;;  %v3161_v21 = vld [vmem:[%s9725_s5 + $0x788] sm:$0xff] }
 0x2db   :  { %v2910_v16 = vpop.f32.mrb[19].mxu1  ;;  %4555 = vmatprep.subr.bf16.mxu0 %v6371_v22  ;;  %4637 = vmatprep.subr.bf16.mxu1 %v6373_v24  ;;  %v3164_v20 = vld [vmem:[%s9725_s5 + $0x7a0] sm:$0xff]  ;;  %v3165_v22 = vld [vmem:[%s9725_s5 + $0x7a8] sm:$0xff]  ;;  %v6410_v24 = vcombine.low %v3152_v6, %v3156_v7  ;;  %v6201_v6 = vcombine.high %v2939_v62, %v2943_v63  ;;  %v2950_v7 = vld [vmem:[%s9725_s5 + $0xf0] sm:$0xff] }
 0x2dc   :  { %v2915_v39 = vmax.f32 %v6565_v32, 0.0  ;;  %v6419_v29 = vcombine.high %v3160_v19, %v3164_v20  ;;  %v6421_v30 = vcombine.high %v3161_v21, %v3165_v22  ;;  %v3168_v31 = vld [vmem:[%s9725_s5 + $0x7c0] sm:$0xff]  ;;  %v3169_v33 = vld [vmem:[%s9725_s5 + $0x7c8] sm:$0xff]  ;;  %v6564_v16 = vadd.f32 %v8809_v27, %v1295_v28  ;;  %v2927_v27 = vld [vmem:[%s9725_s5 + $0x38] sm:$0xff] }
 0x2dd   :  { %v3172_v32 = vld [vmem:[%s9725_s5 + $0x7e0] sm:$0xff]  ;;  %v6428_v42 = vcombine.low %v3169_v33, %v3173_v55 }
 0x2de   :  { %v8832_v43 = vpack.c.bf16 %v2915_v39, %v2915_v39  ;;  %4556 = vmatpush1.bf16.msra.mxu0 %v6370_v34  ;;  %4638 = vmatpush1.bf16.msra.mxu1 %v6372_v35  ;;  %v6418_v34 = vcombine.low %v3160_v19, %v3164_v20  ;;  %v6420_v35 = vcombine.low %v3161_v21, %v3165_v22  ;;  %v2926_v39 = vld [vmem:[%s9725_s5 + $0x30] sm:$0xff]  ;;  %v2955_v19 = vld [vmem:[%s9725_s5 + $0x118] sm:$0xff] }
 0x2df   :  { %4557 = vmatprep.subr.bf16.mxu0 %v6379_v36  ;;  %4639 = vmatprep.subr.bf16.mxu1 %v6381_v37  ;;  %v6427_v36 = vcombine.high %v3168_v31, %v3172_v32  ;;  %v6429_v37 = vcombine.high %v3169_v33, %v3173_v55  ;;  %v6426_v41 = vcombine.low %v3168_v31, %v3172_v32  ;;  %v2959_v20 = vld [vmem:[%s9725_s5 + $0x138] sm:$0xff]  ;;  %v2970_v55 = vld [vmem:[%s9725_s5 + $0x190] sm:$0xff] }
 0x2e0   :  { %4571 = vmatprep.mubr.bf16.mxu0 %v8832_v43  ;;  %4653 = vmatprep.mubr.bf16.mxu1 %v8832_v43  ;;  %v6182_v54 = vcombine.low %v2922_v38, %v2926_v39  ;;  %v2967_v31 = vld [vmem:[%s9725_s5 + $0x178] sm:$0xff]  ;;  %v6217_v32 = vcombine.high %v2955_v19, %v2959_v20 }
 0x2e2   :  { %4558 = vmatpush1.bf16.msra.mxu0 %v6378_v44  ;;  %4640 = vmatpush1.bf16.msra.mxu1 %v6380_v46  ;;  %v2914_v44 = vmax.f32 %v6564_v16, 0.0  ;;  %v6183_v46 = vcombine.high %v2922_v38, %v2926_v39 }
 0x2e3   :  { %4559 = vmatprep.subr.bf16.mxu0 %v6387_v47  ;;  %4641 = vmatprep.subr.bf16.mxu1 %v6389_v49  ;;  %v6185_v47 = vcombine.high %v2923_v40, %v2927_v27  ;;  %v2930_v49 = vld [vmem:[%s9725_s5 + $0x50] sm:$0xff] }
 0x2e6   :  { %4560 = vmatpush1.bf16.msra.mxu0 %v6386_v57  ;;  %4642 = vmatpush1.bf16.msra.mxu1 %v6388_v18  ;;  %v8923_v57 = vpack.c.bf16 %v2914_v44, %v2914_v44  ;;  %v6184_v18 = vcombine.low %v2923_v40, %v2927_v27  ;;  %v2978_v40 = vld [vmem:[%s9725_s5 + $0x1d0] sm:$0xff]  ;;  %v2979_v44 = vld [vmem:[%s9725_s5 + $0x1d8] sm:$0xff] }
 0x2e7   :  { %4561 = vmatprep.subr.bf16.mxu0 %v6395_v58  ;;  %4643 = vmatprep.subr.bf16.mxu1 %v6397_v59  ;;  %v6191_v58 = vcombine.high %v2930_v49, %v2934_v8  ;;  %v6193_v59 = vcombine.high %v2931_v51, %v2935_v52  ;;  %v2982_v27 = vld [vmem:[%s9725_s5 + $0x1f0] sm:$0xff] }
 0x2ea   :  { %4562 = vmatpush1.bf16.msra.mxu0 %v6394_v0  ;;  %4644 = vmatpush1.bf16.msra.mxu1 %v6396_v2  ;;  %v6190_v0 = vcombine.low %v2930_v49, %v2934_v8  ;;  %v6192_v2 = vcombine.low %v2931_v51, %v2935_v52  ;;  %v2986_v8 = vld [vmem:[%s9725_s5 + $0x210] sm:$0xff] }
 0x2eb   :  { %4563 = vmatprep.subr.bf16.mxu0 %v6403_v3  ;;  %4645 = vmatprep.subr.bf16.mxu1 %v6405_v5  ;;  %v6199_v3 = vcombine.high %v2938_v60, %v2942_v61  ;;  %v2946_v5 = vld [vmem:[%s9725_s5 + $0xd0] sm:$0xff]  ;;  %v6238_v60 = vcombine.low %v2978_v40, %v2982_v27 }
 0x2ec   :  { %v6206_v22 = vcombine.low %v2946_v5, %v2950_v7  ;;  %v2990_v51 = vld [vmem:[%s9725_s5 + $0x230] sm:$0xff] }
 0x2ed   :  { %v2994_v61 = vld [vmem:[%s9725_s5 + $0x250] sm:$0xff] }
 0x2ee   :  { %4564 = vmatpush1.bf16.msra.mxu0 %v6402_v11  ;;  %4646 = vmatpush1.bf16.msra.mxu1 %v6404_v12  ;;  %v2954_v11 = vld [vmem:[%s9725_s5 + $0x110] sm:$0xff] }
 0x2ef   :  { %4565 = vmatprep.subr.bf16.mxu0 %v6411_v15  ;;  %4647 = vmatprep.subr.bf16.mxu1 %v6413_v17  ;;  %v2958_v12 = vld [vmem:[%s9725_s5 + $0x130] sm:$0xff]  ;;  %v6200_v15 = vcombine.low %v2939_v62, %v2943_v63  ;;  %v6207_v17 = vcombine.high %v2946_v5, %v2950_v7 }
 0x2f0   :  { %v6214_v33 = vcombine.low %v2954_v11, %v2958_v12  ;;  %v2998_v62 = vld [vmem:[%s9725_s5 + $0x270] sm:$0xff] }
 0x2f1   :  { %v3002_v7 = vld [vmem:[%s9725_s5 + $0x290] sm:$0xff] }
 0x2f2   :  { %4566 = vmatpush1.bf16.msra.mxu0 %v6410_v24  ;;  %4648 = vmatpush1.bf16.msra.mxu1 %v6412_v25  ;;  %v2962_v24 = vld [vmem:[%s9725_s5 + $0x150] sm:$0xff] }
 0x2f3   :  { %4567 = vmatprep.subr.bf16.mxu0 %v6419_v29  ;;  %4649 = vmatprep.subr.bf16.mxu1 %v6421_v30  ;;  %v2966_v25 = vld [vmem:[%s9725_s5 + $0x170] sm:$0xff]  ;;  %v6215_v29 = vcombine.high %v2954_v11, %v2958_v12  ;;  %v2963_v30 = vld [vmem:[%s9725_s5 + $0x158] sm:$0xff] }
 0x2f4   :  { %v6223_v16 = vcombine.high %v2962_v24, %v2966_v25  ;;  %v6225_v38 = vcombine.high %v2963_v30, %v2967_v31  ;;  %v6222_v39 = vcombine.low %v2962_v24, %v2966_v25  ;;  %v3003_v11 = vld [vmem:[%s9725_s5 + $0x298] sm:$0xff] }
 0x2f5   :  { %v3007_v12 = vld [vmem:[%s9725_s5 + $0x2b8] sm:$0xff] }
 0x2f6   :  { %4568 = vmatpush1.bf16.msra.mxu0 %v6418_v34  ;;  %4650 = vmatpush1.bf16.msra.mxu1 %v6420_v35  ;;  %v2974_v34 = vld [vmem:[%s9725_s5 + $0x1b0] sm:$0xff]  ;;  %v6216_v35 = vcombine.low %v2955_v19, %v2959_v20  ;;  %v3011_v24 = vld [vmem:[%s9725_s5 + $0x2d8] sm:$0xff] }
 0x2f7   :  { %4569 = vmatprep.subr.bf16.mxu0 %v6427_v36  ;;  %4651 = vmatprep.subr.bf16.mxu1 %v6429_v37  ;;  %v2971_v36 = vld [vmem:[%s9725_s5 + $0x198] sm:$0xff]  ;;  %v6230_v49 = vcombine.low %v2970_v55, %v2974_v34  ;;  %v3010_v19 = vld [vmem:[%s9725_s5 + $0x2d0] sm:$0xff] }
 0x2f8   :  { %v2975_v37 = vld [vmem:[%s9725_s5 + $0x1b8] sm:$0xff]  ;;  %v3014_v20 = vld [vmem:[%s9725_s5 + $0x2f0] sm:$0xff] }
 0x2f9   :  { %v6232_v52 = vcombine.low %v2971_v36, %v2975_v37  ;;  %v3015_v25 = vld [vmem:[%s9725_s5 + $0x2f8] sm:$0xff] }
 0x2fa   :  { %4570 = vmatpush1.bf16.msra.mxu0 %v6426_v41  ;;  %4652 = vmatpush1.bf16.msra.mxu1 %v6428_v42  ;;  %v6224_v41 = vcombine.low %v2963_v30, %v2967_v31  ;;  %v6231_v42 = vcombine.high %v2970_v55, %v2974_v34  ;;  %v3018_v30 = vld [vmem:[%s9725_s5 + $0x310] sm:$0xff]  ;;  %v3019_v55 = vld [vmem:[%s9725_s5 + $0x318] sm:$0xff] }
 0x2fb   :  { %4662 = vmatprep.subr.bf16.mxu0 %v6183_v46  ;;  %4744 = vmatprep.subr.bf16.mxu1 %v6185_v47  ;;  %v2983_v46 = vld [vmem:[%s9725_s5 + $0x1f8] sm:$0xff]  ;;  %v6233_v47 = vcombine.high %v2971_v36, %v2975_v37  ;;  %v3022_v31 = vld [vmem:[%s9725_s5 + $0x330] sm:$0xff] }
 0x2fc   :  { %v6240_v63 = vcombine.low %v2979_v44, %v2983_v46  ;;  %v3023_v34 = vld [vmem:[%s9725_s5 + $0x338] sm:$0xff]  ;;  %v3026_v36 = vld [vmem:[%s9725_s5 + $0x350] sm:$0xff] }
 0x2fd   :  { %4572 = vmatmul.mubr.bf16.vlgmr.msra.gmra.mrb[4].mxu0 %v8923_v57  ;;  %4654 = vmatmul.mubr.bf16.vlgmr.msra.gmra.mrb[20].mxu1 %v8923_v57  ;;  %v3030_v37 = vld [vmem:[%s9725_s5 + $0x370] sm:$0xff] }
 0x2fe   :  { %4663 = vmatpush1.bf16.msra.mxu0 %v6182_v54  ;;  %4694 = vmatprep.mubr.bf16.mxu0 %v8712_v13  ;;  %v6239_v54 = vcombine.high %v2978_v40, %v2982_v27  ;;  %v3027_v40 = vld [vmem:[%s9725_s5 + $0x358] sm:$0xff] }
 0x2ff   :  { %4745 = vmatpush1.bf16.msra.mxu1 %v6184_v18  ;;  %4776 = vmatprep.mubr.bf16.mxu1 %v8712_v13  ;;  %v2951_v13 = vld [vmem:[%s9725_s5 + $0xf8] sm:$0xff] }
 0x300   :  { %4664 = vmatprep.subr.bf16.mxu0 %v6191_v58  ;;  %4746 = vmatprep.subr.bf16.mxu1 %v6193_v59  ;;  %v6209_v21 = vcombine.high %v2947_v9, %v2951_v13  ;;  %v6208_v28 = vcombine.low %v2947_v9, %v2951_v13  ;;  %v2987_v18 = vld [vmem:[%s9725_s5 + $0x218] sm:$0xff]  ;;  %v6241_v59 = vcombine.high %v2979_v44, %v2983_v46  ;;  %v3006_v9 = vld [vmem:[%s9725_s5 + $0x2b0] sm:$0xff] }
 0x301   :  { %v2991_v58 = vld [vmem:[%s9725_s5 + $0x238] sm:$0xff]  ;;  %v3034_v44 = vld [vmem:[%s9725_s5 + $0x390] sm:$0xff] }
 0x302   :  { %4665 = vmatpush1.bf16.msra.mxu0 %v6190_v0  ;;  %v6247_v0 = vcombine.high %v2986_v8, %v2990_v51  ;;  %v6249_v5 = vcombine.high %v2987_v18, %v2991_v58  ;;  %v6248_v13 = vcombine.low %v2987_v18, %v2991_v58  ;;  %v3031_v27 = vld [vmem:[%s9725_s5 + $0x378] sm:$0xff]  ;;  %v3038_v46 = vld [vmem:[%s9725_s5 + $0x3b0] sm:$0xff] }
 0x303   :  { %4747 = vmatpush1.bf16.msra.mxu1 %v6192_v2  ;;  %4666 = vmatprep.subr.bf16.mxu0 %v6199_v3  ;;  %v2995_v2 = vld [vmem:[%s9725_s5 + $0x258] sm:$0xff]  ;;  %v3042_v18 = vld [vmem:[%s9725_s5 + $0x3d0] sm:$0xff] }
 0x304   :  { %4748 = vmatprep.subr.bf16.mxu1 %v6201_v6  ;;  %v2999_v3 = vld [vmem:[%s9725_s5 + $0x278] sm:$0xff]  ;;  %v6246_v6 = vcombine.low %v2986_v8, %v2990_v51  ;;  %v3046_v58 = vld [vmem:[%s9725_s5 + $0x3f0] sm:$0xff] }
 0x305   :  { %v3035_v8 = vld [vmem:[%s9725_s5 + $0x398] sm:$0xff] }
 0x306   :  { %4667 = vmatpush1.bf16.msra.mxu0 %v6198_v10  ;;  %v6255_v10 = vcombine.high %v2994_v61, %v2998_v62  ;;  %v3039_v51 = vld [vmem:[%s9725_s5 + $0x3b8] sm:$0xff] }
 0x307   :  { %4749 = vmatpush1.bf16.msra.mxu1 %v6200_v15  ;;  %4668 = vmatprep.subr.bf16.mxu0 %v6207_v17  ;;  %v6257_v15 = vcombine.high %v2995_v2, %v2999_v3  ;;  %v6254_v17 = vcombine.low %v2994_v61, %v2998_v62  ;;  %v3043_v61 = vld [vmem:[%s9725_s5 + $0x3d8] sm:$0xff] }
 0x308   :  { %4750 = vmatprep.subr.bf16.mxu1 %v6209_v21  ;;  %v6256_v21 = vcombine.low %v2995_v2, %v2999_v3  ;;  %v3047_v62 = vld [vmem:[%s9725_s5 + $0x3f8] sm:$0xff]  ;;  %v6296_v2 = vcombine.low %v3035_v8, %v3039_v51  ;;  %v6303_v3 = vcombine.high %v3042_v18, %v3046_v58 }
 0x30a   :  { %4669 = vmatpush1.bf16.msra.mxu0 %v6206_v22  ;;  %v6263_v22 = vcombine.high %v3002_v7, %v3006_v9 }
 0x30b   :  { %4751 = vmatpush1.bf16.msra.mxu1 %v6208_v28  ;;  %4670 = vmatprep.subr.bf16.mxu0 %v6215_v29  ;;  %v6265_v28 = vcombine.high %v3003_v11, %v3007_v12  ;;  %v6262_v29 = vcombine.low %v3002_v7, %v3006_v9  ;;  %v3054_v7 = vld [vmem:[%s9725_s5 + $0x430] sm:$0xff]  ;;  %v3051_v9 = vld [vmem:[%s9725_s5 + $0x418] sm:$0xff] }
 0x30c   :  { %4752 = vmatprep.subr.bf16.mxu1 %v6217_v32  ;;  %v6264_v32 = vcombine.low %v3003_v11, %v3007_v12  ;;  %v6304_v11 = vcombine.low %v3043_v61, %v3047_v62 }
 0x30e   :  { %4671 = vmatpush1.bf16.msra.mxu0 %v6214_v33  ;;  %v6271_v33 = vcombine.high %v3010_v19, %v3014_v20 }
 0x30f   :  { %4753 = vmatpush1.bf16.msra.mxu1 %v6216_v35  ;;  %4672 = vmatprep.subr.bf16.mxu0 %v6223_v16  ;;  %v6273_v35 = vcombine.high %v3011_v24, %v3015_v25  ;;  %v6270_v16 = vcombine.low %v3010_v19, %v3014_v20  ;;  %v3062_v19 = vld [vmem:[%s9725_s5 + $0x470] sm:$0xff] }
 0x310   :  { %4754 = vmatprep.subr.bf16.mxu1 %v6225_v38  ;;  %v6272_v38 = vcombine.low %v3011_v24, %v3015_v25 }
 0x312   :  { %4673 = vmatpush1.bf16.msra.mxu0 %v6222_v39  ;;  %v6279_v39 = vcombine.high %v3018_v30, %v3022_v31 }
 0x313   :  { %4755 = vmatpush1.bf16.msra.mxu1 %v6224_v41  ;;  %4674 = vmatprep.subr.bf16.mxu0 %v6231_v42  ;;  %v6281_v41 = vcombine.high %v3019_v55, %v3023_v34  ;;  %v6278_v42 = vcombine.low %v3018_v30, %v3022_v31  ;;  %v3067_v31 = vld [vmem:[%s9725_s5 + $0x498] sm:$0xff] }
 0x314   :  { %4756 = vmatprep.subr.bf16.mxu1 %v6233_v47  ;;  %v6280_v47 = vcombine.low %v3019_v55, %v3023_v34 }
 0x316   :  { %4675 = vmatpush1.bf16.msra.mxu0 %v6230_v49  ;;  %v6287_v49 = vcombine.high %v3026_v36, %v3030_v37 }
 0x317   :  { %4757 = vmatpush1.bf16.msra.mxu1 %v6232_v52  ;;  %4676 = vmatprep.subr.bf16.mxu0 %v6239_v54  ;;  %v6289_v52 = vcombine.high %v3027_v40, %v3031_v27  ;;  %v6286_v54 = vcombine.low %v3026_v36, %v3030_v37  ;;  %v3078_v36 = vld [vmem:[%s9725_s5 + $0x4f0] sm:$0xff]  ;;  %v3079_v37 = vld [vmem:[%s9725_s5 + $0x4f8] sm:$0xff] }
 0x318   :  { %4758 = vmatprep.subr.bf16.mxu1 %v6241_v59  ;;  %v6288_v59 = vcombine.low %v3027_v40, %v3031_v27  ;;  %v3082_v27 = vld [vmem:[%s9725_s5 + $0x510] sm:$0xff] }
 0x31a   :  { %4677 = vmatpush1.bf16.msra.mxu0 %v6238_v60  ;;  %v6295_v60 = vcombine.high %v3034_v44, %v3038_v46 }
 0x31b   :  { %4759 = vmatpush1.bf16.msra.mxu1 %v6240_v63  ;;  %4678 = vmatprep.subr.bf16.mxu0 %v6247_v0  ;;  %v6297_v63 = vcombine.high %v3035_v8, %v3039_v51  ;;  %v6294_v0 = vcombine.low %v3034_v44, %v3038_v46  ;;  %v3087_v44 = vld [vmem:[%s9725_s5 + $0x538] sm:$0xff]  ;;  %v3090_v51 = vld [vmem:[%s9725_s5 + $0x550] sm:$0xff] }
 0x31c   :  { %4760 = vmatprep.subr.bf16.mxu1 %v6249_v5  ;;  %v6305_v5 = vcombine.high %v3043_v61, %v3047_v62  ;;  %v3098_v62 = vld [vmem:[%s9725_s5 + $0x590] sm:$0xff] }
 0x31e   :  { %4679 = vmatpush1.bf16.msra.mxu0 %v6246_v6  ;;  %v3050_v6 = vld [vmem:[%s9725_s5 + $0x410] sm:$0xff] }
 0x31f   :  { %4761 = vmatpush1.bf16.msra.mxu1 %v6248_v13  ;;  %4680 = vmatprep.subr.bf16.mxu0 %v6255_v10  ;;  %v3055_v13 = vld [vmem:[%s9725_s5 + $0x438] sm:$0xff]  ;;  %v6302_v10 = vcombine.low %v3042_v18, %v3046_v58  ;;  %v6311_v12 = vcombine.high %v3050_v6, %v3054_v7  ;;  %v6310_v20 = vcombine.low %v3050_v6, %v3054_v7 }
 0x320   :  { %4762 = vmatprep.subr.bf16.mxu1 %v6257_v15  ;;  %v6313_v15 = vcombine.high %v3051_v9, %v3055_v13  ;;  %v6312_v24 = vcombine.low %v3051_v9, %v3055_v13  ;;  %v3095_v18 = vld [vmem:[%s9725_s5 + $0x578] sm:$0xff]  ;;  %v3106_v9 = vld [vmem:[%s9725_s5 + $0x5d0] sm:$0xff] }
 0x321   :  { %v3110_v13 = vld [vmem:[%s9725_s5 + $0x5f0] sm:$0xff] }
 0x322   :  { %4681 = vmatpush1.bf16.msra.mxu0 %v6254_v17  ;;  %v3058_v17 = vld [vmem:[%s9725_s5 + $0x450] sm:$0xff] }
 0x323   :  { %4763 = vmatpush1.bf16.msra.mxu1 %v6256_v21  ;;  %4682 = vmatprep.subr.bf16.mxu0 %v6263_v22  ;;  %v3059_v21 = vld [vmem:[%s9725_s5 + $0x458] sm:$0xff]  ;;  %v6319_v25 = vcombine.high %v3058_v17, %v3062_v19 }
 0x324   :  { %4764 = vmatprep.subr.bf16.mxu1 %v6265_v28  ;;  %v3063_v22 = vld [vmem:[%s9725_s5 + $0x478] sm:$0xff]  ;;  %v3066_v28 = vld [vmem:[%s9725_s5 + $0x490] sm:$0xff] }
 0x325   :  { %v6321_v30 = vcombine.high %v3059_v21, %v3063_v22  ;;  %v6320_v55 = vcombine.low %v3059_v21, %v3063_v22  ;;  %v3118_v21 = vld [vmem:[%s9725_s5 + $0x630] sm:$0xff]  ;;  %v3115_v22 = vld [vmem:[%s9725_s5 + $0x618] sm:$0xff] }
 0x326   :  { %4683 = vmatpush1.bf16.msra.mxu0 %v6262_v29  ;;  %v3070_v29 = vld [vmem:[%s9725_s5 + $0x4b0] sm:$0xff] }
 0x327   :  { %4765 = vmatpush1.bf16.msra.mxu1 %v6264_v32  ;;  %4684 = vmatprep.subr.bf16.mxu0 %v6271_v33  ;;  %v3071_v32 = vld [vmem:[%s9725_s5 + $0x4b8] sm:$0xff]  ;;  %v6318_v33 = vcombine.low %v3058_v17, %v3062_v19  ;;  %v6327_v34 = vcombine.high %v3066_v28, %v3070_v29  ;;  %v6367_v17 = vcombine.high %v3106_v9, %v3110_v13 }
 0x328   :  { %4766 = vmatprep.subr.bf16.mxu1 %v6273_v35  ;;  %v6329_v35 = vcombine.high %v3067_v31, %v3071_v32 }
 0x32a   :  { %4685 = vmatpush1.bf16.msra.mxu0 %v6270_v16  ;;  %v3074_v16 = vld [vmem:[%s9725_s5 + $0x4d0] sm:$0xff] }
 0x32b   :  { %4767 = vmatpush1.bf16.msra.mxu1 %v6272_v38  ;;  %4686 = vmatprep.subr.bf16.mxu0 %v6279_v39  ;;  %v6328_v38 = vcombine.low %v3067_v31, %v3071_v32  ;;  %v6335_v39 = vcombine.high %v3074_v16, %v3078_v36  ;;  %v6334_v46 = vcombine.low %v3074_v16, %v3078_v36  ;;  %v3122_v31 = vld [vmem:[%s9725_s5 + $0x650] sm:$0xff] }
 0x32c   :  { %4768 = vmatprep.subr.bf16.mxu1 %v6281_v41  ;;  %v3086_v41 = vld [vmem:[%s9725_s5 + $0x530] sm:$0xff] }
 0x32d   :  { %v6342_v58 = vcombine.low %v3082_v27, %v3086_v41  ;;  %v3126_v32 = vld [vmem:[%s9725_s5 + $0x670] sm:$0xff] }
 0x32e   :  { %4687 = vmatpush1.bf16.msra.mxu0 %v6278_v42  ;;  %v3083_v42 = vld [vmem:[%s9725_s5 + $0x518] sm:$0xff]  ;;  %v6383_v16 = vcombine.high %v3122_v31, %v3126_v32 }
 0x32f   :  { %4769 = vmatpush1.bf16.msra.mxu1 %v6280_v47  ;;  %4688 = vmatprep.subr.bf16.mxu0 %v6287_v49  ;;  %v6343_v49 = vcombine.high %v3082_v27, %v3086_v41  ;;  %v6345_v8 = vcombine.high %v3083_v42, %v3087_v44 }
 0x330   :  { %4770 = vmatprep.subr.bf16.mxu1 %v6289_v52  ;;  %v3094_v52 = vld [vmem:[%s9725_s5 + $0x570] sm:$0xff] }
 0x332   :  { %4689 = vmatpush1.bf16.msra.mxu0 %v6286_v54  ;;  %v3091_v54 = vld [vmem:[%s9725_s5 + $0x558] sm:$0xff] }
 0x333   :  { %4771 = vmatpush1.bf16.msra.mxu1 %v6288_v59  ;;  %4690 = vmatprep.subr.bf16.mxu0 %v6295_v60  ;;  %v6344_v59 = vcombine.low %v3083_v42, %v3087_v44  ;;  %v6351_v60 = vcombine.high %v3090_v51, %v3094_v52  ;;  %v6353_v61 = vcombine.high %v3091_v54, %v3095_v18  ;;  %v3138_v42 = vld [vmem:[%s9725_s5 + $0x6d0] sm:$0xff] }
 0x334   :  { %4772 = vmatprep.subr.bf16.mxu1 %v6297_v63  ;;  %v3102_v63 = vld [vmem:[%s9725_s5 + $0x5b0] sm:$0xff] }
 0x335   :  { %v6359_v6 = vcombine.high %v3098_v62, %v3102_v63  ;;  %v3142_v44 = vld [vmem:[%s9725_s5 + $0x6f0] sm:$0xff] }
 0x336   :  { %4691 = vmatpush1.bf16.msra.mxu0 %v6294_v0  ;;  %v3099_v0 = vld [vmem:[%s9725_s5 + $0x598] sm:$0xff] }
 0x337   :  { %4773 = vmatpush1.bf16.msra.mxu1 %v6296_v2  ;;  %4692 = vmatprep.subr.bf16.mxu0 %v6303_v3  ;;  %v3103_v2 = vld [vmem:[%s9725_s5 + $0x5b8] sm:$0xff]  ;;  %v6350_v3 = vcombine.low %v3090_v51, %v3094_v52  ;;  %v6399_v51 = vcombine.high %v3138_v42, %v3142_v44 }
 0x338   :  { %4774 = vmatprep.subr.bf16.mxu1 %v6305_v5  ;;  %v6352_v5 = vcombine.low %v3091_v54, %v3095_v18  ;;  %v6361_v7 = vcombine.high %v3099_v0, %v3103_v2  ;;  %v3146_v54 = vld [vmem:[%s9725_s5 + $0x710] sm:$0xff] }
 0x339   :  { %v3150_v18 = vld [vmem:[%s9725_s5 + $0x730] sm:$0xff] }
 0x33a   :  { %4693 = vmatpush1.bf16.msra.mxu0 %v6302_v10  ;;  %v3107_v10 = vld [vmem:[%s9725_s5 + $0x5d8] sm:$0xff] }
 0x33b   :  { %4775 = vmatpush1.bf16.msra.mxu1 %v6304_v11  ;;  %4703 = vmatprep.subr.bf16.mxu0 %v6311_v12  ;;  %v3111_v11 = vld [vmem:[%s9725_s5 + $0x5f8] sm:$0xff]  ;;  %v6358_v12 = vcombine.low %v3098_v62, %v3102_v63  ;;  %v6407_v62 = vcombine.high %v3146_v54, %v3150_v18 }
 0x33c   :  { %4785 = vmatprep.subr.bf16.mxu1 %v6313_v15  ;;  %v6360_v15 = vcombine.low %v3099_v0, %v3103_v2  ;;  %v6369_v19 = vcombine.high %v3107_v10, %v3111_v11  ;;  %v3154_v0 = vld [vmem:[%s9725_s5 + $0x750] sm:$0xff] }
 0x33d   :  { %4695 = vmatmul.mubr.bf16.vlgmr.msra.gmra.mrb[8].mxu0 %v8714_v14  ;;  %v3158_v2 = vld [vmem:[%s9725_s5 + $0x770] sm:$0xff] }
 0x33e   :  { %4777 = vmatmul.mubr.bf16.vlgmr.msra.gmra.mrb[24].mxu1 %v8714_v14  ;;  %4704 = vmatpush1.bf16.msra.mxu0 %v6310_v20  ;;  %v3075_v14 = vld [vmem:[%s9725_s5 + $0x4d8] sm:$0xff]  ;;  %v3114_v20 = vld [vmem:[%s9725_s5 + $0x610] sm:$0xff] }
 0x33f   :  { %4735 = vmatprep.mubr.bf16.mxu0 %v8832_v43  ;;  %4786 = vmatpush1.bf16.msra.mxu1 %v6312_v24  ;;  %v6337_v40 = vcombine.high %v3075_v14, %v3079_v37  ;;  %v6336_v47 = vcombine.low %v3075_v14, %v3079_v37  ;;  %v3119_v24 = vld [vmem:[%s9725_s5 + $0x638] sm:$0xff]  ;;  %v3130_v14 = vld [vmem:[%s9725_s5 + $0x690] sm:$0xff] }
 0x340   :  { %4817 = vmatprep.mubr.bf16.mxu1 %v8832_v43  ;;  %4705 = vmatprep.subr.bf16.mxu0 %v6319_v25  ;;  %v6326_v43 = vcombine.low %v3066_v28, %v3070_v29  ;;  %v6366_v25 = vcombine.low %v3106_v9, %v3110_v13  ;;  %v6368_v28 = vcombine.low %v3107_v10, %v3111_v11  ;;  %v3134_v37 = vld [vmem:[%s9725_s5 + $0x6b0] sm:$0xff] }
 0x341   :  { %4787 = vmatprep.subr.bf16.mxu1 %v6321_v30  ;;  %v6375_v29 = vcombine.high %v3114_v20, %v3118_v21  ;;  %v6377_v30 = vcombine.high %v3115_v22, %v3119_v24  ;;  %v6391_v27 = vcombine.high %v3130_v14, %v3134_v37  ;;  %v6415_v9 = vcombine.high %v3154_v0, %v3158_v2  ;;  %v3162_v10 = vld [vmem:[%s9725_s5 + $0x790] sm:$0xff] }
 0x342   :  { %4706 = vmatpush1.bf16.msra.mxu0 %v6318_v33  ;;  %v3123_v33 = vld [vmem:[%s9725_s5 + $0x658] sm:$0xff]  ;;  %v3166_v11 = vld [vmem:[%s9725_s5 + $0x7b0] sm:$0xff] }
 0x343   :  { %4788 = vmatpush1.bf16.msra.mxu1 %v6320_v55  ;;  %4707 = vmatprep.subr.bf16.mxu0 %v6327_v34  ;;  %v3127_v55 = vld [vmem:[%s9725_s5 + $0x678] sm:$0xff]  ;;  %v6374_v34 = vcombine.low %v3114_v20, %v3118_v21  ;;  %v6423_v20 = vcombine.high %v3162_v10, %v3166_v11 }
 0x344   :  { %4789 = vmatprep.subr.bf16.mxu1 %v6329_v35  ;;  %v6376_v35 = vcombine.low %v3115_v22, %v3119_v24  ;;  %v6385_v36 = vcombine.high %v3123_v33, %v3127_v55  ;;  %v3170_v22 = vld [vmem:[%s9725_s5 + $0x7d0] sm:$0xff] }
 0x345   :  { %v3174_v24 = vld [vmem:[%s9725_s5 + $0x7f0] sm:$0xff] }
 0x346   :  { %4708 = vmatpush1.bf16.msra.mxu0 %v6326_v43  ;;  %v3131_v43 = vld [vmem:[%s9725_s5 + $0x698] sm:$0xff] }
 0x347   :  { %4790 = vmatpush1.bf16.msra.mxu1 %v6328_v38  ;;  %4709 = vmatprep.subr.bf16.mxu0 %v6335_v39  ;;  %v3135_v38 = vld [vmem:[%s9725_s5 + $0x6b8] sm:$0xff]  ;;  %v6382_v39 = vcombine.low %v3122_v31, %v3126_v32  ;;  %v6431_v31 = vcombine.high %v3170_v22, %v3174_v24 }
 0x348   :  { %4791 = vmatprep.subr.bf16.mxu1 %v6337_v40  ;;  %v6384_v40 = vcombine.low %v3123_v33, %v3127_v55  ;;  %v6393_v41 = vcombine.high %v3131_v43, %v3135_v38  ;;  %v6430_v33 = vcombine.low %v3170_v22, %v3174_v24 }
 0x34a   :  { %4710 = vmatpush1.bf16.msra.mxu0 %v6334_v46  ;;  %v3139_v46 = vld [vmem:[%s9725_s5 + $0x6d8] sm:$0xff] }
 0x34b   :  { %4792 = vmatpush1.bf16.msra.mxu1 %v6336_v47  ;;  %4711 = vmatprep.subr.bf16.mxu0 %v6343_v49  ;;  %v3143_v47 = vld [vmem:[%s9725_s5 + $0x6f8] sm:$0xff]  ;;  %v6390_v49 = vcombine.low %v3130_v14, %v3134_v37  ;;  %v7020_v14 = vld [vmem:[%s9727_s7 + $0x24] ss:$8 sps:$4 sm:$0xff]   ;;  %v7018_v37 = vld [vmem:[%s9727_s7 + $0x20] ss:$8 sps:$4 sm:$0xff]  }
 0x34c   :  { %4793 = vmatprep.subr.bf16.mxu1 %v6345_v8  ;;  %v6392_v8 = vcombine.low %v3131_v43, %v3135_v38  ;;  %v6401_v52 = vcombine.high %v3139_v46, %v3143_v47  ;;  %v7021_v43 = vld [vmem:[%s9727_s7 + $0x30] ss:$8 sps:$4 sm:$0xff]   ;;  %v7026_v38 = vld [vmem:[%s9727_s7 + $0x44] ss:$8 sps:$4 sm:$0xff]  }
 0x34e   :  { %4712 = vmatpush1.bf16.msra.mxu0 %v6342_v58  ;;  %v3147_v58 = vld [vmem:[%s9725_s5 + $0x718] sm:$0xff] }
 0x34f   :  { %4794 = vmatpush1.bf16.msra.mxu1 %v6344_v59  ;;  %4713 = vmatprep.subr.bf16.mxu0 %v6351_v60  ;;  %v3151_v59 = vld [vmem:[%s9725_s5 + $0x738] sm:$0xff]  ;;  %v6398_v60 = vcombine.low %v3138_v42, %v3142_v44  ;;  %v7030_v42 = vld [vmem:[%s9727_s7 + $0x60] ss:$8 sps:$4 sm:$0xff]  }
 0x350   :  { %4795 = vmatprep.subr.bf16.mxu1 %v6353_v61  ;;  %v6400_v61 = vcombine.low %v3139_v46, %v3143_v47  ;;  %v6409_v63 = vcombine.high %v3147_v58, %v3151_v59  ;;  %v7035_v44 = vld [vmem:[%s9727_s7 + $0x74] ss:$8 sps:$4 sm:$0xff]   ;;  %v7033_v46 = vld [vmem:[%s9727_s7 + $0x70] ss:$8 sps:$4 sm:$0xff]   ;;  %v7038_v47 = vld [vmem:[%s9727_s7 + $0x84] ss:$8 sps:$4 sm:$0xff]  }
 0x352   :  { %4714 = vmatpush1.bf16.msra.mxu0 %v6350_v3  ;;  %v3155_v3 = vld [vmem:[%s9725_s5 + $0x758] sm:$0xff] }
 0x353   :  { %4796 = vmatpush1.bf16.msra.mxu1 %v6352_v5  ;;  %4715 = vmatprep.subr.bf16.mxu0 %v6359_v6  ;;  %v3159_v5 = vld [vmem:[%s9725_s5 + $0x778] sm:$0xff]  ;;  %v6406_v6 = vcombine.low %v3146_v54, %v3150_v18  ;;  %v7042_v54 = vld [vmem:[%s9727_s7 + $0xa0] ss:$8 sps:$4 sm:$0xff]  }
 0x354   :  { %4797 = vmatprep.subr.bf16.mxu1 %v6361_v7  ;;  %v6408_v7 = vcombine.low %v3147_v58, %v3151_v59  ;;  %v6417_v13 = vcombine.high %v3155_v3, %v3159_v5  ;;  %v7047_v18 = vld [vmem:[%s9727_s7 + $0xb4] ss:$8 sps:$4 sm:$0xff]   ;;  %v7045_v58 = vld [vmem:[%s9727_s7 + $0xb0] ss:$8 sps:$4 sm:$0xff]   ;;  %v7050_v59 = vld [vmem:[%s9727_s7 + $0xc4] ss:$8 sps:$4 sm:$0xff]  }
 0x356   :  { %4716 = vmatpush1.bf16.msra.mxu0 %v6358_v12  ;;  %v3163_v12 = vld [vmem:[%s9725_s5 + $0x798] sm:$0xff] }
 0x357   :  { %4798 = vmatpush1.bf16.msra.mxu1 %v6360_v15  ;;  %4717 = vmatprep.subr.bf16.mxu0 %v6367_v17  ;;  %v3167_v15 = vld [vmem:[%s9725_s5 + $0x7b8] sm:$0xff]  ;;  %v6414_v17 = vcombine.low %v3154_v0, %v3158_v2  ;;  %v7054_v0 = vld [vmem:[%s9727_s7 + $0xe0] ss:$8 sps:$4 sm:$0xff]  }
 0x358   :  { %4799 = vmatprep.subr.bf16.mxu1 %v6369_v19  ;;  %v6416_v19 = vcombine.low %v3155_v3, %v3159_v5  ;;  %v6425_v21 = vcombine.high %v3163_v12, %v3167_v15  ;;  %v7059_v2 = vld [vmem:[%s9727_s7 + $0xf4] ss:$8 sps:$4 sm:$0xff]   ;;  %v7057_v3 = vld [vmem:[%s9727_s7 + $0xf0] ss:$8 sps:$4 sm:$0xff]   ;;  %v7062_v5 = vld [vmem:[%s9727_s7 + $0x104] ss:$8 sps:$4 sm:$0xff]  }
 0x35a   :  { %4718 = vmatpush1.bf16.msra.mxu0 %v6366_v25  ;;  %v3171_v25 = vld [vmem:[%s9725_s5 + $0x7d8] sm:$0xff] }
 0x35b   :  { %4800 = vmatpush1.bf16.msra.mxu1 %v6368_v28  ;;  %4719 = vmatprep.subr.bf16.mxu0 %v6375_v29  ;;  %v3175_v28 = vld [vmem:[%s9725_s5 + $0x7f8] sm:$0xff]  ;;  %v6422_v29 = vcombine.low %v3162_v10, %v3166_v11 }
 0x35c   :  { %4801 = vmatprep.subr.bf16.mxu1 %v6377_v30  ;;  %v6424_v30 = vcombine.low %v3163_v12, %v3167_v15  ;;  %v6433_v32 = vcombine.high %v3171_v25, %v3175_v28  ;;  %v6432_v55 = vcombine.low %v3171_v25, %v3175_v28 }
 0x35e   :  { %4720 = vmatpush1.bf16.msra.mxu0 %v6374_v34  ;;  %v7014_v34 = vld [vmem:[%s9727_s7 + $0x4] ss:$8 sps:$4 sm:$0xff]  }
 0x35f   :  { %4802 = vmatpush1.bf16.msra.mxu1 %v6376_v35  ;;  %4721 = vmatprep.subr.bf16.mxu0 %v6383_v16  ;;  %v7012_v35 = vld [vmem:[%s9727_s7] ss:$8 sps:$4 sm:$0xff]   ;;  %v7017_v16 = vld [vmem:[%s9727_s7 + $0x14] ss:$8 sps:$4 sm:$0xff]  }
 0x360   :  { %4803 = vmatprep.subr.bf16.mxu1 %v6385_v36  ;;  %v7015_v36 = vld [vmem:[%s9727_s7 + $0x10] ss:$8 sps:$4 sm:$0xff]  }
 0x362   :  { %4722 = vmatpush1.bf16.msra.mxu0 %v6382_v39  ;;  %v7024_v39 = vld [vmem:[%s9727_s7 + $0x40] ss:$8 sps:$4 sm:$0xff]  }
 0x363   :  { %4804 = vmatpush1.bf16.msra.mxu1 %v6384_v40  ;;  %4723 = vmatprep.subr.bf16.mxu0 %v6391_v27  ;;  %v7029_v40 = vld [vmem:[%s9727_s7 + $0x54] ss:$8 sps:$4 sm:$0xff]   ;;  %v7027_v27 = vld [vmem:[%s9727_s7 + $0x50] ss:$8 sps:$4 sm:$0xff]  }
 0x364   :  { %4805 = vmatprep.subr.bf16.mxu1 %v6393_v41  ;;  %v7032_v41 = vld [vmem:[%s9727_s7 + $0x64] ss:$8 sps:$4 sm:$0xff]  }
 0x366   :  { %4724 = vmatpush1.bf16.msra.mxu0 %v6390_v49  ;;  %v7036_v49 = vld [vmem:[%s9727_s7 + $0x80] ss:$8 sps:$4 sm:$0xff]  }
 0x367   :  { %4806 = vmatpush1.bf16.msra.mxu1 %v6392_v8  ;;  %4725 = vmatprep.subr.bf16.mxu0 %v6399_v51  ;;  %v7041_v8 = vld [vmem:[%s9727_s7 + $0x94] ss:$8 sps:$4 sm:$0xff]   ;;  %v7039_v51 = vld [vmem:[%s9727_s7 + $0x90] ss:$8 sps:$4 sm:$0xff]  }
 0x368   :  { %4807 = vmatprep.subr.bf16.mxu1 %v6401_v52  ;;  %v7044_v52 = vld [vmem:[%s9727_s7 + $0xa4] ss:$8 sps:$4 sm:$0xff]  }
 0x36a   :  { %4726 = vmatpush1.bf16.msra.mxu0 %v6398_v60  ;;  %v7048_v60 = vld [vmem:[%s9727_s7 + $0xc0] ss:$8 sps:$4 sm:$0xff]  }
 0x36b   :  { %4808 = vmatpush1.bf16.msra.mxu1 %v6400_v61  ;;  %4727 = vmatprep.subr.bf16.mxu0 %v6407_v62  ;;  %v7053_v61 = vld [vmem:[%s9727_s7 + $0xd4] ss:$8 sps:$4 sm:$0xff]   ;;  %v7051_v62 = vld [vmem:[%s9727_s7 + $0xd0] ss:$8 sps:$4 sm:$0xff]  }
 0x36c   :  { %4809 = vmatprep.subr.bf16.mxu1 %v6409_v63  ;;  %v7056_v63 = vld [vmem:[%s9727_s7 + $0xe4] ss:$8 sps:$4 sm:$0xff]  }
 0x36e   :  { %4728 = vmatpush1.bf16.msra.mxu0 %v6406_v6  ;;  %v9397_v6 = vld [vmem:[%s9728_s6] sm:$0xff] }
 0x36f   :  { %4810 = vmatpush1.bf16.msra.mxu1 %v6408_v7  ;;  %4729 = vmatprep.subr.bf16.mxu0 %v6415_v9  ;;  %v3181_v7 = vrot.slane %v9397_v6, %v7789_v53  ;;  %v3185_v9 = vrot.slane %v9397_v6, %v7800_v56 }
 0x370   :  { %4811 = vmatprep.subr.bf16.mxu1 %v6417_v13  ;;  %v3193_v13 = vrot.slane %v9397_v6, %v7991_v4  ;;  %v7060_v4 = vld [vmem:[%s9727_s7 + $0x100] ss:$8 sps:$4 sm:$0xff]  }
 0x372   :  { %4730 = vmatpush1.bf16.msra.mxu0 %v6414_v17 }
 0x373   :  { %4812 = vmatpush1.bf16.msra.mxu1 %v6416_v19  ;;  %4731 = vmatprep.subr.bf16.mxu0 %v6423_v20 }
 0x374   :  { %4813 = vmatprep.subr.bf16.mxu1 %v6425_v21 }
 0x376   :  { %4732 = vmatpush1.bf16.msra.mxu0 %v6422_v29 }
 0x377   :  { %4814 = vmatpush1.bf16.msra.mxu1 %v6424_v30  ;;  %4733 = vmatprep.subr.bf16.mxu0 %v6431_v31 }
 0x378   :  { %4815 = vmatprep.subr.bf16.mxu1 %v6433_v32 }
 0x37a   :  { %4734 = vmatpush1.bf16.msra.mxu0 %v6430_v33  ;;  %v7065_v33 = vld [vmem:[%s9727_s7 + $0x114] ss:$8 sps:$4 sm:$0xff]  }
 0x37b   :  { %4816 = vmatpush1.bf16.msra.mxu1 %v6432_v55  ;;  %5622 = vmatprep.subr.bf16.mxu0 %v7014_v34  ;;  %v7063_v34 = vld [vmem:[%s9727_s7 + $0x110] ss:$8 sps:$4 sm:$0xff]  }
 0x37d   :  { %4736 = vmatmul.mubr.bf16.vlgmr.msra.gmra.mrb[8].mxu0 %v8923_v57 }
 0x37e   :  { %4818 = vmatmul.mubr.bf16.vlgmr.msra.gmra.mrb[24].mxu1 %v8923_v57  ;;  %5623 = vmatpush1.bf16.msra.mxu0 %v7012_v35  ;;  %v7023_v57 = vld [vmem:[%s9727_s7 + $0x34] ss:$8 sps:$4 sm:$0xff]   ;;  %v7068_v35 = vld [vmem:[%s9727_s7 + $0x124] ss:$8 sps:$4 sm:$0xff]  }
 0x37f   :  { %5624 = vmatprep.subr.bf16.mxu0 %v7017_v16  ;;  %v7066_v16 = vld [vmem:[%s9727_s7 + $0x120] ss:$8 sps:$4 sm:$0xff]  }
 0x382   :  { %5625 = vmatpush1.bf16.msra.mxu0 %v7015_v36  ;;  %v7071_v36 = vld [vmem:[%s9727_s7 + $0x134] ss:$8 sps:$4 sm:$0xff]  }
 0x383   :  { %5626 = vmatprep.subr.bf16.mxu0 %v7020_v14  ;;  %v7069_v14 = vld [vmem:[%s9727_s7 + $0x130] ss:$8 sps:$4 sm:$0xff]  }
 0x386   :  { %5627 = vmatpush1.bf16.msra.mxu0 %v7018_v37  ;;  %v7074_v37 = vld [vmem:[%s9727_s7 + $0x144] ss:$8 sps:$4 sm:$0xff]  }
 0x387   :  { %5628 = vmatprep.subr.bf16.mxu0 %v7023_v57  ;;  %v7072_v57 = vld [vmem:[%s9727_s7 + $0x140] ss:$8 sps:$4 sm:$0xff]  }
 0x38a   :  { %5629 = vmatpush1.bf16.msra.mxu0 %v7021_v43  ;;  %v7077_v43 = vld [vmem:[%s9727_s7 + $0x154] ss:$8 sps:$4 sm:$0xff]  }
 0x38b   :  { %5630 = vmatprep.subr.bf16.mxu0 %v7026_v38  ;;  %v7075_v38 = vld [vmem:[%s9727_s7 + $0x150] ss:$8 sps:$4 sm:$0xff]  }
 0x38e   :  { %5631 = vmatpush1.bf16.msra.mxu0 %v7024_v39  ;;  %v7080_v39 = vld [vmem:[%s9727_s7 + $0x164] ss:$8 sps:$4 sm:$0xff]  }
 0x38f   :  { %5632 = vmatprep.subr.bf16.mxu0 %v7029_v40  ;;  %v7078_v40 = vld [vmem:[%s9727_s7 + $0x160] ss:$8 sps:$4 sm:$0xff]  }
 0x392   :  { %5633 = vmatpush1.bf16.msra.mxu0 %v7027_v27  ;;  %v7083_v27 = vld [vmem:[%s9727_s7 + $0x174] ss:$8 sps:$4 sm:$0xff]  }
 0x393   :  { %5634 = vmatprep.subr.bf16.mxu0 %v7032_v41  ;;  %v7081_v41 = vld [vmem:[%s9727_s7 + $0x170] ss:$8 sps:$4 sm:$0xff]  }
 0x396   :  { %5635 = vmatpush1.bf16.msra.mxu0 %v7030_v42  ;;  %v7086_v42 = vld [vmem:[%s9727_s7 + $0x184] ss:$8 sps:$4 sm:$0xff]  }
 0x397   :  { %5636 = vmatprep.subr.bf16.mxu0 %v7035_v44  ;;  %v7084_v44 = vld [vmem:[%s9727_s7 + $0x180] ss:$8 sps:$4 sm:$0xff]  }
 0x39a   :  { %5637 = vmatpush1.bf16.msra.mxu0 %v7033_v46  ;;  %v7089_v46 = vld [vmem:[%s9727_s7 + $0x194] ss:$8 sps:$4 sm:$0xff]  }
 0x39b   :  { %5638 = vmatprep.subr.bf16.mxu0 %v7038_v47  ;;  %v7087_v47 = vld [vmem:[%s9727_s7 + $0x190] ss:$8 sps:$4 sm:$0xff]  }
 0x39e   :  { %5639 = vmatpush1.bf16.msra.mxu0 %v7036_v49  ;;  %v7092_v49 = vld [vmem:[%s9727_s7 + $0x1a4] ss:$8 sps:$4 sm:$0xff]  }
 0x39f   :  { %5640 = vmatprep.subr.bf16.mxu0 %v7041_v8  ;;  %v7090_v8 = vld [vmem:[%s9727_s7 + $0x1a0] ss:$8 sps:$4 sm:$0xff]  }
 0x3a2   :  { %5641 = vmatpush1.bf16.msra.mxu0 %v7039_v51  ;;  %v7095_v51 = vld [vmem:[%s9727_s7 + $0x1b4] ss:$8 sps:$4 sm:$0xff]  }
 0x3a3   :  { %5642 = vmatprep.subr.bf16.mxu0 %v7044_v52  ;;  %v7093_v52 = vld [vmem:[%s9727_s7 + $0x1b0] ss:$8 sps:$4 sm:$0xff]  }
 0x3a6   :  { %5643 = vmatpush1.bf16.msra.mxu0 %v7042_v54  ;;  %v7098_v54 = vld [vmem:[%s9727_s7 + $0x1c4] ss:$8 sps:$4 sm:$0xff]  }
 0x3a7   :  { %5644 = vmatprep.subr.bf16.mxu0 %v7047_v18  ;;  %v7096_v18 = vld [vmem:[%s9727_s7 + $0x1c0] ss:$8 sps:$4 sm:$0xff]  }
 0x3aa   :  { %5645 = vmatpush1.bf16.msra.mxu0 %v7045_v58  ;;  %v7101_v58 = vld [vmem:[%s9727_s7 + $0x1d4] ss:$8 sps:$4 sm:$0xff]  }
 0x3ab   :  { %5646 = vmatprep.subr.bf16.mxu0 %v7050_v59  ;;  %v7099_v59 = vld [vmem:[%s9727_s7 + $0x1d0] ss:$8 sps:$4 sm:$0xff]  }
 0x3ae   :  { %5647 = vmatpush1.bf16.msra.mxu0 %v7048_v60  ;;  %v3189_v60 = vrot.slane %v9397_v6, %v7982_v1  ;;  %v7105_v1 = vld [vmem:[%s9727_s7 + $0x1f0] ss:$8 sps:$4 sm:$0xff]  }
 0x3af   :  { %5648 = vmatprep.subr.bf16.mxu0 %v7053_v61  ;;  %v7104_v61 = vld [vmem:[%s9727_s7 + $0x1e4] ss:$8 sps:$4 sm:$0xff]  }
 0x3b2   :  { %5649 = vmatpush1.bf16.msra.mxu0 %v7051_v62  ;;  %v7102_v62 = vld [vmem:[%s9727_s7 + $0x1e0] ss:$8 sps:$4 sm:$0xff]  }
 0x3b3   :  { %5650 = vmatprep.subr.bf16.mxu0 %v7056_v63 }
 0x3b6   :  { %5651 = vmatpush1.bf16.msra.mxu0 %v7054_v0  ;;  %v7107_v0 = vld [vmem:[%s9727_s7 + $0x1f4] ss:$8 sps:$4 sm:$0xff]  }
 0x3b7   :  { %5652 = vmatprep.subr.bf16.mxu0 %v7059_v2 }
 0x3ba   :  { %5653 = vmatpush1.bf16.msra.mxu0 %v7057_v3  ;;  %v7110_v3 = vld [vmem:[%s9727_s7 + $0x204] ss:$8 sps:$4 sm:$0xff]  }
 0x3bb   :  { %5663 = vmatprep.subr.bf16.mxu0 %v7062_v5  ;;  %v7108_v5 = vld [vmem:[%s9727_s7 + $0x200] ss:$8 sps:$4 sm:$0xff]  }
 0x3d0   :  { %v4573_v10 = vpop.f32.mrb[4].mxu0  ;;  %v9405_v11 = vpop.f32.mrb[20].mxu1 }
 0x3d1   :  { %v6566_v12 = vadd.f32 %v4573_v10, %v3181_v7  ;;  %v4575_v15 = vpop.f32.mrb[5].mxu0  ;;  %v4657_v17 = vpop.f32.mrb[21].mxu1  ;;  %v6568_v63 = vadd.f32 %v9405_v11, %v3189_v60  ;;  %v7116_v10 = vld [vmem:[%s9727_s7 + $0x224] ss:$8 sps:$4 sm:$0xff]   ;;  %v7114_v11 = vld [vmem:[%s9727_s7 + $0x220] ss:$8 sps:$4 sm:$0xff]  }
 0x3d2   :  { %v6567_v19 = vadd.f32 %v4575_v15, %v3185_v9  ;;  %v6569_v20 = vadd.f32 %v4657_v17, %v3193_v13  ;;  %v4577_v21 = vpop.f32.mrb[6].mxu0  ;;  %v4659_v22 = vpop.f32.mrb[22].mxu1  ;;  %v7113_v9 = vld [vmem:[%s9727_s7 + $0x214] ss:$8 sps:$4 sm:$0xff]   ;;  %v7111_v13 = vld [vmem:[%s9727_s7 + $0x210] ss:$8 sps:$4 sm:$0xff]  }
 0x3d3   :  { %v4826_v24 = vmax.f32 %v6566_v12, 0.0  ;;  %v4578_v25 = vpop.f32.mrb[7].mxu0  ;;  %v4660_v28 = vpop.f32.mrb[23].mxu1  ;;  %v4828_v2 = vmax.f32 %v6568_v63, 0.0  ;;  %v7119_v12 = vld [vmem:[%s9727_s7 + $0x234] ss:$8 sps:$4 sm:$0xff]  }
 0x3d4   :  { %v4827_v29 = vmax.f32 %v6567_v19, 0.0  ;;  %v4829_v30 = vmax.f32 %v6569_v20, 0.0  ;;  %v7117_v15 = vld [vmem:[%s9727_s7 + $0x230] ss:$8 sps:$4 sm:$0xff]   ;;  %v7122_v17 = vld [vmem:[%s9727_s7 + $0x244] ss:$8 sps:$4 sm:$0xff]  }
 0x3d5   :  { %v4834_v32 = vpack.c.bf16 %v4826_v24, %v4826_v24  ;;  %v4836_v7 = vpack.c.bf16 %v4828_v2, %v4828_v2  ;;  %v7120_v19 = vld [vmem:[%s9727_s7 + $0x240] ss:$8 sps:$4 sm:$0xff]   ;;  %v7125_v20 = vld [vmem:[%s9727_s7 + $0x254] ss:$8 sps:$4 sm:$0xff]   ;;  %v7123_v21 = vld [vmem:[%s9727_s7 + $0x250] ss:$8 sps:$4 sm:$0xff]  }
 0x3d6   :  { %v4835_v31 = vpack.c.bf16 %v4827_v29, %v4827_v29  ;;  %v4837_v55 = vpack.c.bf16 %v4829_v30, %v4829_v30  ;;  %v7128_v22 = vld [vmem:[%s9727_s7 + $0x264] ss:$8 sps:$4 sm:$0xff]   ;;  %v7126_v24 = vld [vmem:[%s9727_s7 + $0x260] ss:$8 sps:$4 sm:$0xff]   ;;  %v7131_v25 = vld [vmem:[%s9727_s7 + $0x274] ss:$8 sps:$4 sm:$0xff]  }
 0x3d7   :  { %v7129_v28 = vld [vmem:[%s9727_s7 + $0x270] ss:$8 sps:$4 sm:$0xff]   ;;  %v7134_v29 = vld [vmem:[%s9727_s7 + $0x284] ss:$8 sps:$4 sm:$0xff]   ;;  %v7132_v30 = vld [vmem:[%s9727_s7 + $0x280] ss:$8 sps:$4 sm:$0xff]  }
 0x3d8   :  { %5654 = vmatprep.mubr.bf16.mxu0 %v4835_v31  ;;  %v7137_v31 = vld [vmem:[%s9727_s7 + $0x294] ss:$8 sps:$4 sm:$0xff]   ;;  %v7156_v60 = vld [vmem:[%s9727_s7 + $0x300] ss:$8 sps:$4 sm:$0xff]  }
 0x3d9   :  { %5655 = vmatmul.mubr.bf16.vlgmr.msra.gmra.mrb[12].mxu0 %v4834_v32  ;;  %v7140_v32 = vld [vmem:[%s9727_s7 + $0x2a4] ss:$8 sps:$4 sm:$0xff]   ;;  %v7162_v2 = vld [vmem:[%s9727_s7 + $0x320] ss:$8 sps:$4 sm:$0xff]  }
 0x3da   :  { %5664 = vmatpush1.bf16.msra.mxu0 %v7060_v4  ;;  %5695 = vmatprep.mubr.bf16.mxu0 %v4837_v55  ;;  %v7135_v4 = vld [vmem:[%s9727_s7 + $0x290] ss:$8 sps:$4 sm:$0xff]   ;;  %v7143_v55 = vld [vmem:[%s9727_s7 + $0x2b4] ss:$8 sps:$4 sm:$0xff]  }
 0x3db   :  { %5665 = vmatprep.subr.bf16.mxu0 %v7065_v33  ;;  %v7138_v33 = vld [vmem:[%s9727_s7 + $0x2a0] ss:$8 sps:$4 sm:$0xff]  }
 0x3de   :  { %5666 = vmatpush1.bf16.msra.mxu0 %v7063_v34  ;;  %v7141_v34 = vld [vmem:[%s9727_s7 + $0x2b0] ss:$8 sps:$4 sm:$0xff]  }
 0x3df   :  { %5667 = vmatprep.subr.bf16.mxu0 %v7068_v35  ;;  %v7146_v35 = vld [vmem:[%s9727_s7 + $0x2c4] ss:$8 sps:$4 sm:$0xff]  }
 0x3e2   :  { %5668 = vmatpush1.bf16.msra.mxu0 %v7066_v16  ;;  %v7144_v16 = vld [vmem:[%s9727_s7 + $0x2c0] ss:$8 sps:$4 sm:$0xff]  }
 0x3e3   :  { %5669 = vmatprep.subr.bf16.mxu0 %v7071_v36  ;;  %v7149_v36 = vld [vmem:[%s9727_s7 + $0x2d4] ss:$8 sps:$4 sm:$0xff]  }
 0x3e6   :  { %5670 = vmatpush1.bf16.msra.mxu0 %v7069_v14  ;;  %v7147_v14 = vld [vmem:[%s9727_s7 + $0x2d0] ss:$8 sps:$4 sm:$0xff]  }
 0x3e7   :  { %5671 = vmatprep.subr.bf16.mxu0 %v7074_v37  ;;  %v7152_v37 = vld [vmem:[%s9727_s7 + $0x2e4] ss:$8 sps:$4 sm:$0xff]  }
 0x3ea   :  { %5672 = vmatpush1.bf16.msra.mxu0 %v7072_v57  ;;  %v3197_v57 = vrot.slane %v9397_v6, %v184_v23 }
 0x3eb   :  { %5673 = vmatprep.subr.bf16.mxu0 %v7077_v43  ;;  %v7150_v43 = vld [vmem:[%s9727_s7 + $0x2e0] ss:$8 sps:$4 sm:$0xff]  }
 0x3ee   :  { %5674 = vmatpush1.bf16.msra.mxu0 %v7075_v38  ;;  %v3201_v38 = vrot.slane %v9397_v6, %v188_v26  ;;  %v7153_v26 = vld [vmem:[%s9727_s7 + $0x2f0] ss:$8 sps:$4 sm:$0xff]  }
 0x3ef   :  { %5675 = vmatprep.subr.bf16.mxu0 %v7080_v39  ;;  %v3209_v39 = vrot.slane %v9397_v6, %v196_v48 }
 0x3f2   :  { %5676 = vmatpush1.bf16.msra.mxu0 %v7078_v40  ;;  %v7155_v40 = vld [vmem:[%s9727_s7 + $0x2f4] ss:$8 sps:$4 sm:$0xff]  }
 0x3f3   :  { %5677 = vmatprep.subr.bf16.mxu0 %v7083_v27 }
 0x3f6   :  { %5678 = vmatpush1.bf16.msra.mxu0 %v7081_v41 }
 0x3f7   :  { %5679 = vmatprep.subr.bf16.mxu0 %v7086_v42 }
 0x3fa   :  { %5680 = vmatpush1.bf16.msra.mxu0 %v7084_v44 }
 0x3fb   :  { %5681 = vmatprep.subr.bf16.mxu0 %v7089_v46 }
 0x3fe   :  { %5682 = vmatpush1.bf16.msra.mxu0 %v7087_v47 }
 0x3ff   :  { %5683 = vmatprep.subr.bf16.mxu0 %v7092_v49 }
 0x402   :  { %5684 = vmatpush1.bf16.msra.mxu0 %v7090_v8 }
 0x403   :  { %5685 = vmatprep.subr.bf16.mxu0 %v7095_v51 }
 0x406   :  { %5686 = vmatpush1.bf16.msra.mxu0 %v7093_v52  ;;  %v7158_v52 = vld [vmem:[%s9727_s7 + $0x304] ss:$8 sps:$4 sm:$0xff]  }
 0x407   :  { %5687 = vmatprep.subr.bf16.mxu0 %v7098_v54 }
 0x40a   :  { %5688 = vmatpush1.bf16.msra.mxu0 %v7096_v18 }
 0x40b   :  { %5689 = vmatprep.subr.bf16.mxu0 %v7101_v58 }
 0x40e   :  { %5690 = vmatpush1.bf16.msra.mxu0 %v7099_v59 }
 0x40f   :  { %5691 = vmatprep.subr.bf16.mxu0 %v7104_v61 }
 0x412   :  { %5692 = vmatpush1.bf16.msra.mxu0 %v7102_v62  ;;  %v7161_v62 = vld [vmem:[%s9727_s7 + $0x314] ss:$8 sps:$4 sm:$0xff]  }
 0x413   :  { %5693 = vmatprep.subr.bf16.mxu0 %v7107_v0  ;;  %v7159_v0 = vld [vmem:[%s9727_s7 + $0x310] ss:$8 sps:$4 sm:$0xff]  }
 0x416   :  { %5694 = vmatpush1.bf16.msra.mxu0 %v7105_v1  ;;  %v7164_v1 = vld [vmem:[%s9727_s7 + $0x324] ss:$8 sps:$4 sm:$0xff]  }
 0x417   :  { %5704 = vmatprep.subr.bf16.mxu0 %v7110_v3  ;;  %v7167_v3 = vld [vmem:[%s9727_s7 + $0x334] ss:$8 sps:$4 sm:$0xff]  }
 0x419   :  { %5696 = vmatmul.mubr.bf16.vlgmr.msra.gmra.mrb[12].mxu0 %v4836_v7  ;;  %v7170_v7 = vld [vmem:[%s9727_s7 + $0x344] ss:$8 sps:$4 sm:$0xff]  }
 0x41a   :  { %5705 = vmatpush1.bf16.msra.mxu0 %v7108_v5  ;;  %v7165_v5 = vld [vmem:[%s9727_s7 + $0x330] ss:$8 sps:$4 sm:$0xff]  }
 0x41b   :  { %5706 = vmatprep.subr.bf16.mxu0 %v7113_v9  ;;  %v7168_v9 = vld [vmem:[%s9727_s7 + $0x340] ss:$8 sps:$4 sm:$0xff]  }
 0x41e   :  { %5707 = vmatpush1.bf16.msra.mxu0 %v7111_v13  ;;  %v7173_v13 = vld [vmem:[%s9727_s7 + $0x354] ss:$8 sps:$4 sm:$0xff]  }
 0x41f   :  { %5708 = vmatprep.subr.bf16.mxu0 %v7116_v10  ;;  %v7171_v10 = vld [vmem:[%s9727_s7 + $0x350] ss:$8 sps:$4 sm:$0xff]  }
 0x422   :  { %5709 = vmatpush1.bf16.msra.mxu0 %v7114_v11  ;;  %v7176_v11 = vld [vmem:[%s9727_s7 + $0x364] ss:$8 sps:$4 sm:$0xff]  }
 0x423   :  { %5710 = vmatprep.subr.bf16.mxu0 %v7119_v12  ;;  %v7174_v12 = vld [vmem:[%s9727_s7 + $0x360] ss:$8 sps:$4 sm:$0xff]  }
 0x426   :  { %5711 = vmatpush1.bf16.msra.mxu0 %v7117_v15  ;;  %v7179_v15 = vld [vmem:[%s9727_s7 + $0x374] ss:$8 sps:$4 sm:$0xff]  }
 0x427   :  { %5712 = vmatprep.subr.bf16.mxu0 %v7122_v17  ;;  %v7177_v17 = vld [vmem:[%s9727_s7 + $0x370] ss:$8 sps:$4 sm:$0xff]  }
 0x42a   :  { %5713 = vmatpush1.bf16.msra.mxu0 %v7120_v19  ;;  %v7182_v19 = vld [vmem:[%s9727_s7 + $0x384] ss:$8 sps:$4 sm:$0xff]  }
 0x42b   :  { %5714 = vmatprep.subr.bf16.mxu0 %v7125_v20  ;;  %v7180_v20 = vld [vmem:[%s9727_s7 + $0x380] ss:$8 sps:$4 sm:$0xff]  }
 0x42e   :  { %5715 = vmatpush1.bf16.msra.mxu0 %v7123_v21  ;;  %v7185_v21 = vld [vmem:[%s9727_s7 + $0x394] ss:$8 sps:$4 sm:$0xff]  }
 0x42f   :  { %5716 = vmatprep.subr.bf16.mxu0 %v7128_v22  ;;  %v7183_v22 = vld [vmem:[%s9727_s7 + $0x390] ss:$8 sps:$4 sm:$0xff]  }
 0x432   :  { %5717 = vmatpush1.bf16.msra.mxu0 %v7126_v24  ;;  %v7188_v24 = vld [vmem:[%s9727_s7 + $0x3a4] ss:$8 sps:$4 sm:$0xff]  }
 0x433   :  { %5718 = vmatprep.subr.bf16.mxu0 %v7131_v25  ;;  %v7186_v25 = vld [vmem:[%s9727_s7 + $0x3a0] ss:$8 sps:$4 sm:$0xff]  }
 0x436   :  { %5719 = vmatpush1.bf16.msra.mxu0 %v7129_v28  ;;  %v7191_v28 = vld [vmem:[%s9727_s7 + $0x3b4] ss:$8 sps:$4 sm:$0xff]  }
 0x437   :  { %5720 = vmatprep.subr.bf16.mxu0 %v7134_v29  ;;  %v7189_v29 = vld [vmem:[%s9727_s7 + $0x3b0] ss:$8 sps:$4 sm:$0xff]  }
 0x43a   :  { %5721 = vmatpush1.bf16.msra.mxu0 %v7132_v30  ;;  %v7194_v30 = vld [vmem:[%s9727_s7 + $0x3c4] ss:$8 sps:$4 sm:$0xff]  }
 0x43b   :  { %5722 = vmatprep.subr.bf16.mxu0 %v7137_v31  ;;  %v7192_v31 = vld [vmem:[%s9727_s7 + $0x3c0] ss:$8 sps:$4 sm:$0xff]  }
 0x43e   :  { %5723 = vmatpush1.bf16.msra.mxu0 %v7135_v4  ;;  %v7197_v4 = vld [vmem:[%s9727_s7 + $0x3d4] ss:$8 sps:$4 sm:$0xff]  }
 0x43f   :  { %5724 = vmatprep.subr.bf16.mxu0 %v7140_v32  ;;  %v7195_v32 = vld [vmem:[%s9727_s7 + $0x3d0] ss:$8 sps:$4 sm:$0xff]  }
 0x442   :  { %5725 = vmatpush1.bf16.msra.mxu0 %v7138_v33  ;;  %v3205_v33 = vrot.slane %v9397_v6, %v192_v45 }
 0x443   :  { %5726 = vmatprep.subr.bf16.mxu0 %v7143_v55  ;;  %v7200_v55 = vld [vmem:[%s9727_s7 + $0x3e4] ss:$8 sps:$4 sm:$0xff]  }
 0x446   :  { %5727 = vmatpush1.bf16.msra.mxu0 %v7141_v34  ;;  %v7198_v34 = vld [vmem:[%s9727_s7 + $0x3e0] ss:$8 sps:$4 sm:$0xff]  }
 0x447   :  { %5728 = vmatprep.subr.bf16.mxu0 %v7146_v35 }
 0x44a   :  { %5729 = vmatpush1.bf16.msra.mxu0 %v7144_v16  ;;  %v7203_v16 = vld [vmem:[%s9727_s7 + $0x3f4] ss:$8 sps:$4 sm:$0xff]  }
 0x44b   :  { %5730 = vmatprep.subr.bf16.mxu0 %v7149_v36  ;;  %v4970_v36 = vld [vmem:[%s9729_s8] sm:$0x3] }
 0x44e   :  { %5731 = vmatpush1.bf16.msra.mxu0 %v7147_v14  ;;  %v4975_v14 = vrot.slane %v4970_v36, %v7789_v53 }
 0x44f   :  { %5732 = vmatprep.subr.bf16.mxu0 %v7152_v37  ;;  %v4979_v37 = vrot.slane %v4970_v36, %v7800_v56 }
 0x450   :  { %v4737_v27 = vpop.f32.mrb[8].mxu0 }
 0x451   :  { %v6570_v23 = vadd.f32 %v4737_v27, %v3197_v57  ;;  %v9605_v41 = vpop.f32.mrb[24].mxu1  ;;  %v4739_v42 = vpop.f32.mrb[9].mxu0 }
 0x452   :  { %v6571_v44 = vadd.f32 %v4739_v42, %v3201_v38  ;;  %v4821_v46 = vpop.f32.mrb[25].mxu1  ;;  %5733 = vmatpush1.bf16.msra.mxu0 %v7150_v43  ;;  %v4741_v47 = vpop.f32.mrb[10].mxu0  ;;  %v6572_v35 = vadd.f32 %v9605_v41, %v3205_v33 }
 0x453   :  { %v4830_v49 = vmax.f32 %v6570_v23, 0.0  ;;  %v6573_v8 = vadd.f32 %v4821_v46, %v3209_v39  ;;  %v4823_v48 = vpop.f32.mrb[26].mxu1  ;;  %v4742_v51 = vpop.f32.mrb[11].mxu0  ;;  %5734 = vmatprep.subr.bf16.mxu0 %v7155_v40 }
 0x454   :  { %v4831_v54 = vmax.f32 %v6571_v44, 0.0  ;;  %v4824_v18 = vpop.f32.mrb[27].mxu1  ;;  %v4832_v45 = vmax.f32 %v6572_v35, 0.0 }
 0x455   :  { %v4833_v58 = vmax.f32 %v6573_v8, 0.0  ;;  %v4838_v61 = vpack.c.bf16 %v4830_v49, %v4830_v49 }
 0x456   :  { %v4839_v59 = vpack.c.bf16 %v4831_v54, %v4831_v54  ;;  %5735 = vmatpush1.bf16.msra.mxu0 %v7153_v26  ;;  %v4840_v6 = vpack.c.bf16 %v4832_v45, %v4832_v45 }
 0x457   :  { %5745 = vmatprep.subr.bf16.mxu0 %v7158_v52  ;;  %v4841_v63 = vpack.c.bf16 %v4833_v58, %v4833_v58 }
 0x458   :  { %5736 = vmatprep.mubr.bf16.mxu0 %v4839_v59 }
 0x459   :  { %5737 = vmatmul.mubr.bf16.vlgmr.msra.gmra.mrb[12].mxu0 %v4838_v61 }
 0x45a   :  { %5746 = vmatpush1.bf16.msra.mxu0 %v7156_v60  ;;  %5777 = vmatprep.mubr.bf16.mxu0 %v4841_v63 }
 0x45b   :  { %5747 = vmatprep.subr.bf16.mxu0 %v7161_v62 }
 0x45e   :  { %5748 = vmatpush1.bf16.msra.mxu0 %v7159_v0 }
 0x45f   :  { %5749 = vmatprep.subr.bf16.mxu0 %v7164_v1 }
 0x462   :  { %5750 = vmatpush1.bf16.msra.mxu0 %v7162_v2 }
 0x463   :  { %5751 = vmatprep.subr.bf16.mxu0 %v7167_v3 }
 0x466   :  { %5752 = vmatpush1.bf16.msra.mxu0 %v7165_v5 }
 0x467   :  { %5753 = vmatprep.subr.bf16.mxu0 %v7170_v7 }
 0x46a   :  { %5754 = vmatpush1.bf16.msra.mxu0 %v7168_v9 }
 0x46b   :  { %5755 = vmatprep.subr.bf16.mxu0 %v7173_v13 }
 0x46e   :  { %5756 = vmatpush1.bf16.msra.mxu0 %v7171_v10 }
 0x46f   :  { %5757 = vmatprep.subr.bf16.mxu0 %v7176_v11 }
 0x472   :  { %5758 = vmatpush1.bf16.msra.mxu0 %v7174_v12 }
 0x473   :  { %5759 = vmatprep.subr.bf16.mxu0 %v7179_v15 }
 0x476   :  { %5760 = vmatpush1.bf16.msra.mxu0 %v7177_v17 }
 0x477   :  { %5761 = vmatprep.subr.bf16.mxu0 %v7182_v19 }
 0x47a   :  { %5762 = vmatpush1.bf16.msra.mxu0 %v7180_v20 }
 0x47b   :  { %5763 = vmatprep.subr.bf16.mxu0 %v7185_v21 }
 0x47e   :  { %5764 = vmatpush1.bf16.msra.mxu0 %v7183_v22 }
 0x47f   :  { %5765 = vmatprep.subr.bf16.mxu0 %v7188_v24 }
 0x482   :  { %5766 = vmatpush1.bf16.msra.mxu0 %v7186_v25 }
 0x483   :  { %5767 = vmatprep.subr.bf16.mxu0 %v7191_v28 }
 0x486   :  { %5768 = vmatpush1.bf16.msra.mxu0 %v7189_v29 }
 0x487   :  { %5769 = vmatprep.subr.bf16.mxu0 %v7194_v30 }
 0x48a   :  { %5770 = vmatpush1.bf16.msra.mxu0 %v7192_v31 }
 0x48b   :  { %5771 = vmatprep.subr.bf16.mxu0 %v7197_v4 }
 0x48e   :  { %5772 = vmatpush1.bf16.msra.mxu0 %v7195_v32 }
 0x48f   :  { %5773 = vmatprep.subr.bf16.mxu0 %v7200_v55 }
 0x492   :  { %5774 = vmatpush1.bf16.msra.mxu0 %v7198_v34 }
 0x493   :  { %5775 = vmatprep.subr.bf16.mxu0 %v7203_v16 }
 0x496   :  { %5776 = vmatpush1.bf16.msra.mxu0 %v7201_v50 }
 0x499   :  { %5778 = vmatmul.mubr.bf16.vlgmr.msra.gmra.mrb[12].mxu0 %v4840_v6 }
 0x56c   :  { %v5779_v57 = vpop.f32.mrb[12].mxu0 }
 0x56d   :  { %v6574_v43 = vadd.f32 %v5779_v57, %v4975_v14  ;;  %v5781_v38 = vpop.f32.mrb[13].mxu0 }
 0x56e   :  { %v6575_v39 = vadd.f32 %v5781_v38, %v4979_v37  ;;  %v5783_v40 = vpop.f32.mrb[14].mxu0 }
 0x56f   :  { %7204 = vtanh.f32 %v6574_v43  ;;  %v5784_v27 = vpop.f32.mrb[15].mxu0 }
 0x570   :  { %7206 = vtanh.f32 %v6575_v39 }
 0x579   :  { %v7205_v23 = vpop.eup %7204 }
 0x57a   :  { %v7207_v41 = vpop.eup %7206  ;;  %5788 = vst [vmem:[%s9730_s9] sm:$0xff] %v7205_v23 }
 0x57b   :  { %5789 = vst [vmem:[%s9730_s9 + $0x8] sm:$0xff] %v7207_v41 }

</bundles_post_ra>
